<compile_context>
chip_gen: v7x
topology: tpu7x:2x2x1
jax: 0.10.0
libtpu: 0.0.40
codegen_flags: <defaults>
</compile_context>

<pallas_src>
import math

import jax
import jax.numpy as jnp
import numpy as np
from jax.experimental import pallas as pl
from jax.experimental.pallas import tpu as pltpu

DIM = 32
NUM_HEADS = 4
WINDOW_SIZE = 4
N_TOKENS = WINDOW_SIZE * WINDOW_SIZE
MLP_RATIO = 4.0
HIDDEN = int(DIM * MLP_RATIO)
HEAD_DIM = DIM // NUM_HEADS
EPS = 1e-5          # nn.LayerNorm default
NEG_INF = -1e9      # cross-window mask value (underflows to exactly 0 after exp)


def _gelu_tanh(x):
    # tanh-based GELU (max |err| vs exact erf GELU ~3e-4, well inside 1e-2 tolerance).
    # tanh lowers to the EUP, which is otherwise idle while the MLP matmuls run.
    c = math.sqrt(2.0 / math.pi)
    return 0.5 * x * (1.0 + jnp.tanh(c * (x + 0.044715 * x * x * x)))


def swin_block_kernel(x_ref,
                      qkvw_ref, qkvb_ref, mask_ref,
                      projw_ref, projb_ref,
                      fc1w_ref, fc1b_ref,
                      fc2w_ref, fc2b_ref,
                      o_ref):
    WB, N, C = x_ref.shape          # block of WB windows
    M = WB * N                      # fold windows into the matmul M dimension

    x = x_ref[...].reshape(M, C)    # f32
    shortcut = x

    # ---- norm1 (affine + q-scale already folded into qkv weights); one-pass stats
    mu = jnp.mean(x, axis=-1, keepdims=True)
    var = jnp.mean(x * x, axis=-1, keepdims=True) - mu * mu
    xn = ((x - mu) * jax.lax.rsqrt(var + EPS)).astype(jnp.bfloat16)

    # ---- qkv: one matmul for all WB windows (bf16 operands, f32 accumulate)
    qkv = jnp.dot(xn, qkvw_ref[...], preferred_element_type=jnp.float32) + qkvb_ref[...]
    q = qkv[:, 0 * DIM:1 * DIM].astype(jnp.bfloat16)
    k = qkv[:, 1 * DIM:2 * DIM].astype(jnp.bfloat16)
    v = qkv[:, 2 * DIM:3 * DIM].astype(jnp.bfloat16)

    # ---- block-diagonal masked attention over the full M rows (per head: 2 matmuls)
    head_outs = []
    for h in range(NUM_HEADS):
        sl = slice(h * HEAD_DIM, (h + 1) * HEAD_DIM)
        s = jnp.einsum('md,nd->mn', q[:, sl], k[:, sl],
                       preferred_element_type=jnp.float32)            # (M, M)
        s = s + mask_ref[h]                                           # rel bias + -1e9 mask
        s = s - jnp.max(s, axis=-1, keepdims=True)
        p = jnp.exp(s)
        p = p * pl.reciprocal(jnp.sum(p, axis=-1, keepdims=True), approx=True)
        head_outs.append(jnp.dot(p.astype(jnp.bfloat16), v[:, sl],
                                 preferred_element_type=jnp.float32))  # (M, HEAD_DIM)
    attn = jnp.concatenate(head_outs, axis=-1)                         # (M, C)
    attn = jnp.dot(attn.astype(jnp.bfloat16), projw_ref[...],
                   preferred_element_type=jnp.float32) + projb_ref[...]

    # ---- residual 1 (drop_path is identity)
    x1 = shortcut + attn

    # ---- norm2 (affine folded into fc1) + MLP
    mu2 = jnp.mean(x1, axis=-1, keepdims=True)
    var2 = jnp.mean(x1 * x1, axis=-1, keepdims=True) - mu2 * mu2
    yn = ((x1 - mu2) * jax.lax.rsqrt(var2 + EPS)).astype(jnp.bfloat16)

    h1 = jnp.dot(yn, fc1w_ref[...], preferred_element_type=jnp.float32) + fc1b_ref[...]
    h1 = _gelu_tanh(h1)
    mlp = jnp.dot(h1.astype(jnp.bfloat16), fc2w_ref[...],
                  preferred_element_type=jnp.float32) + fc2b_ref[...]

    o_ref[...] = (x1 + mlp).reshape(WB, N, C)


def _pick_wb(B, target_rows=256):
    # As many windows per step as fills a 256-row MXU pass, but keep >= 2 grid
    # steps (when B >= 2) so v7x's two TensorCores both get work.
    wb = max(1, min(B, target_rows // N_TOKENS))
    if B >= 2:
        wb = min(wb, pl.cdiv(B, 2))
    return wb


def _build_mask_bias(relb, wb):
    # (NUM_HEADS, M, M): relative-position bias on the 16x16 diagonal blocks,
    # NEG_INF everywhere else -> softmax over M lanes only mixes within a window.
    eye = jnp.eye(wb, dtype=jnp.float32)
    m = jnp.where(eye[None, :, None, :, None] > 0,
                  relb[:, None, :, None, :],
                  NEG_INF)
    return m.reshape(NUM_HEADS, wb * N_TOKENS, wb * N_TOKENS)


@jax.jit
def swin_block(x, n1w, n1b, qkvw, qkvb, relb, projw, projb,
               n2w, n2b, fc1w, fc1b, fc2w, fc2b):
    B, N, C = x.shape
    WB = _pick_wb(B)
    grid = pl.cdiv(B, WB)
    B_pad = grid * WB
    if B_pad != B:
        # Pad with whole zero windows (block-diagonal mask keeps them isolated),
        # sliced off at the end.  Avoids the WB=1 perf cliff for non-divisor B.
        x = jnp.pad(x, ((0, B_pad - B), (0, 0), (0, 0)))
    M = WB * N

    # ---- fold LayerNorm affines + q scale into the linear weights (exact rewrite)
    scale = HEAD_DIM ** -0.5
    qkvw_f = n1w.reshape(C, 1) * qkvw                      # diag(n1w) @ Wqkv
    qkvb_f = n1b.reshape(1, C) @ qkvw + qkvb               # n1b @ Wqkv + bqkv
    col_scale = jnp.concatenate(
        [jnp.full((1, C), scale, jnp.float32), jnp.ones((1, 2 * C), jnp.float32)], axis=1)
    qkvw_f = qkvw_f * col_scale                            # q columns also absorb scale
    qkvb_f = qkvb_f * col_scale
    fc1w_f = n2w.reshape(C, 1) * fc1w
    fc1b_f = n2b.reshape(1, C) @ fc1w + fc1b

    mask = _build_mask_bias(relb, WB)                      # (H, M, M) f32

    weights = (qkvw_f.astype(jnp.bfloat16), qkvb_f, mask,
               projw.astype(jnp.bfloat16), projb,
               fc1w_f.astype(jnp.bfloat16), fc1b_f,
               fc2w.astype(jnp.bfloat16), fc2b)

    def fullspec(a):
        nd = a.ndim
        return pl.BlockSpec(a.shape, lambda b, _nd=nd: (0,) * _nd)

    # Advisory cost estimate for the XLA scheduler.
    flops = int(B_pad * N * (2 * C * 3 * C + 2 * C * C + 2 * 2 * C * HIDDEN)
                + grid * NUM_HEADS * 2 * (2 * M * M * HEAD_DIM))
    transcendentals = int(grid * (NUM_HEADS * M * M + M * HIDDEN + 2 * M))
    wbytes = sum(int(w.size) * w.dtype.itemsize for w in weights)
    bytes_accessed = int(2 * B_pad * N * C * 4 + wbytes)

    out = pl.pallas_call(
        swin_block_kernel,
        out_shape=jax.ShapeDtypeStruct((B_pad, N, C), x.dtype),
        grid_spec=pltpu.PrefetchScalarGridSpec(
            num_scalar_prefetch=0,
            grid=(grid,),
            in_specs=[pl.BlockSpec((WB, N, C), lambda b: (b, 0, 0))]
                     + [fullspec(w) for w in weights],
            out_specs=pl.BlockSpec((WB, N, C), lambda b: (b, 0, 0)),
        ),
        compiler_params=pltpu.CompilerParams(dimension_semantics=("parallel",)),
        cost_estimate=pl.CostEstimate(flops=flops,
                                      transcendentals=transcendentals,
                                      bytes_accessed=bytes_accessed),
    )(x, *weights)
    return out[:B] if B_pad != B else out


def make_rel_pos_index(ws):
    coords = jnp.stack(jnp.meshgrid(jnp.arange(ws), jnp.arange(ws), indexing="ij"))
    coords_flat = coords.reshape(2, -1)                      # (2, N)
    rel = coords_flat[:, :, None] - coords_flat[:, None, :]  # (2, N, N)
    rel = rel.transpose(1, 2, 0)                             # (N, N, 2)
    rel = rel.at[:, :, 0].add(ws - 1)
    rel = rel.at[:, :, 1].add(ws - 1)
    rel = rel.at[:, :, 0].multiply(2 * ws - 1)
    return rel.sum(-1)                                       # (N, N)


def reference(x, n1w, n1b, qkvw, qkvb, relb, projw, projb,
              n2w, n2b, fc1w, fc1b, fc2w, fc2b):
    B, N, C = x.shape

    def ln(v, w, b):
        mu = jnp.mean(v, -1, keepdims=True)
        var = jnp.mean((v - mu) ** 2, -1, keepdims=True)
        return (v - mu) / jnp.sqrt(var + EPS) * w + b

    xn = ln(x, n1w, n1b)
    qkv = xn @ qkvw + qkvb
    qkv = qkv.reshape(B, N, 3, NUM_HEADS, HEAD_DIM).transpose(2, 0, 3, 1, 4)
    q, k, v = qkv[0] * HEAD_DIM ** -0.5, qkv[1], qkv[2]
    attn = jnp.einsum("bhnd,bhmd->bhnm", q, k) + relb[None]
    attn = jax.nn.softmax(attn, axis=-1)
    out = jnp.einsum("bhnm,bhmd->bhnd", attn, v).transpose(0, 2, 1, 3).reshape(B, N, C)
    out = out @ projw + projb
    x1 = x + out
    yn = ln(x1, n2w, n2b)
    h = jax.nn.gelu(yn @ fc1w + fc1b, approximate=False)
    return x1 + h @ fc2w + fc2b


if __name__ == "__main__":
    key = jax.random.PRNGKey(0)
    keys = jax.random.split(key, 10)
    B = 16  # num_windows * batch -> WB=8 windows/step (M=128 rows), 2 parallel grid steps

    x = jax.random.normal(keys[0], (B, N_TOKENS, DIM), jnp.float32)

    init = lambda k, shape: 0.02 * jax.random.normal(k, shape, jnp.float32)
    # Linear weights are stored pre-transposed as (in, out) so the kernel does x @ W.
    n1w = jnp.ones((1, DIM), jnp.float32)
    n1b = jnp.zeros((1, DIM), jnp.float32)
    qkvw = init(keys[1], (DIM, 3 * DIM))
    qkvb = init(keys[2], (1, 3 * DIM))
    table = init(keys[3], ((2 * WINDOW_SIZE - 1) ** 2, NUM_HEADS))
    rel_idx = make_rel_pos_index(WINDOW_SIZE)
    relb = table[rel_idx.reshape(-1)].reshape(N_TOKENS, N_TOKENS, NUM_HEADS).transpose(2, 0, 1)
    relb = jnp.asarray(relb, jnp.float32)                    # (num_heads, N, N)
    projw = init(keys[4], (DIM, DIM))
    projb = init(keys[5], (1, DIM))
    n2w = jnp.ones((1, DIM), jnp.float32)
    n2b = jnp.zeros((1, DIM), jnp.float32)
    fc1w = init(keys[6], (DIM, HIDDEN))
    fc1b = init(keys[7], (1, HIDDEN))
    fc2w = init(keys[8], (HIDDEN, DIM))
    fc2b = init(keys[9], (1, DIM))

    params = (n1w, n1b, qkvw, qkvb, relb, projw, projb, n2w, n2b, fc1w, fc1b, fc2w, fc2b)

    out = swin_block(x, *params)
    jax.block_until_ready(out)

    ref = reference(x, *params)
    np.testing.assert_allclose(np.asarray(out), np.asarray(ref), atol=1e-2, rtol=1e-2)
    print("KERNEL_OK")
</pallas_src>

<mosaic_0001>
module attributes {stable_mosaic.version = 11 : i64} {
  func.func @swin_block_kernel(%arg0: i32, %arg1: memref<8x16x32xf32, #tpu.memory_space<vmem>>, %arg2: memref<32x96xbf16, #tpu.memory_space<vmem>>, %arg3: memref<1x96xf32, #tpu.memory_space<vmem>>, %arg4: memref<4x128x128xf32, #tpu.memory_space<vmem>>, %arg5: memref<32x32xbf16, #tpu.memory_space<vmem>>, %arg6: memref<1x32xf32, #tpu.memory_space<vmem>>, %arg7: memref<32x128xbf16, #tpu.memory_space<vmem>>, %arg8: memref<1x128xf32, #tpu.memory_space<vmem>>, %arg9: memref<128x32xbf16, #tpu.memory_space<vmem>>, %arg10: memref<1x32xf32, #tpu.memory_space<vmem>>, %arg11: memref<8x16x32xf32, #tpu.memory_space<vmem>>) attributes {dimension_semantics = [#tpu.dimension_semantics<parallel>], iteration_bounds = array<i64: 2>, scalar_prefetch = 0 : i64, scratch_operands = 0 : i64, tpu.core_type = #tpu.core_type<tc>, window_params = [{transform_indices = @transform_0, window_bounds = array<i64: 8, 16, 32>}, {pipeline_mode = #tpu.pipeline_mode<synchronous>, transform_indices = @transform_1, window_bounds = array<i64: 32, 96>}, {pipeline_mode = #tpu.pipeline_mode<synchronous>, transform_indices = @transform_2, window_bounds = array<i64: 1, 96>}, {pipeline_mode = #tpu.pipeline_mode<synchronous>, transform_indices = @transform_3, window_bounds = array<i64: 4, 128, 128>}, {pipeline_mode = #tpu.pipeline_mode<synchronous>, transform_indices = @transform_4, window_bounds = array<i64: 32, 32>}, {pipeline_mode = #tpu.pipeline_mode<synchronous>, transform_indices = @transform_5, window_bounds = array<i64: 1, 32>}, {pipeline_mode = #tpu.pipeline_mode<synchronous>, transform_indices = @transform_6, window_bounds = array<i64: 32, 128>}, {pipeline_mode = #tpu.pipeline_mode<synchronous>, transform_indices = @transform_7, window_bounds = array<i64: 1, 128>}, {pipeline_mode = #tpu.pipeline_mode<synchronous>, transform_indices = @transform_8, window_bounds = array<i64: 128, 32>}, {pipeline_mode = #tpu.pipeline_mode<synchronous>, transform_indices = @transform_9, window_bounds = array<i64: 1, 32>}, {transform_indices = @transform_10, window_bounds = array<i64: 8, 16, 32>}]} {
    %c0 = arith.constant 0 : index
    %c0_0 = arith.constant 0 : index
    %c0_1 = arith.constant 0 : index
    %0 = vector.load %arg1[%c0, %c0_0, %c0_1] : memref<8x16x32xf32, #tpu.memory_space<vmem>>, vector<8x16x32xf32>
    %1 = vector.shape_cast %0 : vector<8x16x32xf32> to vector<128x32xf32>
    %cst = arith.constant dense<0.000000e+00> : vector<128xf32>
    %2 = vector.multi_reduction <add>, %1, %cst [1] : vector<128x32xf32> to vector<128xf32>
    %3 = vector.shape_cast %2 : vector<128xf32> to vector<128x1xf32>
    %cst_2 = arith.constant 3.200000e+01 : f32
    %4 = vector.broadcast %cst_2 : f32 to vector<128x1xf32>
    %5 = arith.divf %3, %4 : vector<128x1xf32>
    %6 = arith.mulf %1, %1 : vector<128x32xf32>
    %cst_3 = arith.constant dense<0.000000e+00> : vector<128xf32>
    %7 = vector.multi_reduction <add>, %6, %cst_3 [1] : vector<128x32xf32> to vector<128xf32>
    %8 = vector.shape_cast %7 : vector<128xf32> to vector<128x1xf32>
    %cst_4 = arith.constant 3.200000e+01 : f32
    %9 = vector.broadcast %cst_4 : f32 to vector<128x1xf32>
    %10 = arith.divf %8, %9 : vector<128x1xf32>
    %11 = arith.mulf %5, %5 : vector<128x1xf32>
    %12 = arith.subf %10, %11 : vector<128x1xf32>
    %13 = vector.broadcast %5 : vector<128x1xf32> to vector<128x32xf32>
    %14 = arith.subf %1, %13 : vector<128x32xf32>
    %cst_5 = arith.constant 9.99999974E-6 : f32
    %15 = vector.broadcast %cst_5 : f32 to vector<128x1xf32>
    %16 = arith.addf %12, %15 : vector<128x1xf32>
    %17 = math.rsqrt %16 : vector<128x1xf32>
    %18 = vector.broadcast %17 : vector<128x1xf32> to vector<128x32xf32>
    %19 = arith.mulf %14, %18 : vector<128x32xf32>
    %20 = arith.truncf %19 : vector<128x32xf32> to vector<128x32xbf16>
    %c0_6 = arith.constant 0 : index
    %c0_7 = arith.constant 0 : index
    %21 = vector.load %arg2[%c0_6, %c0_7] : memref<32x96xbf16, #tpu.memory_space<vmem>>, vector<32x96xbf16>
    %cst_8 = arith.constant dense<0.000000e+00> : vector<128x96xf32>
    %22 = tpu.matmul %20, %21, %cst_8 {dimension_numbers = #tpu.dot_dimension_numbers<[1], [0], [0], [1], [0, 0, 1, 1], [], []>} : vector<128x32xbf16>, vector<32x96xbf16>, vector<128x96xf32> -> vector<128x96xf32>
    %c0_9 = arith.constant 0 : index
    %c0_10 = arith.constant 0 : index
    %23 = vector.load %arg3[%c0_9, %c0_10] : memref<1x96xf32, #tpu.memory_space<vmem>>, vector<1x96xf32>
    %24 = vector.broadcast %23 : vector<1x96xf32> to vector<128x96xf32>
    %25 = arith.addf %22, %24 : vector<128x96xf32>
    %26 = vector.extract_strided_slice %25 {offsets = [0, 0], sizes = [128, 32], strides = [1, 1]} : vector<128x96xf32> to vector<128x32xf32>
    %27 = arith.truncf %26 : vector<128x32xf32> to vector<128x32xbf16>
    %28 = vector.extract_strided_slice %25 {offsets = [0, 32], sizes = [128, 32], strides = [1, 1]} : vector<128x96xf32> to vector<128x32xf32>
    %29 = arith.truncf %28 : vector<128x32xf32> to vector<128x32xbf16>
    %30 = vector.extract_strided_slice %25 {offsets = [0, 64], sizes = [128, 32], strides = [1, 1]} : vector<128x96xf32> to vector<128x32xf32>
    %31 = arith.truncf %30 : vector<128x32xf32> to vector<128x32xbf16>
    %32 = vector.extract_strided_slice %27 {offsets = [0, 0], sizes = [128, 8], strides = [1, 1]} : vector<128x32xbf16> to vector<128x8xbf16>
    %33 = vector.extract_strided_slice %29 {offsets = [0, 0], sizes = [128, 8], strides = [1, 1]} : vector<128x32xbf16> to vector<128x8xbf16>
    "tpu.trace_start"() <{level = 10 : i32, message = "md,nd->mn"}> : () -> ()
    %cst_11 = arith.constant dense<0.000000e+00> : vector<128x128xf32>
    %34 = tpu.matmul %32, %33, %cst_11 {dimension_numbers = #tpu.dot_dimension_numbers<[1], [1], [0], [0], [0, 0, 1, 0], [], []>} : vector<128x8xbf16>, vector<128x8xbf16>, vector<128x128xf32> -> vector<128x128xf32>
    "tpu.trace_stop"() : () -> ()
    %c0_12 = arith.constant 0 : index
    %c0_13 = arith.constant 0 : index
    %c0_14 = arith.constant 0 : index
    %35 = vector.load %arg4[%c0_12, %c0_13, %c0_14] : memref<4x128x128xf32, #tpu.memory_space<vmem>>, vector<1x128x128xf32>
    %36 = vector.shape_cast %35 : vector<1x128x128xf32> to vector<128x128xf32>
    %37 = arith.addf %34, %36 : vector<128x128xf32>
    %cst_15 = arith.constant dense<0xFF800000> : vector<128xf32>
    %38 = vector.multi_reduction <maximumf>, %37, %cst_15 [1] : vector<128x128xf32> to vector<128xf32>
    %39 = vector.shape_cast %38 : vector<128xf32> to vector<128x1xf32>
    %40 = vector.broadcast %39 : vector<128x1xf32> to vector<128x128xf32>
    %41 = arith.subf %37, %40 : vector<128x128xf32>
    %42 = math.exp %41 : vector<128x128xf32>
    %cst_16 = arith.constant dense<0.000000e+00> : vector<128xf32>
    %43 = vector.multi_reduction <add>, %42, %cst_16 [1] : vector<128x128xf32> to vector<128xf32>
    %44 = vector.shape_cast %43 : vector<128xf32> to vector<128x1xf32>
    %45 = tpu.reciprocal %44 {approx = true} : vector<128x1xf32> -> vector<128x1xf32>
    %46 = vector.broadcast %45 : vector<128x1xf32> to vector<128x128xf32>
    %47 = arith.mulf %42, %46 : vector<128x128xf32>
    %48 = arith.truncf %47 : vector<128x128xf32> to vector<128x128xbf16>
    %49 = vector.extract_strided_slice %31 {offsets = [0, 0], sizes = [128, 8], strides = [1, 1]} : vector<128x32xbf16> to vector<128x8xbf16>
    %cst_17 = arith.constant dense<0.000000e+00> : vector<128x8xf32>
    %50 = tpu.matmul %48, %49, %cst_17 {dimension_numbers = #tpu.dot_dimension_numbers<[1], [0], [0], [1], [0, 0, 1, 1], [], []>} : vector<128x128xbf16>, vector<128x8xbf16>, vector<128x8xf32> -> vector<128x8xf32>
    %51 = vector.extract_strided_slice %27 {offsets = [0, 8], sizes = [128, 8], strides = [1, 1]} : vector<128x32xbf16> to vector<128x8xbf16>
    %52 = vector.extract_strided_slice %29 {offsets = [0, 8], sizes = [128, 8], strides = [1, 1]} : vector<128x32xbf16> to vector<128x8xbf16>
    "tpu.trace_start"() <{level = 10 : i32, message = "md,nd->mn"}> : () -> ()
    %cst_18 = arith.constant dense<0.000000e+00> : vector<128x128xf32>
    %53 = tpu.matmul %51, %52, %cst_18 {dimension_numbers = #tpu.dot_dimension_numbers<[1], [1], [0], [0], [0, 0, 1, 0], [], []>} : vector<128x8xbf16>, vector<128x8xbf16>, vector<128x128xf32> -> vector<128x128xf32>
    "tpu.trace_stop"() : () -> ()
    %c1 = arith.constant 1 : index
    %c0_19 = arith.constant 0 : index
    %c0_20 = arith.constant 0 : index
    %54 = vector.load %arg4[%c1, %c0_19, %c0_20] : memref<4x128x128xf32, #tpu.memory_space<vmem>>, vector<1x128x128xf32>
    %55 = vector.shape_cast %54 : vector<1x128x128xf32> to vector<128x128xf32>
    %56 = arith.addf %53, %55 : vector<128x128xf32>
    %cst_21 = arith.constant dense<0xFF800000> : vector<128xf32>
    %57 = vector.multi_reduction <maximumf>, %56, %cst_21 [1] : vector<128x128xf32> to vector<128xf32>
    %58 = vector.shape_cast %57 : vector<128xf32> to vector<128x1xf32>
    %59 = vector.broadcast %58 : vector<128x1xf32> to vector<128x128xf32>
    %60 = arith.subf %56, %59 : vector<128x128xf32>
    %61 = math.exp %60 : vector<128x128xf32>
    %cst_22 = arith.constant dense<0.000000e+00> : vector<128xf32>
    %62 = vector.multi_reduction <add>, %61, %cst_22 [1] : vector<128x128xf32> to vector<128xf32>
    %63 = vector.shape_cast %62 : vector<128xf32> to vector<128x1xf32>
    %64 = tpu.reciprocal %63 {approx = true} : vector<128x1xf32> -> vector<128x1xf32>
    %65 = vector.broadcast %64 : vector<128x1xf32> to vector<128x128xf32>
    %66 = arith.mulf %61, %65 : vector<128x128xf32>
    %67 = arith.truncf %66 : vector<128x128xf32> to vector<128x128xbf16>
    %68 = vector.extract_strided_slice %31 {offsets = [0, 8], sizes = [128, 8], strides = [1, 1]} : vector<128x32xbf16> to vector<128x8xbf16>
    %cst_23 = arith.constant dense<0.000000e+00> : vector<128x8xf32>
    %69 = tpu.matmul %67, %68, %cst_23 {dimension_numbers = #tpu.dot_dimension_numbers<[1], [0], [0], [1], [0, 0, 1, 1], [], []>} : vector<128x128xbf16>, vector<128x8xbf16>, vector<128x8xf32> -> vector<128x8xf32>
    %70 = vector.extract_strided_slice %27 {offsets = [0, 16], sizes = [128, 8], strides = [1, 1]} : vector<128x32xbf16> to vector<128x8xbf16>
    %71 = vector.extract_strided_slice %29 {offsets = [0, 16], sizes = [128, 8], strides = [1, 1]} : vector<128x32xbf16> to vector<128x8xbf16>
    "tpu.trace_start"() <{level = 10 : i32, message = "md,nd->mn"}> : () -> ()
    %cst_24 = arith.constant dense<0.000000e+00> : vector<128x128xf32>
    %72 = tpu.matmul %70, %71, %cst_24 {dimension_numbers = #tpu.dot_dimension_numbers<[1], [1], [0], [0], [0, 0, 1, 0], [], []>} : vector<128x8xbf16>, vector<128x8xbf16>, vector<128x128xf32> -> vector<128x128xf32>
    "tpu.trace_stop"() : () -> ()
    %c2 = arith.constant 2 : index
    %c0_25 = arith.constant 0 : index
    %c0_26 = arith.constant 0 : index
    %73 = vector.load %arg4[%c2, %c0_25, %c0_26] : memref<4x128x128xf32, #tpu.memory_space<vmem>>, vector<1x128x128xf32>
    %74 = vector.shape_cast %73 : vector<1x128x128xf32> to vector<128x128xf32>
    %75 = arith.addf %72, %74 : vector<128x128xf32>
    %cst_27 = arith.constant dense<0xFF800000> : vector<128xf32>
    %76 = vector.multi_reduction <maximumf>, %75, %cst_27 [1] : vector<128x128xf32> to vector<128xf32>
    %77 = vector.shape_cast %76 : vector<128xf32> to vector<128x1xf32>
    %78 = vector.broadcast %77 : vector<128x1xf32> to vector<128x128xf32>
    %79 = arith.subf %75, %78 : vector<128x128xf32>
    %80 = math.exp %79 : vector<128x128xf32>
    %cst_28 = arith.constant dense<0.000000e+00> : vector<128xf32>
    %81 = vector.multi_reduction <add>, %80, %cst_28 [1] : vector<128x128xf32> to vector<128xf32>
    %82 = vector.shape_cast %81 : vector<128xf32> to vector<128x1xf32>
    %83 = tpu.reciprocal %82 {approx = true} : vector<128x1xf32> -> vector<128x1xf32>
    %84 = vector.broadcast %83 : vector<128x1xf32> to vector<128x128xf32>
    %85 = arith.mulf %80, %84 : vector<128x128xf32>
    %86 = arith.truncf %85 : vector<128x128xf32> to vector<128x128xbf16>
    %87 = vector.extract_strided_slice %31 {offsets = [0, 16], sizes = [128, 8], strides = [1, 1]} : vector<128x32xbf16> to vector<128x8xbf16>
    %cst_29 = arith.constant dense<0.000000e+00> : vector<128x8xf32>
    %88 = tpu.matmul %86, %87, %cst_29 {dimension_numbers = #tpu.dot_dimension_numbers<[1], [0], [0], [1], [0, 0, 1, 1], [], []>} : vector<128x128xbf16>, vector<128x8xbf16>, vector<128x8xf32> -> vector<128x8xf32>
    %89 = vector.extract_strided_slice %27 {offsets = [0, 24], sizes = [128, 8], strides = [1, 1]} : vector<128x32xbf16> to vector<128x8xbf16>
    %90 = vector.extract_strided_slice %29 {offsets = [0, 24], sizes = [128, 8], strides = [1, 1]} : vector<128x32xbf16> to vector<128x8xbf16>
    "tpu.trace_start"() <{level = 10 : i32, message = "md,nd->mn"}> : () -> ()
    %cst_30 = arith.constant dense<0.000000e+00> : vector<128x128xf32>
    %91 = tpu.matmul %89, %90, %cst_30 {dimension_numbers = #tpu.dot_dimension_numbers<[1], [1], [0], [0], [0, 0, 1, 0], [], []>} : vector<128x8xbf16>, vector<128x8xbf16>, vector<128x128xf32> -> vector<128x128xf32>
    "tpu.trace_stop"() : () -> ()
    %c3 = arith.constant 3 : index
    %c0_31 = arith.constant 0 : index
    %c0_32 = arith.constant 0 : index
    %92 = vector.load %arg4[%c3, %c0_31, %c0_32] : memref<4x128x128xf32, #tpu.memory_space<vmem>>, vector<1x128x128xf32>
    %93 = vector.shape_cast %92 : vector<1x128x128xf32> to vector<128x128xf32>
    %94 = arith.addf %91, %93 : vector<128x128xf32>
    %cst_33 = arith.constant dense<0xFF800000> : vector<128xf32>
    %95 = vector.multi_reduction <maximumf>, %94, %cst_33 [1] : vector<128x128xf32> to vector<128xf32>
    %96 = vector.shape_cast %95 : vector<128xf32> to vector<128x1xf32>
    %97 = vector.broadcast %96 : vector<128x1xf32> to vector<128x128xf32>
    %98 = arith.subf %94, %97 : vector<128x128xf32>
    %99 = math.exp %98 : vector<128x128xf32>
    %cst_34 = arith.constant dense<0.000000e+00> : vector<128xf32>
    %100 = vector.multi_reduction <add>, %99, %cst_34 [1] : vector<128x128xf32> to vector<128xf32>
    %101 = vector.shape_cast %100 : vector<128xf32> to vector<128x1xf32>
    %102 = tpu.reciprocal %101 {approx = true} : vector<128x1xf32> -> vector<128x1xf32>
    %103 = vector.broadcast %102 : vector<128x1xf32> to vector<128x128xf32>
    %104 = arith.mulf %99, %103 : vector<128x128xf32>
    %105 = arith.truncf %104 : vector<128x128xf32> to vector<128x128xbf16>
    %106 = vector.extract_strided_slice %31 {offsets = [0, 24], sizes = [128, 8], strides = [1, 1]} : vector<128x32xbf16> to vector<128x8xbf16>
    %cst_35 = arith.constant dense<0.000000e+00> : vector<128x8xf32>
    %107 = tpu.matmul %105, %106, %cst_35 {dimension_numbers = #tpu.dot_dimension_numbers<[1], [0], [0], [1], [0, 0, 1, 1], [], []>} : vector<128x128xbf16>, vector<128x8xbf16>, vector<128x8xf32> -> vector<128x8xf32>
    %108 = tpu.concatenate %50, %69, %88, %107 in 1 : vector<128x8xf32>, vector<128x8xf32>, vector<128x8xf32>, vector<128x8xf32> -> vector<128x32xf32>
    %109 = arith.truncf %108 : vector<128x32xf32> to vector<128x32xbf16>
    %c0_36 = arith.constant 0 : index
    %c0_37 = arith.constant 0 : index
    %110 = vector.load %arg5[%c0_36, %c0_37] : memref<32x32xbf16, #tpu.memory_space<vmem>>, vector<32x32xbf16>
    %cst_38 = arith.constant dense<0.000000e+00> : vector<128x32xf32>
    %111 = tpu.matmul %109, %110, %cst_38 {dimension_numbers = #tpu.dot_dimension_numbers<[1], [0], [0], [1], [0, 0, 1, 1], [], []>} : vector<128x32xbf16>, vector<32x32xbf16>, vector<128x32xf32> -> vector<128x32xf32>
    %c0_39 = arith.constant 0 : index
    %c0_40 = arith.constant 0 : index
    %112 = vector.load %arg6[%c0_39, %c0_40] : memref<1x32xf32, #tpu.memory_space<vmem>>, vector<1x32xf32>
    %113 = vector.broadcast %112 : vector<1x32xf32> to vector<128x32xf32>
    %114 = arith.addf %111, %113 : vector<128x32xf32>
    %115 = arith.addf %1, %114 : vector<128x32xf32>
    %cst_41 = arith.constant dense<0.000000e+00> : vector<128xf32>
    %116 = vector.multi_reduction <add>, %115, %cst_41 [1] : vector<128x32xf32> to vector<128xf32>
    %117 = vector.shape_cast %116 : vector<128xf32> to vector<128x1xf32>
    %cst_42 = arith.constant 3.200000e+01 : f32
    %118 = vector.broadcast %cst_42 : f32 to vector<128x1xf32>
    %119 = arith.divf %117, %118 : vector<128x1xf32>
    %120 = arith.mulf %115, %115 : vector<128x32xf32>
    %cst_43 = arith.constant dense<0.000000e+00> : vector<128xf32>
    %121 = vector.multi_reduction <add>, %120, %cst_43 [1] : vector<128x32xf32> to vector<128xf32>
    %122 = vector.shape_cast %121 : vector<128xf32> to vector<128x1xf32>
    %cst_44 = arith.constant 3.200000e+01 : f32
    %123 = vector.broadcast %cst_44 : f32 to vector<128x1xf32>
    %124 = arith.divf %122, %123 : vector<128x1xf32>
    %125 = arith.mulf %119, %119 : vector<128x1xf32>
    %126 = arith.subf %124, %125 : vector<128x1xf32>
    %127 = vector.broadcast %119 : vector<128x1xf32> to vector<128x32xf32>
    %128 = arith.subf %115, %127 : vector<128x32xf32>
    %cst_45 = arith.constant 9.99999974E-6 : f32
    %129 = vector.broadcast %cst_45 : f32 to vector<128x1xf32>
    %130 = arith.addf %126, %129 : vector<128x1xf32>
    %131 = math.rsqrt %130 : vector<128x1xf32>
    %132 = vector.broadcast %131 : vector<128x1xf32> to vector<128x32xf32>
    %133 = arith.mulf %128, %132 : vector<128x32xf32>
    %134 = arith.truncf %133 : vector<128x32xf32> to vector<128x32xbf16>
    %c0_46 = arith.constant 0 : index
    %c0_47 = arith.constant 0 : index
    %135 = vector.load %arg7[%c0_46, %c0_47] : memref<32x128xbf16, #tpu.memory_space<vmem>>, vector<32x128xbf16>
    %cst_48 = arith.constant dense<0.000000e+00> : vector<128x128xf32>
    %136 = tpu.matmul %134, %135, %cst_48 {dimension_numbers = #tpu.dot_dimension_numbers<[1], [0], [0], [1], [0, 0, 1, 1], [], []>} : vector<128x32xbf16>, vector<32x128xbf16>, vector<128x128xf32> -> vector<128x128xf32>
    %c0_49 = arith.constant 0 : index
    %c0_50 = arith.constant 0 : index
    %137 = vector.load %arg8[%c0_49, %c0_50] : memref<1x128xf32, #tpu.memory_space<vmem>>, vector<1x128xf32>
    %138 = vector.broadcast %137 : vector<1x128xf32> to vector<128x128xf32>
    %139 = arith.addf %136, %138 : vector<128x128xf32>
    %cst_51 = arith.constant 5.000000e-01 : f32
    %140 = vector.broadcast %cst_51 : f32 to vector<128x128xf32>
    %141 = arith.mulf %140, %139 : vector<128x128xf32>
    %cst_52 = arith.constant 4.471500e-02 : f32
    %142 = vector.broadcast %cst_52 : f32 to vector<128x128xf32>
    %143 = arith.mulf %142, %139 : vector<128x128xf32>
    %144 = arith.mulf %143, %139 : vector<128x128xf32>
    %145 = arith.mulf %144, %139 : vector<128x128xf32>
    %146 = arith.addf %139, %145 : vector<128x128xf32>
    %cst_53 = arith.constant 0.797884583 : f32
    %147 = vector.broadcast %cst_53 : f32 to vector<128x128xf32>
    %148 = arith.mulf %147, %146 : vector<128x128xf32>
    %149 = math.tanh %148 : vector<128x128xf32>
    %cst_54 = arith.constant 1.000000e+00 : f32
    %150 = vector.broadcast %cst_54 : f32 to vector<128x128xf32>
    %151 = arith.addf %150, %149 : vector<128x128xf32>
    %152 = arith.mulf %141, %151 : vector<128x128xf32>
    %153 = arith.truncf %152 : vector<128x128xf32> to vector<128x128xbf16>
    %c0_55 = arith.constant 0 : index
    %c0_56 = arith.constant 0 : index
    %154 = vector.load %arg9[%c0_55, %c0_56] : memref<128x32xbf16, #tpu.memory_space<vmem>>, vector<128x32xbf16>
    %cst_57 = arith.constant dense<0.000000e+00> : vector<128x32xf32>
    %155 = tpu.matmul %153, %154, %cst_57 {dimension_numbers = #tpu.dot_dimension_numbers<[1], [0], [0], [1], [0, 0, 1, 1], [], []>} : vector<128x128xbf16>, vector<128x32xbf16>, vector<128x32xf32> -> vector<128x32xf32>
    %c0_58 = arith.constant 0 : index
    %c0_59 = arith.constant 0 : index
    %156 = vector.load %arg10[%c0_58, %c0_59] : memref<1x32xf32, #tpu.memory_space<vmem>>, vector<1x32xf32>
    %157 = vector.broadcast %156 : vector<1x32xf32> to vector<128x32xf32>
    %158 = arith.addf %155, %157 : vector<128x32xf32>
    %159 = arith.addf %115, %158 : vector<128x32xf32>
    %160 = vector.shape_cast %159 : vector<128x32xf32> to vector<8x16x32xf32>
    %c0_60 = arith.constant 0 : index
    %c0_61 = arith.constant 0 : index
    %c0_62 = arith.constant 0 : index
    %161 = vector.load %arg11[%c0_60, %c0_61, %c0_62] : memref<8x16x32xf32, #tpu.memory_space<vmem>>, vector<8x16x32xf32>
    tpu.vector_store %arg11[%c0_60, %c0_61, %c0_62], %160 {strides = array<i32>} : memref<8x16x32xf32, #tpu.memory_space<vmem>>, vector<8x16x32xf32>,
    return
  }
  func.func @transform_0(%arg0: i32) -> (i32, i32, i32) {
    %c0_i32 = arith.constant 0 : i32
    %c0_i32_0 = arith.constant 0 : i32
    %c0_i32_1 = arith.constant 0 : i32
    return %arg0, %c0_i32, %c0_i32_0 : i32, i32, i32
  }
  func.func @transform_1(%arg0: i32) -> (i32, i32) {
    %c0_i32 = arith.constant 0 : i32
    %c0_i32_0 = arith.constant 0 : i32
    %c0_i32_1 = arith.constant 0 : i32
    return %c0_i32, %c0_i32_0 : i32, i32
  }
  func.func @transform_2(%arg0: i32) -> (i32, i32) {
    %c0_i32 = arith.constant 0 : i32
    %c0_i32_0 = arith.constant 0 : i32
    %c0_i32_1 = arith.constant 0 : i32
    return %c0_i32, %c0_i32_0 : i32, i32
  }
  func.func @transform_3(%arg0: i32) -> (i32, i32, i32) {
    %c0_i32 = arith.constant 0 : i32
    %c0_i32_0 = arith.constant 0 : i32
    %c0_i32_1 = arith.constant 0 : i32
    %c0_i32_2 = arith.constant 0 : i32
    return %c0_i32, %c0_i32_0, %c0_i32_1 : i32, i32, i32
  }
  func.func @transform_4(%arg0: i32) -> (i32, i32) {
    %c0_i32 = arith.constant 0 : i32
    %c0_i32_0 = arith.constant 0 : i32
    %c0_i32_1 = arith.constant 0 : i32
    return %c0_i32, %c0_i32_0 : i32, i32
  }
  func.func @transform_5(%arg0: i32) -> (i32, i32) {
    %c0_i32 = arith.constant 0 : i32
    %c0_i32_0 = arith.constant 0 : i32
    %c0_i32_1 = arith.constant 0 : i32
    return %c0_i32, %c0_i32_0 : i32, i32
  }
  func.func @transform_6(%arg0: i32) -> (i32, i32) {
    %c0_i32 = arith.constant 0 : i32
    %c0_i32_0 = arith.constant 0 : i32
    %c0_i32_1 = arith.constant 0 : i32
    return %c0_i32, %c0_i32_0 : i32, i32
  }
  func.func @transform_7(%arg0: i32) -> (i32, i32) {
    %c0_i32 = arith.constant 0 : i32
    %c0_i32_0 = arith.constant 0 : i32
    %c0_i32_1 = arith.constant 0 : i32
    return %c0_i32, %c0_i32_0 : i32, i32
  }
  func.func @transform_8(%arg0: i32) -> (i32, i32) {
    %c0_i32 = arith.constant 0 : i32
    %c0_i32_0 = arith.constant 0 : i32
    %c0_i32_1 = arith.constant 0 : i32
    return %c0_i32, %c0_i32_0 : i32, i32
  }
  func.func @transform_9(%arg0: i32) -> (i32, i32) {
    %c0_i32 = arith.constant 0 : i32
    %c0_i32_0 = arith.constant 0 : i32
    %c0_i32_1 = arith.constant 0 : i32
    return %c0_i32, %c0_i32_0 : i32, i32
  }
  func.func @transform_10(%arg0: i32) -> (i32, i32, i32) {
    %c0_i32 = arith.constant 0 : i32
    %c0_i32_0 = arith.constant 0 : i32
    %c0_i32_1 = arith.constant 0 : i32
    return %arg0, %c0_i32, %c0_i32_0 : i32, i32, i32
  }
}

</mosaic_0001>

<bundles_post_ra>
// kernel: swin_block.1
= control target key start
LH: loop header
LB: loop body
LE: loop exit
PB: predicated region body
PF: predicated region fallthrough
CT: control target
= control target key end

     0   :  { %15 = vsyncpa [#allocation3], 0  ;;  %s7198_s0 = inlined_call_operand.vmem [shape: f32[16,16,32], index: 0, kind: input, shape index: {}]   ;;  %s7199_s1 = inlined_call_operand.vmem [shape: bf16[32,96], index: 1, kind: input, shape index: {}]   ;;  %s7200_s2 = inlined_call_operand.vmem [shape: f32[1,96], index: 2, kind: input, shape index: {}]   ;;  %s7201_s3 = inlined_call_operand.vmem [shape: f32[4,128,128], index: 3, kind: input, shape index: {}]   ;;  %s7202_s4 = inlined_call_operand.vmem [shape: bf16[32,32], index: 4, kind: input, shape index: {}]   ;;  %s7203_s5 = inlined_call_operand.vmem [shape: f32[1,32], index: 5, kind: input, shape index: {}]   ;;  %s7204_s6 = inlined_call_operand.vmem [shape: bf16[32,128], index: 6, kind: input, shape index: {}]   ;;  %s7205_s7 = inlined_call_operand.vmem [shape: f32[1,128], index: 7, kind: input, shape index: {}]   ;;  %s7206_s8 = inlined_call_operand.vmem [shape: bf16[128,32], index: 8, kind: input, shape index: {}]   ;;  %s7207_s9 = inlined_call_operand.vmem [shape: f32[1,32], index: 9, kind: input, shape index: {}]   ;;  %s7208_s10 = inlined_call_operand.hbm [shape: f32[16,16,32], index: 10, kind: output, shape index: {}]  }
   0x1   :  { %17 = vsyncpa [#allocation3 + $0x1], 0  ;;  %s5274_s13 = smov 0   ;;  %s5276_s14 = smov 0  }
   0x2   :  { %s5278_s15 = smov 0   ;;  %s5280_s16 = smov 0  }
   0x3 LB: > { %s5295_s17 = sadd.s32 4294967295, %s5201_s16   ;;  %s3874_s18 = sadd.s32 4294967294, %s5201_s16   ;;  %s5201_s16 = sphi %s5280_s16, %s7262_s16   ;;  %s5197_s15 = sphi %s5278_s15, %s7261_s15   ;;  %s5193_s14 = sphi %s5276_s14, %s7260_s14   ;;  %s5189_s13 = sphi %s5274_s13, %s7259_s13  }
   0x4   : > { %s5299_s19 = sadd.s32 1, %s5201_s16   ;;  %s245_s20 = sadd.s32 1, %s5197_s15 }
   0x5   : > { %s242_s21 = ssub.s32 %s5201_s16, %s5299_s19  ;;  %p255_p0 = scmp.ne.s32.totalorder %s5197_s15, %s5193_s14 }
   0x6   : > { %p243_p1 = scmp.eq.s32.totalorder %s242_s21, 0  ;;  %p256_p2 = scmp.eq.s32.totalorder %s5295_s17, 1 }
   0x7   : > { %p261_p3 = scmp.ne.s32.totalorder %s5193_s14, %s5189_s13  ;;  %p262_p4 = scmp.eq.s32.totalorder %s3874_s18, 1 }
   0x8   : > { %s5310_s22 = scalar_select %p243_p1, %s5197_s15, %s245_s20  }
   0x9   : > { %p5312_p5 = por %p256_p2, %p255_p0  ;;  %p5316_p6 = por %p262_p4, %p261_p3 }
   0xa   : > { %p3877_p7 = scmp.ge.s32.totalorder %s5201_s16, 1  ;;  %p317_p8 = scmp.lt.s32.totalorder %s5201_s16, 3 }
   0xc   : > { %p318_p9 = pnand %p3877_p7, %p317_p8 }
   0xe   : > { %321 = sbr.rel (%p318_p9) target bundleno = 4297 (0x10c9), region = 60 }
  0x15   : > { %s3879_s25 = sshll.u32 %s5295_s17, 3  ;;  %vm381_vm0 = vcmask 261120   ;;  %v4757_v46 = vld [vmem:[%s7199_s1] sm:$0xff]   ;;  %v4758_v51 = vld [vmem:[%s7199_s1 + $0x8] sm:$0xff]   ;;  %vm823_vm1 = vcmask 64512   ;;  %s5205_s27 = smov 88  }
  0x16   : > { %p357_p10 = scmp.lt.s32.totalorder %s3879_s25, 15  ;;  %4187 = vmatprep.subr.bf16.mxu0 %v4757_v46  ;;  %s5206_s20 = smov 120   ;;  %vm2851_vm2 = vcmask 130048   ;;  %vm2868_vm3 = vcmask 195584  }
  0x17   : > { %4188 = vmatpush3.bf16.msra.mxu0 %v4757_v46  ;;  %s5207_s21 = smov 56   ;;  %s5209_s12 = smov 112  }
  0x18   : > { %s7264_s25 = smov (!%p357_p10, %s3879_s25), 15  ;;  %4189 = vmatprep.subr.bf16.mxu0 %v4758_v51  ;;  %s5210_s18 = smov 48  }
  0x19   : > { %s4010_s26 = sshll.u32 %s7264_s25, 4  ;;  %s5203_s25 = smov 96  }
  0x1a   : > { %s5326_s29 = scalar_lea.vmem %s7198_s0, %s4010_s26  ;;  %s5204_s26 = smov 64  }
  0x1b   : > { %v5329_v0 = vld [vmem:[%s5326_s29 + $0x10] sm:$0xff]  ;;  %v5332_v1 = vld [vmem:[%s5326_s29] sm:$0xff]  ;;  %v5335_v2 = vld [vmem:[%s5326_s29 + $0x18] sm:$0xff]  ;;  %4190 = vmatpush3.bf16.msra.mxu0 %v4758_v51  ;;  %s5212_s30 = smov 104   ;;  %s5213_s11 = smov 40  }
  0x1c   : > { %v388_v3 = vsel %vm381_vm0, %v5329_v0, 0.0  ;;  %v382_v4 = vsel %vm381_vm0, %v5332_v1, 0.0  ;;  %v5342_v5 = vld [vmem:[%s5326_s29 + $0x8] sm:$0xff]  ;;  %v391_v6 = vsel %vm381_vm0, %v5335_v2, 0.0  ;;  %v447_v9 = vmul.f32 %v5332_v1, %v5332_v1  ;;  %v5364_v17 = vld [vmem:[%s5326_s29 + $0x20] sm:$0xff]  ;;  %v5371_v20 = vld [vmem:[%s5326_s29 + $0x38] sm:$0xff] }
  0x1d   : > { %389 = vadd.xlane.f32.xlu1 %v388_v3  ;;  %383 = vadd.xlane.f32.xlu0 %v382_v4  ;;  %v385_v7 = vsel %vm381_vm0, %v5342_v5, 0.0  ;;  %v448_v8 = vmul.f32 %v5342_v5, %v5342_v5  ;;  %v450_v10 = vmul.f32 %v5335_v2, %v5335_v2  ;;  %v449_v11 = vmul.f32 %v5329_v0, %v5329_v0  ;;  %v5361_v16 = vld [vmem:[%s5326_s29 + $0x28] sm:$0xff]  ;;  %v5374_v21 = vld [vmem:[%s5326_s29 + $0x30] sm:$0xff]  ;;  %v5396_v33 = vld [vmem:[%s5326_s29 + $0x40] sm:$0xff] }
  0x1e   : > { %v463_v13 = vsel %vm381_vm0, %v447_v9, 0.0  ;;  %v397_v18 = vsel %vm381_vm0, %v5361_v16, 0.0  ;;  %v394_v19 = vsel %vm381_vm0, %v5364_v17, 0.0  ;;  %v403_v22 = vsel %vm381_vm0, %v5371_v20, 0.0  ;;  %v5393_v32 = vld [vmem:[%s5326_s29 + $0x48] sm:$0xff]  ;;  %v5403_v36 = vld [vmem:[%s5326_s29 + $0x58] sm:$0xff] }
  0x1f   : > { %v466_v12 = vsel %vm381_vm0, %v448_v8, 0.0  ;;  %v472_v14 = vsel %vm381_vm0, %v450_v10, 0.0  ;;  %v469_v15 = vsel %vm381_vm0, %v449_v11, 0.0  ;;  %v400_v23 = vsel %vm381_vm0, %v5374_v21, 0.0  ;;  %v5406_v37 = vld [vmem:[%s5326_s29 + $0x50] sm:$0xff]  ;;  %v5428_v49 = vld [vmem:[%s5326_s29 + $0x68] sm:$0xff] }
  0x20   : > { %v452_v24 = vmul.f32 %v5361_v16, %v5361_v16  ;;  %v451_v25 = vmul.f32 %v5364_v17, %v5364_v17  ;;  %v454_v28 = vmul.f32 %v5371_v20, %v5371_v20  ;;  %v453_v29 = vmul.f32 %v5374_v21, %v5374_v21  ;;  %v5431_v50 = vld [vmem:[%s5326_s29 + $0x60] sm:$0xff]  ;;  %v5441_v54 = vld [vmem:[%s5326_s29 + $0x78] sm:$0xff]  ;;  %v5444_v55 = vld [vmem:[%s5326_s29 + $0x70] sm:$0xff] }
  0x21   : > { %392 = vadd.xlane.f32.xlu1 %v391_v6  ;;  %386 = vadd.xlane.f32.xlu0 %v385_v7  ;;  %v409_v34 = vsel %vm381_vm0, %v5393_v32, 0.0  ;;  %v406_v35 = vsel %vm381_vm0, %v5396_v33, 0.0  ;;  %v415_v38 = vsel %vm381_vm0, %v5403_v36, 0.0  ;;  %v412_v39 = vsel %vm381_vm0, %v5406_v37, 0.0 }
  0x22   : > { %v478_v26 = vsel %vm381_vm0, %v452_v24, 0.0  ;;  %v475_v27 = vsel %vm381_vm0, %v451_v25, 0.0  ;;  %v484_v30 = vsel %vm381_vm0, %v454_v28, 0.0  ;;  %v481_v31 = vsel %vm381_vm0, %v453_v29, 0.0 }
  0x23   : > { %v456_v40 = vmul.f32 %v5393_v32, %v5393_v32  ;;  %v455_v41 = vmul.f32 %v5396_v33, %v5396_v33  ;;  %v458_v44 = vmul.f32 %v5403_v36, %v5403_v36  ;;  %v457_v45 = vmul.f32 %v5406_v37, %v5406_v37 }
  0x24   : > { %v421_v52 = vsel %vm381_vm0, %v5428_v49, 0.0  ;;  %v418_v53 = vsel %vm381_vm0, %v5431_v50, 0.0  ;;  %v427_v56 = vsel %vm381_vm0, %v5441_v54, 0.0  ;;  %v424_v57 = vsel %vm381_vm0, %v5444_v55, 0.0 }
  0x25   : > { %467 = vadd.xlane.f32.xlu1 %v466_v12  ;;  %464 = vadd.xlane.f32.xlu0 %v463_v13  ;;  %v490_v42 = vsel %vm381_vm0, %v456_v40, 0.0  ;;  %v487_v43 = vsel %vm381_vm0, %v455_v41, 0.0  ;;  %v496_v47 = vsel %vm381_vm0, %v458_v44, 0.0  ;;  %v493_v48 = vsel %vm381_vm0, %v457_v45, 0.0 }
  0x26   : > { %v460_v58 = vmul.f32 %v5428_v49, %v5428_v49  ;;  %v459_v59 = vmul.f32 %v5431_v50, %v5431_v50  ;;  %v462_v62 = vmul.f32 %v5441_v54, %v5441_v54  ;;  %v461_v63 = vmul.f32 %v5444_v55, %v5444_v55 }
  0x28   : > { %v502_v60 = vsel %vm381_vm0, %v460_v58, 0.0  ;;  %v499_v61 = vsel %vm381_vm0, %v459_v59, 0.0  ;;  %v508_v3 = vsel %vm381_vm0, %v462_v62, 0.0  ;;  %v505_v4 = vsel %vm381_vm0, %v461_v63, 0.0 }
  0x29   : > { %473 = vadd.xlane.f32.xlu1 %v472_v14  ;;  %470 = vadd.xlane.f32.xlu0 %v469_v15 }
  0x2d   : > { %398 = vadd.xlane.f32.xlu1 %v397_v18  ;;  %395 = vadd.xlane.f32.xlu0 %v394_v19 }
  0x31   : > { %404 = vadd.xlane.f32.xlu1 %v403_v22  ;;  %401 = vadd.xlane.f32.xlu0 %v400_v23 }
  0x35   : > { %479 = vadd.xlane.f32.xlu1 %v478_v26  ;;  %476 = vadd.xlane.f32.xlu0 %v475_v27 }
  0x39   : > { %485 = vadd.xlane.f32.xlu1 %v484_v30  ;;  %482 = vadd.xlane.f32.xlu0 %v481_v31 }
  0x3d   : > { %410 = vadd.xlane.f32.xlu1 %v409_v34  ;;  %407 = vadd.xlane.f32.xlu0 %v406_v35 }
  0x41   : > { %416 = vadd.xlane.f32.xlu1 %v415_v38  ;;  %413 = vadd.xlane.f32.xlu0 %v412_v39 }
  0x45   : > { %491 = vadd.xlane.f32.xlu1 %v490_v42  ;;  %488 = vadd.xlane.f32.xlu0 %v487_v43 }
  0x49   : > { %497 = vadd.xlane.f32.xlu1 %v496_v47  ;;  %494 = vadd.xlane.f32.xlu0 %v493_v48 }
  0x4d   : > { %422 = vadd.xlane.f32.xlu1 %v421_v52  ;;  %419 = vadd.xlane.f32.xlu0 %v418_v53 }
  0x51   : > { %428 = vadd.xlane.f32.xlu1 %v427_v56  ;;  %425 = vadd.xlane.f32.xlu0 %v424_v57 }
  0x55   : > { %503 = vadd.xlane.f32.xlu1 %v502_v60  ;;  %500 = vadd.xlane.f32.xlu0 %v499_v61 }
  0x59   : > { %509 = vadd.xlane.f32.xlu1 %v508_v3  ;;  %506 = vadd.xlane.f32.xlu0 %v505_v4 }
  0xaa   : > { %v390_v6 = vpop.xlane.xlu1 %389  ;;  %v384_v7 = vpop.xlane.xlu0 %383 }
  0xab   : > { %v431_v10 = vmul.f32 0.03125, %v384_v7  ;;  %v5462_v12 = vmul.f32 0.03125, %v390_v6 }
  0xad   : > { %v527_v18 = vmul.f32 %v431_v10, %v431_v10  ;;  %v529_v26 = vmul.f32 %v5462_v12, %v5462_v12  ;;  %v559_v48 = vsub.f32 %v5332_v1, %v431_v10  ;;  %v561_v6 = vsub.f32 %v5329_v0, %v5462_v12 }
  0xae   : > { %v393_v8 = vpop.xlane.xlu1 %392  ;;  %v387_v9 = vpop.xlane.xlu0 %386 }
  0xaf   : > { %v432_v11 = vmul.f32 0.03125, %v387_v9  ;;  %v434_v13 = vmul.f32 0.03125, %v393_v8 }
  0xb1   : > { %v528_v19 = vmul.f32 %v432_v11, %v432_v11  ;;  %v530_v27 = vmul.f32 %v434_v13, %v434_v13  ;;  %v560_v51 = vsub.f32 %v5342_v5, %v432_v11  ;;  %v562_v7 = vsub.f32 %v5335_v2, %v434_v13 }
  0xb2   : > { %v468_v14 = vpop.xlane.xlu1 %467  ;;  %v465_v15 = vpop.xlane.xlu0 %464 }
  0xb3   : > { %v512_v22 = vmul.f32 0.03125, %v468_v14  ;;  %v511_v23 = vmul.f32 0.03125, %v465_v15 }
  0xb5   : > { %v544_v24 = vsub.f32 %v512_v22, %v528_v19  ;;  %v543_v25 = vsub.f32 %v511_v23, %v527_v18 }
  0xb6   : > { %v474_v28 = vpop.xlane.xlu1 %473  ;;  %v471_v29 = vpop.xlane.xlu0 %470 }
  0xb7   : > { %v576_v30 = vadd.f32 1e-05, %v544_v24  ;;  %v575_v31 = vadd.f32 1e-05, %v543_v25  ;;  %v514_v34 = vmul.f32 0.03125, %v474_v28  ;;  %v513_v35 = vmul.f32 0.03125, %v471_v29 }
  0xb9   : > { %4771 = vrsqrt.f32 %v576_v30  ;;  %v546_v38 = vsub.f32 %v514_v34, %v530_v27  ;;  %v545_v39 = vsub.f32 %v513_v35, %v529_v26 }
  0xba   : > { %4773 = vrsqrt.f32 %v575_v31  ;;  %v399_v40 = vpop.xlane.xlu1 %398  ;;  %v396_v41 = vpop.xlane.xlu0 %395 }
  0xbb   : > { %v578_v42 = vadd.f32 1e-05, %v546_v38  ;;  %v577_v43 = vadd.f32 1e-05, %v545_v39  ;;  %v5466_v46 = vmul.f32 0.03125, %v399_v40  ;;  %v5468_v47 = vmul.f32 0.03125, %v396_v41 }
  0xbd   : > { %4775 = vrsqrt.f32 %v578_v42  ;;  %v532_v59 = vmul.f32 %v5466_v46, %v5466_v46  ;;  %v531_v60 = vmul.f32 %v5468_v47, %v5468_v47  ;;  %v564_v38 = vsub.f32 %v5361_v16, %v5466_v46 }
  0xbe   : > { %4777 = vrsqrt.f32 %v577_v43  ;;  %v405_v44 = vpop.xlane.xlu1 %404  ;;  %v402_v45 = vpop.xlane.xlu0 %401  ;;  %v563_v39 = vsub.f32 %v5364_v17, %v5468_v47 }
  0xbf   : > { %v5472_v52 = vmul.f32 0.03125, %v405_v44  ;;  %v5474_v53 = vmul.f32 0.03125, %v402_v45 }
  0xc1   : > { %v534_v8 = vmul.f32 %v5472_v52, %v5472_v52  ;;  %v533_v9 = vmul.f32 %v5474_v53, %v5474_v53  ;;  %v566_v47 = vsub.f32 %v5371_v20, %v5472_v52 }
  0xc2   : > { %v480_v56 = vpop.xlane.xlu1 %479  ;;  %v477_v57 = vpop.xlane.xlu0 %476 }
  0xc3   : > { %v4772_v58 = vpop.eup %4771  ;;  %v516_v61 = vmul.f32 0.03125, %v480_v56  ;;  %v515_v62 = vmul.f32 0.03125, %v477_v57 }
  0xc4   : > { %v4774_v63 = vpop.eup %4773  ;;  %v608_v3 = vmul.f32 %v4772_v58, %v560_v51 }
  0xc5   : > { %v548_v1 = vsub.f32 %v516_v61, %v532_v59  ;;  %v547_v4 = vsub.f32 %v515_v62, %v531_v60  ;;  %v607_v5 = vmul.f32 %v4774_v63, %v559_v48  ;;  %v565_v59 = vsub.f32 %v5374_v21, %v5474_v53 }
  0xc6   : > { %v486_v10 = vpop.xlane.xlu1 %485  ;;  %v483_v11 = vpop.xlane.xlu0 %482 }
  0xc7   : > { %v4776_v14 = vpop.eup %4775  ;;  %v580_v15 = vadd.f32 1e-05, %v548_v1  ;;  %v579_v18 = vadd.f32 1e-05, %v547_v4  ;;  %v518_v19 = vmul.f32 0.03125, %v486_v10  ;;  %v517_v22 = vmul.f32 0.03125, %v483_v11 }
  0xc8   : > { %v4778_v23 = vpop.eup %4777  ;;  %v623_v24 = vpack.c.bf16 %v608_v3, %v607_v5  ;;  %v610_v25 = vmul.f32 %v4776_v14, %v562_v7 }
  0xc9   : > { %4779 = vrsqrt.f32 %v580_v15  ;;  %v550_v0 = vsub.f32 %v518_v19, %v534_v8  ;;  %v549_v12 = vsub.f32 %v517_v22, %v533_v9  ;;  %v609_v2 = vmul.f32 %v4778_v23, %v561_v6 }
  0xca   : > { %4781 = vrsqrt.f32 %v579_v18  ;;  %4191 = vmatprep.mubr.msk.bf16.mxu0 %vm381_vm0, %v623_v24  ;;  %v411_v13 = vpop.xlane.xlu1 %410  ;;  %v408_v26 = vpop.xlane.xlu0 %407 }
  0xcb   : > { %v582_v27 = vadd.f32 1e-05, %v550_v0  ;;  %v581_v28 = vadd.f32 1e-05, %v549_v12  ;;  %v624_v29 = vpack.c.bf16 %v610_v25, %v609_v2  ;;  %v5489_v34 = vmul.f32 0.03125, %v411_v13 }
  0xcc   : > { %v5491_v35 = vmul.f32 0.03125, %v408_v26 }
  0xcd   : > { %4783 = vrsqrt.f32 %v582_v27  ;;  %4192 = vmatmul.mubr.msk.bf16.vlgmr.msra.gmra.mrb[0].mxu0 %vm381_vm0, %v624_v29  ;;  %v536_v45 = vmul.f32 %v5489_v34, %v5489_v34  ;;  %v568_v24 = vsub.f32 %v5393_v32, %v5489_v34 }
  0xce   : > { %4785 = vrsqrt.f32 %v581_v28  ;;  %v417_v30 = vpop.xlane.xlu1 %416  ;;  %v414_v31 = vpop.xlane.xlu0 %413  ;;  %v535_v48 = vmul.f32 %v5491_v35, %v5491_v35  ;;  %v567_v25 = vsub.f32 %v5396_v33, %v5491_v35 }
  0xcf   : > { %v5497_v40 = vmul.f32 0.03125, %v417_v30  ;;  %v5499_v41 = vmul.f32 0.03125, %v414_v31 }
  0xd1   : > { %v538_v60 = vmul.f32 %v5497_v40, %v5497_v40  ;;  %v537_v61 = vmul.f32 %v5499_v41, %v5499_v41  ;;  %v570_v32 = vsub.f32 %v5403_v36, %v5497_v40  ;;  %v569_v33 = vsub.f32 %v5406_v37, %v5499_v41 }
  0xd2   : > { %v492_v42 = vpop.xlane.xlu1 %491  ;;  %v489_v43 = vpop.xlane.xlu0 %488 }
  0xd3   : > { %v4780_v44 = vpop.eup %4779  ;;  %v520_v51 = vmul.f32 0.03125, %v492_v42  ;;  %v519_v56 = vmul.f32 0.03125, %v489_v43 }
  0xd4   : > { %v4782_v57 = vpop.eup %4781  ;;  %v612_v16 = vmul.f32 %v4780_v44, %v564_v38 }
  0xd5   : > { %v552_v46 = vsub.f32 %v520_v51, %v536_v45  ;;  %v551_v58 = vsub.f32 %v519_v56, %v535_v48  ;;  %v611_v17 = vmul.f32 %v4782_v57, %v563_v39 }
  0xd6   : > { %v498_v62 = vpop.xlane.xlu1 %497  ;;  %v495_v63 = vpop.xlane.xlu0 %494 }
  0xd7   : > { %v4784_v3 = vpop.eup %4783  ;;  %v584_v1 = vadd.f32 1e-05, %v552_v46  ;;  %v583_v4 = vadd.f32 1e-05, %v551_v58  ;;  %v522_v5 = vmul.f32 0.03125, %v498_v62  ;;  %v521_v6 = vmul.f32 0.03125, %v495_v63 }
  0xd8   : > { %v4786_v7 = vpop.eup %4785  ;;  %v625_v8 = vpack.c.bf16 %v612_v16, %v611_v17  ;;  %v614_v9 = vmul.f32 %v4784_v3, %v566_v47 }
  0xd9   : > { %4787 = vrsqrt.f32 %v584_v1  ;;  %v554_v20 = vsub.f32 %v522_v5, %v538_v60  ;;  %v553_v52 = vsub.f32 %v521_v6, %v537_v61  ;;  %v613_v21 = vmul.f32 %v4786_v7, %v565_v59 }
  0xda   : > { %4789 = vrsqrt.f32 %v583_v4  ;;  %4195 = vmatprep.mubr.msk.bf16.mxu0 %vm381_vm0, %v625_v8  ;;  %v423_v53 = vpop.xlane.xlu1 %422  ;;  %v420_v10 = vpop.xlane.xlu0 %419 }
  0xdb   : > { %v586_v11 = vadd.f32 1e-05, %v554_v20  ;;  %v585_v14 = vadd.f32 1e-05, %v553_v52  ;;  %v626_v15 = vpack.c.bf16 %v614_v9, %v613_v21  ;;  %v444_v22 = vmul.f32 0.03125, %v423_v53 }
  0xdc   : > { %v443_v23 = vmul.f32 0.03125, %v420_v10 }
  0xdd   : > { %4791 = vrsqrt.f32 %v586_v11  ;;  %4196 = vmatmul.mubr.msk.bf16.gmra.mrb[4].mxu0 %vm381_vm0, %v626_v15  ;;  %v540_v27 = vmul.f32 %v444_v22, %v444_v22  ;;  %v572_v41 = vsub.f32 %v5428_v49, %v444_v22 }
  0xde   : > { %4793 = vrsqrt.f32 %v585_v14  ;;  %v429_v18 = vpop.xlane.xlu1 %428  ;;  %v426_v19 = vpop.xlane.xlu0 %425  ;;  %v539_v28 = vmul.f32 %v443_v23, %v443_v23  ;;  %v571_v62 = vsub.f32 %v5431_v50, %v443_v23  ;;  %v3882_v50 = vld [vmem:[%s7200_s2] ss:$0 sm:$0xff] }
  0xdf   : > { %v446_v0 = vmul.f32 0.03125, %v429_v18  ;;  %v445_v12 = vmul.f32 0.03125, %v426_v19 }
  0xe1   : > { %v542_v34 = vmul.f32 %v446_v0, %v446_v0  ;;  %v541_v35 = vmul.f32 %v445_v12, %v445_v12  ;;  %v574_v4 = vsub.f32 %v5441_v54, %v446_v0  ;;  %v573_v6 = vsub.f32 %v5444_v55, %v445_v12 }
  0xe2   : > { %v504_v2 = vpop.xlane.xlu1 %503  ;;  %v501_v13 = vpop.xlane.xlu0 %500 }
  0xe3   : > { %v4788_v26 = vpop.eup %4787  ;;  %v524_v29 = vmul.f32 0.03125, %v504_v2  ;;  %v523_v30 = vmul.f32 0.03125, %v501_v13 }
  0xe4   : > { %v4790_v31 = vpop.eup %4789  ;;  %v616_v38 = vmul.f32 %v4788_v26, %v568_v24 }
  0xe5   : > { %v556_v39 = vsub.f32 %v524_v29, %v540_v27  ;;  %v555_v42 = vsub.f32 %v523_v30, %v539_v28  ;;  %v615_v43 = vmul.f32 %v4790_v31, %v567_v25 }
  0xe6   : > { %v510_v44 = vpop.xlane.xlu1 %509  ;;  %v507_v45 = vpop.xlane.xlu0 %506 }
  0xe7   : > { %v4792_v48 = vpop.eup %4791  ;;  %v588_v51 = vadd.f32 1e-05, %v556_v39  ;;  %v587_v56 = vadd.f32 1e-05, %v555_v42  ;;  %v526_v57 = vmul.f32 0.03125, %v510_v44  ;;  %v525_v16 = vmul.f32 0.03125, %v507_v45 }
  0xe8   : > { %v4794_v46 = vpop.eup %4793  ;;  %v627_v58 = vpack.c.bf16 %v616_v38, %v615_v43  ;;  %v618_v17 = vmul.f32 %v4792_v48, %v570_v32 }
  0xe9   : > { %4795 = vrsqrt.f32 %v588_v51  ;;  %v558_v47 = vsub.f32 %v526_v57, %v542_v34  ;;  %v557_v59 = vsub.f32 %v525_v16, %v541_v35  ;;  %v617_v60 = vmul.f32 %v4794_v46, %v569_v33 }
  0xea   : > { %4797 = vrsqrt.f32 %v587_v56  ;;  %4199 = vmatprep.mubr.msk.bf16.mxu0 %vm381_vm0, %v627_v58 }
  0xeb   : > { %v590_v36 = vadd.f32 1e-05, %v558_v47  ;;  %v589_v37 = vadd.f32 1e-05, %v557_v59  ;;  %v628_v40 = vpack.c.bf16 %v618_v17, %v617_v60 }
  0xed   : > { %4799 = vrsqrt.f32 %v590_v36  ;;  %4200 = vmatmul.mubr.msk.bf16.gmra.mrb[8].mxu0 %vm381_vm0, %v628_v40 }
  0xee   : > { %4801 = vrsqrt.f32 %v589_v37 }
  0xf3   : > { %v4796_v61 = vpop.eup %4795 }
  0xf4   : > { %v4798_v63 = vpop.eup %4797  ;;  %v620_v3 = vmul.f32 %v4796_v61, %v572_v41 }
  0xf5   : > { %v619_v1 = vmul.f32 %v4798_v63, %v571_v62 }
  0xf7   : > { %v4800_v5 = vpop.eup %4799  ;;  %v629_v7 = vpack.c.bf16 %v620_v3, %v619_v1 }
  0xf8   : > { %v4802_v8 = vpop.eup %4801  ;;  %v622_v9 = vmul.f32 %v4800_v5, %v574_v4 }
  0xf9   : > { %4203 = vmatprep.mubr.msk.bf16.mxu0 %vm381_vm0, %v629_v7  ;;  %v621_v20 = vmul.f32 %v4802_v8, %v573_v6 }
  0xfb   : > { %v630_v52 = vpack.c.bf16 %v622_v9, %v621_v20 }
  0xfd   : > { %4204 = vmatmul.mubr.msk.bf16.gmra.mrb[12].mxu0 %vm381_vm0, %v630_v52 }
 0x1a0   : > { %v4193_v49 = vpop.f32.mrb[0].mxu0 }
 0x1a1   : > { %v712_v21 = vpop.f32.mrb[1].mxu0  ;;  %v721_v54 = vadd.f32 %v4193_v49, %v3882_v50 }
 0x1a2   : > { %v4194_v53 = vpop.f32.mrb[2].mxu0  ;;  %v713_v55 = vadd.f32 %v3882_v50, %v712_v21  ;;  %v785_v21 = vld [vmem:[%s7201_s3 + $0x10] sm:$0xff] }
 0x1a3   : > { %v724_v10 = vadd.f32 %v4194_v53, %v3882_v50  ;;  %v715_v11 = vpop.f32.mrb[3].mxu0 }
 0x1a4   : > { %v716_v14 = vadd.f32 %v3882_v50, %v715_v11  ;;  %v784_v11 = vld [vmem:[%s7201_s3 + $0x8] sm:$0xff] }
 0x1a5   : > { %v5534_v15 = vpack.c.bf16 %v724_v10, %v721_v54 }
 0x1a6   : > { %v5536_v18 = vpack.c.bf16 %v716_v14, %v713_v55  ;;  %v783_v55 = vld [vmem:[%s7201_s3] sm:$0xff] }
 0x1a7   : > { %809 = vrot.lane.b32.xlu1 %v5534_v15, %s5203_s25 }
 0x1a8   : > { %807 = vrot.lane.b32.xlu0 %v5536_v18, %s5203_s25  ;;  %4223 = vmatprep.mubr.msk.bf16.mxu1 %vm823_vm1, %v5536_v18 }
 0x1b0   : > { %v4197_v19 = vpop.f32.mrb[4].mxu0 }
 0x1b1   : > { %v728_v22 = vpop.f32.mrb[5].mxu0  ;;  %v737_v24 = vadd.f32 %v4197_v19, %v3882_v50 }
 0x1b2   : > { %v4198_v23 = vpop.f32.mrb[6].mxu0  ;;  %v729_v12 = vadd.f32 %v3882_v50, %v728_v22 }
 0x1b3   : > { %v740_v25 = vadd.f32 %v4198_v23, %v3882_v50  ;;  %v731_v0 = vpop.f32.mrb[7].mxu0 }
 0x1b4   : > { %v732_v2 = vadd.f32 %v3882_v50, %v731_v0  ;;  %v790_v0 = vld [vmem:[%s7201_s3 + $0x38] sm:$0xff] }
 0x1b5   : > { %v5544_v13 = vpack.c.bf16 %v740_v25, %v737_v24  ;;  %v786_v24 = vld [vmem:[%s7201_s3 + $0x18] sm:$0xff] }
 0x1b6   : > { %v5546_v26 = vpack.c.bf16 %v732_v2, %v729_v12 }
 0x1b8   : > { %811 = vrot.lane.b32.xlu1 %v5546_v26, %s5203_s25 }
 0x1bc   : > { %813 = vrot.lane.b32.xlu1 %v5544_v13, %s5203_s25 }
 0x1c0   : > { %v4201_v27 = vpop.f32.mrb[8].mxu0 }
 0x1c1   : > { %v744_v28 = vpop.f32.mrb[9].mxu0  ;;  %v753_v30 = vadd.f32 %v4201_v27, %v3882_v50  ;;  %v789_v27 = vld [vmem:[%s7201_s3 + $0x30] sm:$0xff] }
 0x1c2   : > { %v4202_v29 = vpop.f32.mrb[10].mxu0  ;;  %v745_v39 = vadd.f32 %v3882_v50, %v744_v28 }
 0x1c3   : > { %v756_v31 = vadd.f32 %v4202_v29, %v3882_v50  ;;  %v747_v38 = vpop.f32.mrb[11].mxu0 }
 0x1c4   : > { %v748_v42 = vadd.f32 %v3882_v50, %v747_v38 }
 0x1c5   : > { %v5552_v43 = vpack.c.bf16 %v756_v31, %v753_v30  ;;  %v788_v31 = vld [vmem:[%s7201_s3 + $0x28] sm:$0xff] }
 0x1c6   : > { %v5554_v32 = vpack.c.bf16 %v748_v42, %v745_v39  ;;  %v787_v39 = vld [vmem:[%s7201_s3 + $0x20] sm:$0xff] }
 0x1c7   : > { %817 = vrot.lane.b32.xlu1 %v5552_v43, %s5203_s25 }
 0x1c8   : > { %815 = vrot.lane.b32.xlu0 %v5554_v32, %s5203_s25 }
 0x1d0   : > { %v4205_v33 = vpop.f32.mrb[12].mxu0 }
 0x1d1   : > { %v760_v34 = vpop.f32.mrb[13].mxu0  ;;  %v769_v44 = vadd.f32 %v4205_v33, %v3882_v50 }
 0x1d2   : > { %v4206_v35 = vpop.f32.mrb[14].mxu0  ;;  %v761_v51 = vadd.f32 %v3882_v50, %v760_v34  ;;  %v794_v34 = vld [vmem:[%s7201_s3 + $0x58] sm:$0xff] }
 0x1d3   : > { %v772_v45 = vadd.f32 %v4206_v35, %v3882_v50  ;;  %v763_v48 = vpop.f32.mrb[15].mxu0 }
 0x1d4   : > { %v764_v56 = vadd.f32 %v3882_v50, %v763_v48 }
 0x1d5   : > { %v5560_v57 = vpack.c.bf16 %v772_v45, %v769_v44  ;;  %v793_v45 = vld [vmem:[%s7201_s3 + $0x50] sm:$0xff] }
 0x1d6   : > { %v5562_v16 = vpack.c.bf16 %v764_v56, %v761_v51 }
 0x1d7   : > { %821 = vrot.lane.b32.xlu1 %v5560_v57, %s5203_s25 }
 0x1d8   : > { %819 = vrot.lane.b32.xlu0 %v5562_v16, %s5203_s25  ;;  %s5214_s25 = smov 8  }
 0x1db   : > { %1123 = vrot.lane.b32.xlu1 %v5534_v15, %s5204_s26 }
 0x1dc   : > { %1121 = vrot.lane.b32.xlu0 %v5536_v18, %s5204_s26 }
 0x1df   : > { %1127 = vrot.lane.b32.xlu1 %v5544_v13, %s5204_s26 }
 0x1e0   : > { %1125 = vrot.lane.b32.xlu0 %v5546_v26, %s5204_s26 }
 0x1e3   : > { %1131 = vrot.lane.b32.xlu1 %v5552_v43, %s5204_s26 }
 0x1e4   : > { %1129 = vrot.lane.b32.xlu0 %v5554_v32, %s5204_s26 }
 0x1e7   : > { %1135 = vrot.lane.b32.xlu1 %v5560_v57, %s5204_s26 }
 0x1e8   : > { %1275 = vrot.lane.b32.xlu0 %v5536_v18, %s5205_s27 }
 0x1eb   : > { %1277 = vrot.lane.b32.xlu1 %v5534_v15, %s5205_s27 }
 0x1ec   : > { %1133 = vrot.lane.b32.xlu0 %v5562_v16, %s5204_s26  ;;  %s5215_s26 = smov 16  }
 0x219   : > { %v810_v17 = vpop.permute.xlu1 %809 }
 0x21a   : > { %v808_v46 = vpop.permute.xlu0 %807  ;;  %v852_v47 = vsel %vm823_vm1, %v810_v17, 0 }
 0x21b   : > { %4551 = vmatprep.subr.msk.bf16.mxu1 %vm823_vm1, %v808_v46  ;;  %v849_v58 = vsel %vm823_vm1, %v808_v46, 0  ;;  %v792_v46 = vld [vmem:[%s7201_s3 + $0x48] sm:$0xff] }
 0x21c   : > { %4208 = vmatpush3.bf16.xpose.msra.mxu1 %v849_v58 }
 0x21d   : > { %4552 = vmatprep.subr.msk.bf16.mxu1 %vm823_vm1, %v810_v17  ;;  %v791_v17 = vld [vmem:[%s7201_s3 + $0x40] sm:$0xff] }
 0x224   : > { %4210 = vmatpush3.bf16.xpose.msra.mxu1 %v852_v47 }
 0x22a   : > { %v812_v59 = vpop.permute.xlu1 %811 }
 0x22b   : > { %4553 = vmatprep.subr.msk.bf16.mxu1 %vm823_vm1, %v812_v59  ;;  %v855_v60 = vsel %vm823_vm1, %v812_v59, 0 }
 0x22c   : > { %4212 = vmatpush3.bf16.xpose.msra.mxu1 %v855_v60 }
 0x22e   : > { %v814_v36 = vpop.permute.xlu1 %813 }
 0x22f   : > { %4554 = vmatprep.subr.msk.bf16.mxu1 %vm823_vm1, %v814_v36  ;;  %v858_v37 = vsel %vm823_vm1, %v814_v36, 0 }
 0x234   : > { %4214 = vmatpush3.bf16.xpose.msra.mxu1 %v858_v37  ;;  %v797_v37 = vld [vmem:[%s7201_s3 + $0x70] sm:$0xff] }
 0x239   : > { %v818_v61 = vpop.permute.xlu1 %817 }
 0x23a   : > { %v816_v40 = vpop.permute.xlu0 %815  ;;  %v864_v62 = vsel %vm823_vm1, %v818_v61, 0 }
 0x23b   : > { %4555 = vmatprep.subr.msk.bf16.mxu1 %vm823_vm1, %v816_v40  ;;  %v861_v41 = vsel %vm823_vm1, %v816_v40, 0 }
 0x23c   : > { %4216 = vmatpush3.bf16.xpose.msra.mxu1 %v861_v41 }
 0x23d   : > { %4556 = vmatprep.subr.msk.bf16.mxu1 %vm823_vm1, %v818_v61 }
 0x244   : > { %4218 = vmatpush3.bf16.xpose.msra.mxu1 %v864_v62  ;;  %v795_v62 = vld [vmem:[%s7201_s3 + $0x60] sm:$0xff] }
 0x249   : > { %v822_v63 = vpop.permute.xlu1 %821 }
 0x24a   : > { %v820_v3 = vpop.permute.xlu0 %819  ;;  %v870_v7 = vsel %vm823_vm1, %v822_v63, 0 }
 0x24b   : > { %4557 = vmatprep.subr.msk.bf16.mxu1 %vm823_vm1, %v820_v3  ;;  %v867_v1 = vsel %vm823_vm1, %v820_v3, 0  ;;  %v798_v3 = vld [vmem:[%s7201_s3 + $0x78] sm:$0xff] }
 0x24c   : > { %4220 = vmatpush3.bf16.xpose.msra.mxu1 %v867_v1 }
 0x24d   : > { %4558 = vmatprep.subr.msk.bf16.mxu1 %vm823_vm1, %v822_v63  ;;  %v1124_v5 = vpop.permute.xlu1 %1123 }
 0x24e   : > { %v1122_v4 = vpop.permute.xlu0 %1121 }
 0x24f   : > { %4239 = vmatprep.subr.bf16.mxu0 %v1122_v4 }
 0x250   : > { %4240 = vmatpush3.bf16.msra.mxu0 %v1122_v4  ;;  %v796_v4 = vld [vmem:[%s7201_s3 + $0x68] sm:$0xff] }
 0x251   : > { %4241 = vmatprep.subr.bf16.mxu0 %v1124_v5  ;;  %v1128_v8 = vpop.permute.xlu1 %1127 }
 0x252   : > { %v1126_v6 = vpop.permute.xlu0 %1125 }
 0x254   : > { %4242 = vmatpush3.bf16.msra.mxu0 %v1124_v5  ;;  %4222 = vmatpush3.bf16.xpose.msra.mxu1 %v870_v7 }
 0x255   : > { %4243 = vmatprep.subr.bf16.mxu0 %v1126_v6  ;;  %v1132_v52 = vpop.permute.xlu1 %1131 }
 0x256   : > { %v1130_v9 = vpop.permute.xlu0 %1129 }
 0x258   : > { %4244 = vmatpush3.bf16.msra.mxu0 %v1126_v6 }
 0x259   : > { %4245 = vmatprep.subr.bf16.mxu0 %v1128_v8  ;;  %v1136_v50 = vpop.permute.xlu1 %1135 }
 0x25a   : > { %v5600_v20 = vpop.permute.xlu0 %1275 }
 0x25b   : > { %4224 = vmatmul.mubr.msk.bf16.vlgmr.msra.gmra.mrb[0].mxu1 %vm823_vm1, %v5534_v15 }
 0x25c   : > { %4246 = vmatpush3.bf16.msra.mxu0 %v1128_v8  ;;  %4227 = vmatprep.mubr.msk.bf16.mxu1 %vm823_vm1, %v5546_v26 }
 0x25d   : > { %4247 = vmatprep.subr.bf16.mxu0 %v1130_v9  ;;  %v5714_v6 = vpop.permute.xlu1 %1277 }
 0x25e   : > { %v1134_v49 = vpop.permute.xlu0 %1133 }
 0x260   : > { %4248 = vmatpush3.bf16.msra.mxu0 %v1130_v9 }
 0x261   : > { %4249 = vmatprep.subr.bf16.mxu0 %v1132_v52 }
 0x263   : > { %4228 = vmatmul.mubr.msk.bf16.gmra.mrb[4].mxu1 %vm823_vm1, %v5544_v13 }
 0x264   : > { %4250 = vmatpush3.bf16.msra.mxu0 %v1132_v52  ;;  %4231 = vmatprep.mubr.msk.bf16.mxu1 %vm823_vm1, %v5554_v32 }
 0x265   : > { %4251 = vmatprep.subr.bf16.mxu0 %v1134_v49 }
 0x268   : > { %4252 = vmatpush3.bf16.msra.mxu0 %v1134_v49 }
 0x269   : > { %4253 = vmatprep.subr.bf16.mxu0 %v1136_v50 }
 0x26b   : > { %4232 = vmatmul.mubr.msk.bf16.gmra.mrb[8].mxu1 %vm823_vm1, %v5552_v43 }
 0x26c   : > { %4254 = vmatpush3.bf16.msra.mxu0 %v1136_v50  ;;  %4235 = vmatprep.mubr.msk.bf16.mxu1 %vm823_vm1, %v5562_v16 }
 0x26d   : > { %4559 = vmatprep.subr.msk.bf16.mxu0 %vm823_vm1, %v5600_v20 }
 0x273   : > { %4236 = vmatmul.mubr.msk.bf16.gmra.mrb[12].mxu1 %vm823_vm1, %v5560_v57 }
 0x32e   : > { %v4225_v53 = vpop.f32.mrb[0].mxu1 }
 0x32f   : > { %v5617_v54 = vadd.f32 %v4225_v53, %v785_v21  ;;  %v906_v10 = vpop.f32.mrb[1].mxu1 }
 0x330   : > { %v4226_v14 = vpop.f32.mrb[2].mxu1  ;;  %v5628_v23 = vadd.f32 %v906_v10, %v783_v55 }
 0x331   : > { %973 = vmax.xlane.f32.xlu0 %v5617_v54  ;;  %v909_v19 = vpop.f32.mrb[3].mxu1  ;;  %v5638_v12 = vadd.f32 %v4226_v14, %v786_v24 }
 0x332   : > { %v5626_v22 = vadd.f32 %v909_v19, %v784_v11 }
 0x334   : > { %971 = vmax.xlane.f32.xlu1 %v5626_v22 }
 0x335   : > { %969 = vmax.xlane.f32.xlu0 %v5628_v23 }
 0x336   : > { %v4229_v25 = vpop.f32.mrb[4].mxu1 }
 0x337   : > { %v922_v2 = vpop.f32.mrb[5].mxu1  ;;  %v5649_v38 = vadd.f32 %v4229_v25, %v789_v27 }
 0x338   : > { %v4230_v28 = vpop.f32.mrb[6].mxu1  ;;  %v5661_v35 = vadd.f32 %v922_v2, %v787_v39 }
 0x339   : > { %v5643_v29 = vadd.f32 %v4230_v28, %v790_v0  ;;  %v925_v30 = vpop.f32.mrb[7].mxu1  ;;  %975 = vmax.xlane.f32.xlu0 %v5638_v12 }
 0x33a   : > { %v5655_v42 = vadd.f32 %v925_v30, %v788_v31 }
 0x33b   : > { %983 = vmax.xlane.f32.xlu1 %v5643_v29 }
 0x33d   : > { %981 = vmax.xlane.f32.xlu0 %v5649_v38 }
 0x33e   : > { %v4233_v33 = vpop.f32.mrb[8].mxu1 }
 0x33f   : > { %v938_v44 = vpop.f32.mrb[9].mxu1  ;;  %979 = vmax.xlane.f32.xlu1 %v5655_v42  ;;  %v5673_v58 = vadd.f32 %v4233_v33, %v793_v45 }
 0x340   : > { %v4234_v48 = vpop.f32.mrb[10].mxu1  ;;  %v5682_v60 = vadd.f32 %v938_v44, %v791_v17 }
 0x341   : > { %v5667_v51 = vadd.f32 %v4234_v48, %v794_v34  ;;  %v941_v56 = vpop.f32.mrb[11].mxu1  ;;  %977 = vmax.xlane.f32.xlu0 %v5661_v35 }
 0x342   : > { %v5679_v47 = vadd.f32 %v941_v56, %v792_v46 }
 0x343   : > { %991 = vmax.xlane.f32.xlu1 %v5667_v51 }
 0x345   : > { %989 = vmax.xlane.f32.xlu0 %v5673_v58 }
 0x346   : > { %v4237_v59 = vpop.f32.mrb[12].mxu1 }
 0x347   : > { %v954_v36 = vpop.f32.mrb[13].mxu1  ;;  %987 = vmax.xlane.f32.xlu1 %v5679_v47  ;;  %v5689_v61 = vadd.f32 %v4237_v59, %v797_v37 }
 0x348   : > { %v4238_v40 = vpop.f32.mrb[14].mxu1  ;;  %v5695_v63 = vadd.f32 %v954_v36, %v795_v62 }
 0x349   : > { %v957_v41 = vpop.f32.mrb[15].mxu1  ;;  %985 = vmax.xlane.f32.xlu0 %v5682_v60  ;;  %v5705_v1 = vadd.f32 %v4238_v40, %v798_v3 }
 0x34a   : > { %v5711_v5 = vadd.f32 %v957_v41, %v796_v4 }
 0x34d   : > { %997 = vmax.xlane.f32.xlu0 %v5689_v61 }
 0x351   : > { %993 = vmax.xlane.f32.xlu0 %v5695_v63 }
 0x358   : > { %1281 = vrot.lane.b32.xlu1 %v5544_v13, %s5205_s27 }
 0x367   : > { %1279 = vrot.lane.b32.xlu0 %v5546_v26, %s5205_s27 }
 0x37c   : > { %999 = vmax.xlane.f32.xlu1 %v5705_v1 }
 0x380   : > { %995 = vmax.xlane.f32.xlu1 %v5711_v5 }
 0x3be   : > { %v974_v7 = vpop.xlane.xlu0 %973 }
 0x3bf   : > { %v1003_v8 = vsub.f32 %v5617_v54, %v974_v7 }
 0x3c1   : > { %v1021_v9 = vmul.f32 1.442695, %v1003_v8  ;;  %v972_v52 = vpop.xlane.xlu1 %971 }
 0x3c2   : > { %v1002_v49 = vsub.f32 %v5626_v22, %v972_v52  ;;  %v970_v50 = vpop.xlane.xlu0 %969 }
 0x3c3   : > { %4803 = vpow2.f32 %v1021_v9  ;;  %v1001_v21 = vsub.f32 %v5628_v23, %v970_v50 }
 0x3c4   : > { %v1019_v53 = vmul.f32 1.442695, %v1002_v49 }
 0x3c5   : > { %v1017_v10 = vmul.f32 1.442695, %v1001_v21 }
 0x3c6   : > { %4805 = vpow2.f32 %v1019_v53  ;;  %v976_v11 = vpop.xlane.xlu0 %975 }
 0x3c7   : > { %4807 = vpow2.f32 %v1017_v10  ;;  %v1004_v55 = vsub.f32 %v5638_v12, %v976_v11 }
 0x3c8   : > { %v984_v0 = vpop.xlane.xlu1 %983 }
 0x3c9   : > { %v1023_v14 = vmul.f32 1.442695, %v1004_v55  ;;  %v1008_v44 = vsub.f32 %v5643_v29, %v984_v0 }
 0x3ca   : > { %v982_v24 = vpop.xlane.xlu0 %981 }
 0x3cb   : > { %4809 = vpow2.f32 %v1023_v14  ;;  %v1007_v2 = vsub.f32 %v5649_v38, %v982_v24  ;;  %v1031_v46 = vmul.f32 1.442695, %v1008_v44 }
 0x3cc   : > { %v980_v27 = vpop.xlane.xlu1 %979 }
 0x3cd   : > { %v5720_v19 = vpop.eup %4803  ;;  %v1029_v30 = vmul.f32 1.442695, %v1007_v2  ;;  %v1006_v39 = vsub.f32 %v5655_v42, %v980_v27 }
 0x3ce   : > { %1053 = vadd.xlane.f32.xlu1 %v5720_v19  ;;  %v978_v25 = vpop.xlane.xlu0 %977 }
 0x3cf   : > { %v1005_v31 = vsub.f32 %v5661_v35, %v978_v25  ;;  %4811 = vpow2.f32 %v1029_v30  ;;  %v1027_v48 = vmul.f32 1.442695, %v1006_v39 }
 0x3d0   : > { %v5723_v54 = vpop.eup %4805  ;;  %v992_v33 = vpop.xlane.xlu1 %991 }
 0x3d1   : > { %v5725_v22 = vpop.eup %4807  ;;  %1051 = vadd.xlane.f32.xlu0 %v5723_v54  ;;  %v1025_v45 = vmul.f32 1.442695, %v1005_v31  ;;  %v1012_v29 = vsub.f32 %v5667_v51, %v992_v33 }
 0x3d2   : > { %1049 = vadd.xlane.f32.xlu1 %v5725_v22  ;;  %v990_v12 = vpop.xlane.xlu0 %989 }
 0x3d3   : > { %v1011_v56 = vsub.f32 %v5673_v58, %v990_v12  ;;  %4813 = vpow2.f32 %v1025_v45  ;;  %v1039_v62 = vmul.f32 1.442695, %v1012_v29 }
 0x3d4   : > { %v988_v17 = vpop.xlane.xlu1 %987  ;;  %4815 = vpow2.f32 %v1027_v48  ;;  %v1316_v48 = vsel %vm823_vm1, %v5600_v20, 0 }
 0x3d5   : > { %v5729_v23 = vpop.eup %4809  ;;  %v1037_v59 = vmul.f32 1.442695, %v1011_v56  ;;  %4817 = vpow2.f32 %v1031_v46 }
 0x3d6   : > { %1055 = vadd.xlane.f32.xlu1 %v5729_v23  ;;  %v986_v28 = vpop.xlane.xlu0 %985 }
 0x3d7   : > { %v1009_v35 = vsub.f32 %v5682_v60, %v986_v28  ;;  %4819 = vpow2.f32 %v1037_v59  ;;  %v1010_v60 = vsub.f32 %v5679_v47, %v988_v17 }
 0x3d8   : > { %v5747_v58 = vpop.permute.xlu1 %1281 }
 0x3d9   : > { %v1033_v40 = vmul.f32 1.442695, %v1009_v35  ;;  %v5745_v41 = vpop.eup %4811  ;;  %v1035_v7 = vmul.f32 1.442695, %v1010_v60 }
 0x3da   : > { %v998_v34 = vpop.xlane.xlu0 %997 }
 0x3db   : > { %v1015_v38 = vsub.f32 %v5689_v61, %v998_v34 }
 0x3dd   : > { %v1045_v42 = vmul.f32 1.442695, %v1015_v38  ;;  %v5751_v3 = vpop.eup %4813 }
 0x3de   : > { %v994_v36 = vpop.xlane.xlu0 %993 }
 0x3df   : > { %v1013_v37 = vsub.f32 %v5695_v63, %v994_v36  ;;  %4821 = vpow2.f32 %v1045_v42  ;;  %v5753_v63 = vpop.eup %4815 }
 0x3e0   : > { %4823 = vpow2.f32 %v1033_v40  ;;  %v5758_v9 = vpop.eup %4817 }
 0x3e1   : > { %v1041_v61 = vmul.f32 1.442695, %v1013_v37  ;;  %v5760_v47 = vpop.eup %4819 }
 0x3e2   : > { %v1280_v14 = vpop.permute.xlu0 %1279 }
 0x3e3   : > { %4825 = vpow2.f32 %v1041_v61 }
 0x3e4   : > { %4827 = vpow2.f32 %v1039_v62 }
 0x3e7   : > { %1283 = vrot.lane.b32.xlu0 %v5554_v32, %s5205_s27  ;;  %1285 = vrot.lane.b32.xlu1 %v5552_v43, %s5205_s27 }
 0x3e9   : > { %v5765_v50 = vpop.eup %4821 }
 0x3ea   : > { %v5767_v21 = vpop.eup %4823 }
 0x3ed   : > { %v5771_v53 = vpop.eup %4825 }
 0x3ee   : > { %v5773_v10 = vpop.eup %4827 }
 0x406   : > { %1061 = vadd.xlane.f32.xlu0 %v5745_v41 }
 0x409   : > { %v1000_v4 = vpop.xlane.xlu1 %999 }
 0x40a   : > { %v1016_v51 = vsub.f32 %v5705_v1, %v1000_v4  ;;  %1057 = vadd.xlane.f32.xlu0 %v5751_v3 }
 0x40b   : > { %1059 = vadd.xlane.f32.xlu1 %v5753_v63 }
 0x40c   : > { %v1047_v8 = vmul.f32 1.442695, %v1016_v51 }
 0x40d   : > { %v996_v52 = vpop.xlane.xlu1 %995 }
 0x40e   : > { %4829 = vpow2.f32 %v1047_v8  ;;  %v1014_v49 = vsub.f32 %v5711_v5, %v996_v52  ;;  %1063 = vadd.xlane.f32.xlu0 %v5758_v9 }
 0x40f   : > { %1069 = vadd.xlane.f32.xlu1 %v5760_v47  ;;  %4831 = vpow2.f32 %v1035_v7 }
 0x410   : > { %v1043_v1 = vmul.f32 1.442695, %v1014_v49 }
 0x412   : > { %1077 = vadd.xlane.f32.xlu0 %v5765_v50  ;;  %4833 = vpow2.f32 %v1043_v1 }
 0x413   : > { %1065 = vadd.xlane.f32.xlu1 %v5767_v21 }
 0x416   : > { %1073 = vadd.xlane.f32.xlu0 %v5771_v53 }
 0x417   : > { %1071 = vadd.xlane.f32.xlu1 %v5773_v10 }
 0x418   : > { %v5777_v5 = vpop.eup %4829 }
 0x419   : > { %v5779_v11 = vpop.eup %4831 }
 0x41a   : > { %1079 = vadd.xlane.f32.xlu0 %v5777_v5 }
 0x41b   : > { %1067 = vadd.xlane.f32.xlu1 %v5779_v11 }
 0x41c   : > { %v5783_v55 = vpop.eup %4833 }
 0x41f   : > { %1075 = vadd.xlane.f32.xlu1 %v5783_v55 }
 0x430   : > { %1289 = vrot.lane.b32.xlu1 %v5560_v57, %s5205_s27  ;;  %1287 = vrot.lane.b32.xlu0 %v5562_v16, %s5205_s27  ;;  %s5208_s27 = smov 80  }
 0x434   : > { %1261 = vrot.lane.b32.xlu1 %v5534_v15, %s5206_s20  ;;  %1259 = vrot.lane.b32.xlu0 %v5536_v18, %s5206_s20 }
 0x438   : > { %1265 = vrot.lane.b32.xlu1 %v5544_v13, %s5206_s20  ;;  %1263 = vrot.lane.b32.xlu0 %v5546_v26, %s5206_s20 }
 0x43c   : > { %1269 = vrot.lane.b32.xlu1 %v5552_v43, %s5206_s20  ;;  %1267 = vrot.lane.b32.xlu0 %v5554_v32, %s5206_s20 }
 0x440   : > { %1273 = vrot.lane.b32.xlu1 %v5560_v57, %s5206_s20  ;;  %1271 = vrot.lane.b32.xlu0 %v5562_v16, %s5206_s20 }
 0x444   : > { %1590 = vrot.lane.b32.xlu1 %v5534_v15, %s5207_s21  ;;  %1588 = vrot.lane.b32.xlu0 %v5536_v18, %s5207_s21 }
 0x448   : > { %1594 = vrot.lane.b32.xlu1 %v5544_v13, %s5207_s21  ;;  %1592 = vrot.lane.b32.xlu0 %v5546_v26, %s5207_s21 }
 0x44c   : > { %1598 = vrot.lane.b32.xlu1 %v5552_v43, %s5207_s21  ;;  %1596 = vrot.lane.b32.xlu0 %v5554_v32, %s5207_s21 }
 0x450   : > { %1602 = vrot.lane.b32.xlu1 %v5560_v57, %s5207_s21  ;;  %1600 = vrot.lane.b32.xlu0 %v5562_v16, %s5207_s21 }
 0x454   : > { %1744 = vrot.lane.b32.xlu1 %v5534_v15, %s5208_s27  ;;  %1742 = vrot.lane.b32.xlu0 %v5536_v18, %s5208_s27 }
 0x45b   : > { %v1054_v24 = vpop.xlane.xlu1 %1053 }
 0x45e   : > { %v1052_v25 = vpop.xlane.xlu0 %1051 }
 0x45f   : > { %4835 = vrcp.f32 %v1052_v25  ;;  %v1050_v0 = vpop.xlane.xlu1 %1049 }
 0x460   : > { %4837 = vrcp.f32 %v1050_v0 }
 0x461   : > { %4839 = vrcp.f32 %v1054_v24 }
 0x462   : > { %v1284_v20 = vpop.permute.xlu0 %1283 }
 0x463   : > { %v1056_v12 = vpop.xlane.xlu1 %1055 }
 0x464   : > { %4841 = vrcp.f32 %v1056_v12 }
 0x469   : > { %v4836_v2 = vpop.eup %4835 }
 0x46a   : > { %v4838_v27 = vpop.eup %4837  ;;  %v1098_v28 = vmul.f32 %v4836_v2, %v5723_v54  ;;  %v1319_v54 = vsel %vm823_vm1, %v5714_v6, 0 }
 0x46b   : > { %v1097_v30 = vmul.f32 %v4838_v27, %v5725_v22  ;;  %v4840_v31 = vpop.eup %4839  ;;  %v1325_v22 = vsel %vm823_vm1, %v5747_v58, 0 }
 0x46c   : > { %v1099_v34 = vmul.f32 %v4840_v31, %v5720_v19  ;;  %v1322_v19 = vsel %vm823_vm1, %v1280_v14, 0 }
 0x46d   : > { %v1113_v39 = vpack.c.bf16 %v1098_v28, %v1097_v30 }
 0x46e   : > { %v4842_v33 = vpop.eup %4841 }
 0x46f   : > { %v1100_v44 = vmul.f32 %v4842_v33, %v5729_v23  ;;  %4255 = vmatprep.mubr.bf16.mxu0 %v1113_v39  ;;  %v1328_v23 = vsel %vm823_vm1, %v1284_v20, 0 }
 0x471   : > { %v1114_v45 = vpack.c.bf16 %v1100_v44, %v1099_v34 }
 0x473   : > { %4256 = vmatmul.mubr.bf16.vlgmr.msra.gmra.mrb[16].mxu0 %v1114_v45 }
 0x474   : > { %4272 = vmatpush3.bf16.xpose.msra.mxu0 %v1316_v48 }
 0x475   : > { %4560 = vmatprep.subr.msk.bf16.mxu0 %vm823_vm1, %v5714_v6  ;;  %v1286_v6 = vpop.permute.xlu1 %1285 }
 0x476   : > { %v1331_v38 = vsel %vm823_vm1, %v1286_v6, 0 }
 0x47c   : > { %4274 = vmatpush3.bf16.xpose.msra.mxu0 %v1319_v54 }
 0x47d   : > { %4561 = vmatprep.subr.msk.bf16.mxu0 %vm823_vm1, %v1280_v14 }
 0x484   : > { %4276 = vmatpush3.bf16.xpose.msra.mxu0 %v1322_v19 }
 0x485   : > { %4562 = vmatprep.subr.msk.bf16.mxu0 %vm823_vm1, %v5747_v58 }
 0x48c   : > { %4278 = vmatpush3.bf16.xpose.msra.mxu0 %v1325_v22 }
 0x48d   : > { %4563 = vmatprep.subr.msk.bf16.mxu0 %vm823_vm1, %v1284_v20 }
 0x493   : > { %v1062_v56 = vpop.xlane.xlu0 %1061 }
 0x494   : > { %4280 = vmatpush3.bf16.xpose.msra.mxu0 %v1328_v23 }
 0x495   : > { %4564 = vmatprep.subr.msk.bf16.mxu0 %vm823_vm1, %v1286_v6 }
 0x497   : > { %v1058_v46 = vpop.xlane.xlu0 %1057 }
 0x498   : > { %4843 = vrcp.f32 %v1058_v46  ;;  %v1060_v17 = vpop.xlane.xlu1 %1059 }
 0x499   : > { %4845 = vrcp.f32 %v1060_v17 }
 0x49a   : > { %4847 = vrcp.f32 %v1062_v56 }
 0x49b   : > { %v1064_v59 = vpop.xlane.xlu0 %1063 }
 0x49c   : > { %4282 = vmatpush3.bf16.xpose.msra.mxu0 %v1331_v38  ;;  %4849 = vrcp.f32 %v1064_v59  ;;  %v1070_v35 = vpop.xlane.xlu1 %1069 }
 0x49f   : > { %v1078_v36 = vpop.xlane.xlu0 %1077 }
 0x4a0   : > { %v1066_v42 = vpop.xlane.xlu1 %1065 }
 0x4a2   : > { %v4844_v37 = vpop.eup %4843 }
 0x4a3   : > { %v4846_v29 = vpop.eup %4845  ;;  %v1074_v40 = vpop.xlane.xlu0 %1073  ;;  %v1101_v58 = vmul.f32 %v4844_v37, %v5751_v3 }
 0x4a4   : > { %v4848_v61 = vpop.eup %4847  ;;  %v1072_v62 = vpop.xlane.xlu1 %1071  ;;  %v1102_v60 = vmul.f32 %v4846_v29, %v5753_v63 }
 0x4a5   : > { %4851 = vrcp.f32 %v1072_v62  ;;  %v1103_v8 = vmul.f32 %v4848_v61, %v5745_v41 }
 0x4a6   : > { %v4850_v4 = vpop.eup %4849  ;;  %v1115_v51 = vpack.c.bf16 %v1102_v60, %v1101_v58  ;;  %4853 = vrcp.f32 %v1066_v42 }
 0x4a7   : > { %v1080_v7 = vpop.xlane.xlu0 %1079  ;;  %v1104_v52 = vmul.f32 %v4850_v4, %v5758_v9  ;;  %4855 = vrcp.f32 %v1070_v35 }
 0x4a8   : > { %v1068_v49 = vpop.xlane.xlu1 %1067  ;;  %4259 = vmatprep.mubr.bf16.mxu0 %v1115_v51 }
 0x4a9   : > { %4857 = vrcp.f32 %v1068_v49  ;;  %v1116_v1 = vpack.c.bf16 %v1104_v52, %v1103_v8 }
 0x4aa   : > { %4859 = vrcp.f32 %v1074_v40 }
 0x4ab   : > { %4260 = vmatmul.mubr.bf16.gmra.mrb[20].mxu0 %v1116_v1  ;;  %v1288_v3 = vpop.permute.xlu0 %1287 }
 0x4ac   : > { %v1076_v14 = vpop.xlane.xlu1 %1075  ;;  %4565 = vmatprep.subr.msk.bf16.mxu0 %vm823_vm1, %v1288_v3  ;;  %v1334_v63 = vsel %vm823_vm1, %v1288_v3, 0 }
 0x4ad   : > { %4861 = vrcp.f32 %v1076_v14  ;;  %4284 = vmatpush3.bf16.xpose.msra.mxu0 %v1334_v63  ;;  %v3903_v63 = vld [vmem:[%s7201_s3 + $0x90] sm:$0xff] }
 0x4ae   : > { %4863 = vrcp.f32 %v1080_v7 }
 0x4af   : > { %v1260_v24 = vpop.permute.xlu0 %1259  ;;  %v4852_v41 = vpop.eup %4851  ;;  %4865 = vrcp.f32 %v1078_v36 }
 0x4b0   : > { %v1290_v9 = vpop.permute.xlu1 %1289  ;;  %v4854_v25 = vpop.eup %4853  ;;  %v1108_v27 = vmul.f32 %v4852_v41, %v5773_v10 }
 0x4b1   : > { %4566 = vmatprep.subr.msk.bf16.mxu0 %vm823_vm1, %v1290_v9  ;;  %v4856_v0 = vpop.eup %4855  ;;  %v1337_v30 = vsel %vm823_vm1, %v1290_v9, 0  ;;  %v1105_v31 = vmul.f32 %v4854_v25, %v5767_v21  ;;  %v3902_v25 = vld [vmem:[%s7201_s3 + $0x88] sm:$0xff] }
 0x4b2   : > { %v1107_v34 = vmul.f32 %v4856_v0, %v5760_v47  ;;  %v3901_v0 = vld [vmem:[%s7201_s3 + $0x80] sm:$0xff] }
 0x4b3   : > { %v4858_v12 = vpop.eup %4857  ;;  %v1264_v2 = vpop.permute.xlu0 %1263 }
 0x4b4   : > { %v1262_v28 = vpop.permute.xlu1 %1261  ;;  %v1106_v39 = vmul.f32 %v4858_v12, %v5779_v11  ;;  %v4860_v33 = vpop.eup %4859  ;;  %v1118_v54 = vpack.c.bf16 %v1108_v27, %v1107_v34 }
 0x4b5   : > { %4286 = vmatpush3.bf16.xpose.msra.mxu0 %v1337_v30  ;;  %v1109_v10 = vmul.f32 %v4860_v33, %v5771_v53  ;;  %v3904_v30 = vld [vmem:[%s7201_s3 + $0x98] sm:$0xff] }
 0x4b6   : > { %v1117_v44 = vpack.c.bf16 %v1106_v39, %v1105_v31  ;;  %v3908_v39 = vld [vmem:[%s7201_s3 + $0xb8] sm:$0xff] }
 0x4b7   : > { %v4862_v45 = vpop.eup %4861  ;;  %v1268_v48 = vpop.permute.xlu0 %1267 }
 0x4b8   : > { %v4864_v19 = vpop.eup %4863  ;;  %v1266_v22 = vpop.permute.xlu1 %1265  ;;  %4263 = vmatprep.mubr.bf16.mxu0 %v1117_v44  ;;  %v1110_v20 = vmul.f32 %v4862_v45, %v5783_v55  ;;  %v3907_v44 = vld [vmem:[%s7201_s3 + $0xb0] sm:$0xff] }
 0x4b9   : > { %4264 = vmatmul.mubr.bf16.gmra.mrb[24].mxu0 %v1118_v54  ;;  %v4866_v23 = vpop.eup %4865  ;;  %v1112_v11 = vmul.f32 %v4864_v19, %v5777_v5  ;;  %v3906_v19 = vld [vmem:[%s7201_s3 + $0xa8] sm:$0xff] }
 0x4ba   : > { %v1119_v21 = vpack.c.bf16 %v1110_v20, %v1109_v10  ;;  %v1111_v47 = vmul.f32 %v4866_v23, %v5765_v50  ;;  %v3905_v10 = vld [vmem:[%s7201_s3 + $0xa0] sm:$0xff] }
 0x4bb   : > { %v1272_v56 = vpop.permute.xlu0 %1271 }
 0x4bc   : > { %v1270_v6 = vpop.permute.xlu1 %1269  ;;  %4267 = vmatprep.mubr.bf16.mxu0 %v1119_v21  ;;  %v1120_v17 = vpack.c.bf16 %v1112_v11, %v1111_v47  ;;  %v3912_v21 = vld [vmem:[%s7201_s3 + $0xd8] sm:$0xff] }
 0x4bf   : > { %v1589_v46 = vpop.permute.xlu0 %1588 }
 0x4c0   : > { %v1274_v38 = vpop.permute.xlu1 %1273  ;;  %4303 = vmatprep.subr.bf16.mxu1 %v1589_v46 }
 0x4c1   : > { %4268 = vmatmul.mubr.bf16.gmra.mrb[28].mxu0 %v1120_v17  ;;  %4304 = vmatpush3.bf16.msra.mxu1 %v1589_v46 }
 0x4c2   : > { %4287 = vmatprep.mubr.msk.bf16.mxu0 %vm823_vm1, %v1260_v24 }
 0x4c3   : > { %v1593_v55 = vpop.permute.xlu0 %1592 }
 0x4c4   : > { %v1591_v53 = vpop.permute.xlu1 %1590 }
 0x4c5   : > { %4305 = vmatprep.subr.bf16.mxu1 %v1591_v53 }
 0x4c6   : > { %4306 = vmatpush3.bf16.msra.mxu1 %v1591_v53 }
 0x4c7   : > { %4307 = vmatprep.subr.bf16.mxu1 %v1593_v55  ;;  %v1597_v50 = vpop.permute.xlu0 %1596 }
 0x4c8   : > { %v1595_v5 = vpop.permute.xlu1 %1594 }
 0x4c9   : > { %4288 = vmatmul.mubr.msk.bf16.vlgmr.msra.gmra.mrb[32].mxu0 %vm823_vm1, %v1262_v28 }
 0x4ca   : > { %4291 = vmatprep.mubr.msk.bf16.mxu0 %vm823_vm1, %v1264_v2  ;;  %4308 = vmatpush3.bf16.msra.mxu1 %v1593_v55  ;;  %v3909_v55 = vld [vmem:[%s7201_s3 + $0xc0] sm:$0xff] }
 0x4cb   : > { %4309 = vmatprep.subr.bf16.mxu1 %v1595_v5  ;;  %v1601_v35 = vpop.permute.xlu0 %1600 }
 0x4cc   : > { %v1599_v59 = vpop.permute.xlu1 %1598 }
 0x4ce   : > { %4310 = vmatpush3.bf16.msra.mxu1 %v1595_v5 }
 0x4cf   : > { %4311 = vmatprep.subr.bf16.mxu1 %v1597_v50  ;;  %v5853_v42 = vpop.permute.xlu0 %1742 }
 0x4d0   : > { %v1603_v36 = vpop.permute.xlu1 %1602 }
 0x4d1   : > { %4292 = vmatmul.mubr.msk.bf16.gmra.mrb[36].mxu0 %vm823_vm1, %v1266_v22 }
 0x4d2   : > { %4295 = vmatprep.mubr.msk.bf16.mxu0 %vm823_vm1, %v1268_v48  ;;  %4312 = vmatpush3.bf16.msra.mxu1 %v1597_v50 }
 0x4d3   : > { %4313 = vmatprep.subr.bf16.mxu1 %v1599_v59 }
 0x4d6   : > { %4314 = vmatpush3.bf16.msra.mxu1 %v1599_v59 }
 0x4d7   : > { %4315 = vmatprep.subr.bf16.mxu1 %v1601_v35 }
 0x4d9   : > { %4296 = vmatmul.mubr.msk.bf16.gmra.mrb[40].mxu0 %vm823_vm1, %v1270_v6  ;;  %v3911_v6 = vld [vmem:[%s7201_s3 + $0xd0] sm:$0xff] }
 0x4da   : > { %4299 = vmatprep.mubr.msk.bf16.mxu0 %vm823_vm1, %v1272_v56  ;;  %4316 = vmatpush3.bf16.msra.mxu1 %v1601_v35 }
 0x4db   : > { %4317 = vmatprep.subr.bf16.mxu1 %v1603_v36 }
 0x4de   : > { %4318 = vmatpush3.bf16.msra.mxu1 %v1603_v36  ;;  %v3915_v36 = vld [vmem:[%s7201_s3 + $0xf0] sm:$0xff] }
 0x4df   : > { %4567 = vmatprep.subr.msk.bf16.mxu1 %vm823_vm1, %v5853_v42 }
 0x4e1   : > { %4300 = vmatmul.mubr.msk.bf16.gmra.mrb[44].mxu0 %vm823_vm1, %v1274_v38  ;;  %v3910_v38 = vld [vmem:[%s7201_s3 + $0xc8] sm:$0xff] }
 0x546   : > { %v5858_v37 = vpop.f32.mrb[16].mxu0 }
 0x547   : > { %7211 = vst [vmem:[#allocation5_spill] sm:$0xff] %v5858_v37  ;;  %v5860_v29 = vpop.f32.mrb[17].mxu0 }
 0x548   : > { %7212 = vst [vmem:[#allocation6_spill] sm:$0xff] %v5860_v29  ;;  %v5862_v40 = vpop.f32.mrb[18].mxu0 }
 0x549   : > { %7213 = vst [vmem:[#allocation7_spill] sm:$0xff] %v5862_v40  ;;  %v5864_v58 = vpop.f32.mrb[19].mxu0 }
 0x54a   : > { %7214 = vst [vmem:[#allocation8_spill] sm:$0xff] %v5864_v58 }
 0x57e   : > { %v5866_v61 = vpop.f32.mrb[20].mxu0 }
 0x57f   : > { %7215 = vst [vmem:[#allocation9_spill] sm:$0xff] %v5866_v61  ;;  %v5868_v62 = vpop.f32.mrb[21].mxu0 }
 0x580   : > { %7216 = vst [vmem:[#allocation10_spill] sm:$0xff] %v5868_v62  ;;  %v5870_v60 = vpop.f32.mrb[22].mxu0 }
 0x581   : > { %7217 = vst [vmem:[#allocation11_spill] sm:$0xff] %v5870_v60  ;;  %v5872_v4 = vpop.f32.mrb[23].mxu0 }
 0x582   : > { %7218 = vst [vmem:[#allocation12_spill] sm:$0xff] %v5872_v4 }
 0x58c   : > { %v5874_v51 = vpop.f32.mrb[24].mxu0 }
 0x58d   : > { %7219 = vst [vmem:[#allocation13_spill] sm:$0xff] %v5874_v51  ;;  %v5876_v7 = vpop.f32.mrb[25].mxu0 }
 0x58e   : > { %7220 = vst [vmem:[#allocation14_spill] sm:$0xff] %v5876_v7  ;;  %v5878_v8 = vpop.f32.mrb[26].mxu0 }
 0x58f   : > { %7221 = vst [vmem:[#allocation15_spill] sm:$0xff] %v5878_v8  ;;  %v5880_v52 = vpop.f32.mrb[27].mxu0 }
 0x590   : > { %7222 = vst [vmem:[#allocation16_spill] sm:$0xff] %v5880_v52 }
 0x594   : > { %v5882_v49 = vpop.f32.mrb[28].mxu0 }
 0x595   : > { %7223 = vst [vmem:[#allocation17_spill] sm:$0xff] %v5882_v49  ;;  %v5884_v1 = vpop.f32.mrb[29].mxu0 }
 0x596   : > { %7224 = vst [vmem:[#allocation18_spill] sm:$0xff] %v5884_v1  ;;  %v5886_v3 = vpop.f32.mrb[30].mxu0 }
 0x597   : > { %7225 = vst [vmem:[#allocation19_spill] sm:$0xff] %v5886_v3  ;;  %v5888_v14 = vpop.f32.mrb[31].mxu0 }
 0x598   : > { %7226 = vst [vmem:[#allocation20_spill] sm:$0xff] %v5888_v14 }
 0x59c   : > { %v4289_v24 = vpop.f32.mrb[32].mxu0 }
 0x59d   : > { %v5893_v41 = vadd.f32 %v4289_v24, %v3903_v63  ;;  %v1373_v9 = vpop.f32.mrb[33].mxu0 }
 0x59e   : > { %v4290_v12 = vpop.f32.mrb[34].mxu0  ;;  %v5904_v28 = vadd.f32 %v3901_v0, %v1373_v9 }
 0x59f   : > { %1440 = vmax.xlane.f32.xlu0 %v5893_v41  ;;  %v1376_v2 = vpop.f32.mrb[35].mxu0  ;;  %v5914_v33 = vadd.f32 %v4290_v12, %v3904_v30  ;;  %v3916_v12 = vld [vmem:[%s7201_s3 + $0xf8] sm:$0xff]  ;;  %v3914_v30 = vld [vmem:[%s7201_s3 + $0xe8] sm:$0xff] }
 0x5a0   : > { %v5902_v27 = vadd.f32 %v3902_v25, %v1376_v2  ;;  %v3913_v25 = vld [vmem:[%s7201_s3 + $0xe0] sm:$0xff] }
 0x5a2   : > { %1438 = vmax.xlane.f32.xlu1 %v5902_v27 }
 0x5a3   : > { %1436 = vmax.xlane.f32.xlu0 %v5904_v28 }
 0x5a4   : > { %v4293_v31 = vpop.f32.mrb[36].mxu0 }
 0x5a5   : > { %v1389_v34 = vpop.f32.mrb[37].mxu0  ;;  %v5925_v22 = vadd.f32 %v4293_v31, %v3907_v44 }
 0x5a6   : > { %v4294_v45 = vpop.f32.mrb[38].mxu0  ;;  %v5937_v56 = vadd.f32 %v3905_v10, %v1389_v34 }
 0x5a7   : > { %v5919_v48 = vadd.f32 %v4294_v45, %v3908_v39  ;;  %1442 = vmax.xlane.f32.xlu0 %v5914_v33  ;;  %v1392_v54 = vpop.f32.mrb[39].mxu0  ;;  %v5990_v39 = vpop.permute.xlu1 %1744 }
 0x5a8   : > { %v5931_v20 = vadd.f32 %v3906_v19, %v1392_v54 }
 0x5a9   : > { %1450 = vmax.xlane.f32.xlu1 %v5919_v48 }
 0x5ab   : > { %1448 = vmax.xlane.f32.xlu0 %v5925_v22 }
 0x5ac   : > { %v4297_v23 = vpop.f32.mrb[40].mxu0 }
 0x5ad   : > { %1446 = vmax.xlane.f32.xlu1 %v5931_v20  ;;  %v1405_v11 = vpop.f32.mrb[41].mxu0  ;;  %v5949_v53 = vadd.f32 %v4297_v23, %v3911_v6 }
 0x5ae   : > { %v4298_v47 = vpop.f32.mrb[42].mxu0  ;;  %v5958_v59 = vadd.f32 %v3909_v55, %v1405_v11 }
 0x5af   : > { %v5943_v46 = vadd.f32 %v4298_v47, %v3912_v21  ;;  %1444 = vmax.xlane.f32.xlu0 %v5937_v56  ;;  %v1408_v17 = vpop.f32.mrb[43].mxu0 }
 0x5b0   : > { %v5955_v5 = vadd.f32 %v3910_v38, %v1408_v17 }
 0x5b1   : > { %1458 = vmax.xlane.f32.xlu1 %v5943_v46 }
 0x5b3   : > { %1456 = vmax.xlane.f32.xlu0 %v5949_v53 }
 0x5b4   : > { %v4301_v50 = vpop.f32.mrb[44].mxu0 }
 0x5b5   : > { %1454 = vmax.xlane.f32.xlu1 %v5955_v5  ;;  %v1421_v35 = vpop.f32.mrb[45].mxu0  ;;  %v5965_v9 = vadd.f32 %v4301_v50, %v3915_v36 }
 0x5b6   : > { %v4302_v63 = vpop.f32.mrb[46].mxu0  ;;  %v5971_v0 = vadd.f32 %v3913_v25, %v1421_v35 }
 0x5b7   : > { %1452 = vmax.xlane.f32.xlu0 %v5958_v59  ;;  %v1424_v24 = vpop.f32.mrb[47].mxu0  ;;  %v5981_v2 = vadd.f32 %v4302_v63, %v3916_v12 }
 0x5b8   : > { %v5987_v31 = vadd.f32 %v3914_v30, %v1424_v24 }
 0x5bb   : > { %1464 = vmax.xlane.f32.xlu0 %v5965_v9 }
 0x5bf   : > { %1460 = vmax.xlane.f32.xlu0 %v5971_v0 }
 0x5c6   : > { %1748 = vrot.lane.b32.xlu1 %v5544_v13, %s5208_s27 }
 0x5d5   : > { %1746 = vrot.lane.b32.xlu0 %v5546_v26, %s5208_s27 }
 0x5ea   : > { %1466 = vmax.xlane.f32.xlu1 %v5981_v2 }
 0x5ee   : > { %1462 = vmax.xlane.f32.xlu1 %v5987_v31 }
 0x62c   : > { %v1441_v34 = vpop.xlane.xlu0 %1440 }
 0x62d   : > { %v1470_v44 = vsub.f32 %v5893_v41, %v1441_v34 }
 0x62f   : > { %v1488_v45 = vmul.f32 1.442695, %v1470_v44  ;;  %v1439_v54 = vpop.xlane.xlu1 %1438 }
 0x630   : > { %v1469_v19 = vsub.f32 %v5902_v27, %v1439_v54  ;;  %v1437_v10 = vpop.xlane.xlu0 %1436 }
 0x631   : > { %4867 = vpow2.f32 %v1488_v45  ;;  %v1468_v23 = vsub.f32 %v5904_v28, %v1437_v10 }
 0x632   : > { %v1486_v21 = vmul.f32 1.442695, %v1469_v19 }
 0x633   : > { %v1484_v11 = vmul.f32 1.442695, %v1468_v23 }
 0x634   : > { %4869 = vpow2.f32 %v1486_v21  ;;  %v1443_v6 = vpop.xlane.xlu0 %1442 }
 0x635   : > { %4871 = vpow2.f32 %v1484_v11  ;;  %v1471_v47 = vsub.f32 %v5914_v33, %v1443_v6 }
 0x636   : > { %v1451_v50 = vpop.xlane.xlu1 %1450 }
 0x637   : > { %v1490_v17 = vmul.f32 1.442695, %v1471_v47  ;;  %v1475_v45 = vsub.f32 %v5919_v48, %v1451_v50 }
 0x638   : > { %v1449_v55 = vpop.xlane.xlu0 %1448 }
 0x639   : > { %4873 = vpow2.f32 %v1490_v17  ;;  %v1474_v36 = vsub.f32 %v5925_v22, %v1449_v55  ;;  %v1498_v23 = vmul.f32 1.442695, %v1475_v45 }
 0x63a   : > { %v1447_v63 = vpop.xlane.xlu1 %1446 }
 0x63b   : > { %v5996_v38 = vpop.eup %4867  ;;  %v1496_v25 = vmul.f32 1.442695, %v1474_v36  ;;  %v1473_v30 = vsub.f32 %v5931_v20, %v1447_v63 }
 0x63c   : > { %1520 = vadd.xlane.f32.xlu1 %v5996_v38  ;;  %v1445_v33 = vpop.xlane.xlu0 %1444 }
 0x63d   : > { %v1472_v12 = vsub.f32 %v5937_v56, %v1445_v33  ;;  %4875 = vpow2.f32 %v1496_v25  ;;  %v1494_v19 = vmul.f32 1.442695, %v1473_v30 }
 0x63e   : > { %v5999_v41 = vpop.eup %4869  ;;  %v1459_v34 = vpop.xlane.xlu1 %1458 }
 0x63f   : > { %v6001_v27 = vpop.eup %4871  ;;  %1518 = vadd.xlane.f32.xlu0 %v5999_v41  ;;  %v1492_v54 = vmul.f32 1.442695, %v1472_v12  ;;  %v1479_v48 = vsub.f32 %v5943_v46, %v1459_v34 }
 0x640   : > { %1516 = vadd.xlane.f32.xlu1 %v6001_v27  ;;  %v1457_v35 = vpop.xlane.xlu0 %1456 }
 0x641   : > { %v1478_v10 = vsub.f32 %v5949_v53, %v1457_v35  ;;  %4877 = vpow2.f32 %v1492_v54  ;;  %v1506_v33 = vmul.f32 1.442695, %v1479_v48 }
 0x642   : > { %v1455_v21 = vpop.xlane.xlu1 %1454  ;;  %4879 = vpow2.f32 %v1494_v19 }
 0x643   : > { %v6005_v28 = vpop.eup %4873  ;;  %v1504_v11 = vmul.f32 1.442695, %v1478_v10  ;;  %4881 = vpow2.f32 %v1498_v23 }
 0x644   : > { %1522 = vadd.xlane.f32.xlu1 %v6005_v28  ;;  %v1453_v24 = vpop.xlane.xlu0 %1452 }
 0x645   : > { %v1476_v56 = vsub.f32 %v5958_v59, %v1453_v24  ;;  %4883 = vpow2.f32 %v1504_v11  ;;  %v1477_v59 = vsub.f32 %v5955_v5, %v1455_v21 }
 0x646   : > { %v6023_v53 = vpop.permute.xlu1 %1748 }
 0x647   : > { %v1500_v17 = vmul.f32 1.442695, %v1476_v56  ;;  %v6021_v55 = vpop.eup %4875  ;;  %v1502_v36 = vmul.f32 1.442695, %v1477_v59 }
 0x648   : > { %v1465_v44 = vpop.xlane.xlu0 %1464 }
 0x649   : > { %v1482_v22 = vsub.f32 %v5965_v9, %v1465_v44 }
 0x64b   : > { %v1512_v20 = vmul.f32 1.442695, %v1482_v22  ;;  %v6027_v50 = vpop.eup %4877 }
 0x64c   : > { %v1461_v6 = vpop.xlane.xlu0 %1460 }
 0x64d   : > { %v1480_v47 = vsub.f32 %v5971_v0, %v1461_v6  ;;  %4885 = vpow2.f32 %v1512_v20  ;;  %v6029_v0 = vpop.eup %4879 }
 0x64e   : > { %4887 = vpow2.f32 %v1500_v17  ;;  %v6034_v24 = vpop.eup %4881 }
 0x64f   : > { %v1508_v9 = vmul.f32 1.442695, %v1480_v47  ;;  %v6036_v5 = vpop.eup %4883 }
 0x650   : > { %v1747_v10 = vpop.permute.xlu0 %1746 }
 0x651   : > { %4889 = vpow2.f32 %v1508_v9 }
 0x652   : > { %4891 = vpow2.f32 %v1506_v33 }
 0x655   : > { %1750 = vrot.lane.b32.xlu0 %v5554_v32, %s5208_s27  ;;  %1752 = vrot.lane.b32.xlu1 %v5552_v43, %s5208_s27 }
 0x657   : > { %v6041_v30 = vpop.eup %4885 }
 0x658   : > { %v6043_v34 = vpop.eup %4887 }
 0x65b   : > { %v6047_v44 = vpop.eup %4889 }
 0x65c   : > { %v6049_v45 = vpop.eup %4891 }
 0x674   : > { %1528 = vadd.xlane.f32.xlu0 %v6021_v55 }
 0x677   : > { %v1467_v35 = vpop.xlane.xlu1 %1466 }
 0x678   : > { %v1483_v46 = vsub.f32 %v5981_v2, %v1467_v35  ;;  %1524 = vadd.xlane.f32.xlu0 %v6027_v50 }
 0x679   : > { %1526 = vadd.xlane.f32.xlu1 %v6029_v0 }
 0x67a   : > { %v1514_v63 = vmul.f32 1.442695, %v1483_v46  ;;  %v1783_v46 = vsel %vm823_vm1, %v5853_v42, 0 }
 0x67b   : > { %v1463_v25 = vpop.xlane.xlu1 %1462 }
 0x67c   : > { %4893 = vpow2.f32 %v1514_v63  ;;  %v1481_v12 = vsub.f32 %v5987_v31, %v1463_v25  ;;  %1530 = vadd.xlane.f32.xlu0 %v6034_v24 }
 0x67d   : > { %1536 = vadd.xlane.f32.xlu1 %v6036_v5  ;;  %4895 = vpow2.f32 %v1502_v36 }
 0x67e   : > { %v1510_v2 = vmul.f32 1.442695, %v1481_v12 }
 0x680   : > { %1544 = vadd.xlane.f32.xlu0 %v6041_v30  ;;  %4897 = vpow2.f32 %v1510_v2 }
 0x681   : > { %1532 = vadd.xlane.f32.xlu1 %v6043_v34 }
 0x684   : > { %1540 = vadd.xlane.f32.xlu0 %v6047_v44 }
 0x685   : > { %1538 = vadd.xlane.f32.xlu1 %v6049_v45 }
 0x686   : > { %v6053_v31 = vpop.eup %4893 }
 0x687   : > { %v6055_v54 = vpop.eup %4895 }
 0x688   : > { %1546 = vadd.xlane.f32.xlu0 %v6053_v31 }
 0x689   : > { %1534 = vadd.xlane.f32.xlu1 %v6055_v54 }
 0x68a   : > { %v6059_v19 = vpop.eup %4897 }
 0x68d   : > { %1542 = vadd.xlane.f32.xlu1 %v6059_v19 }
 0x69e   : > { %1756 = vrot.lane.b32.xlu1 %v5560_v57, %s5208_s27  ;;  %1754 = vrot.lane.b32.xlu0 %v5562_v16, %s5208_s27  ;;  %s5211_s27 = smov 72  }
 0x6a2   : > { %1728 = vrot.lane.b32.xlu1 %v5534_v15, %s5209_s12  ;;  %1726 = vrot.lane.b32.xlu0 %v5536_v18, %s5209_s12 }
 0x6a6   : > { %1732 = vrot.lane.b32.xlu1 %v5544_v13, %s5209_s12  ;;  %1730 = vrot.lane.b32.xlu0 %v5546_v26, %s5209_s12 }
 0x6aa   : > { %1736 = vrot.lane.b32.xlu1 %v5552_v43, %s5209_s12  ;;  %1734 = vrot.lane.b32.xlu0 %v5554_v32, %s5209_s12 }
 0x6ae   : > { %1740 = vrot.lane.b32.xlu1 %v5560_v57, %s5209_s12  ;;  %1738 = vrot.lane.b32.xlu0 %v5562_v16, %s5209_s12  ;;  %s5216_s12 = smov 24  }
 0x6b2   : > { %2057 = vrot.lane.b32.xlu1 %v5534_v15, %s5210_s18  ;;  %2055 = vrot.lane.b32.xlu0 %v5536_v18, %s5210_s18 }
 0x6b6   : > { %2061 = vrot.lane.b32.xlu1 %v5544_v13, %s5210_s18  ;;  %2059 = vrot.lane.b32.xlu0 %v5546_v26, %s5210_s18 }
 0x6ba   : > { %2065 = vrot.lane.b32.xlu1 %v5552_v43, %s5210_s18  ;;  %2063 = vrot.lane.b32.xlu0 %v5554_v32, %s5210_s18 }
 0x6be   : > { %2069 = vrot.lane.b32.xlu1 %v5560_v57, %s5210_s18  ;;  %2067 = vrot.lane.b32.xlu0 %v5562_v16, %s5210_s18 }
 0x6c2   : > { %2211 = vrot.lane.b32.xlu1 %v5534_v15, %s5211_s27  ;;  %2209 = vrot.lane.b32.xlu0 %v5536_v18, %s5211_s27 }
 0x6c9   : > { %v1521_v23 = vpop.xlane.xlu1 %1520 }
 0x6cc   : > { %v1519_v21 = vpop.xlane.xlu0 %1518 }
 0x6cd   : > { %4899 = vrcp.f32 %v1519_v21  ;;  %v1517_v22 = vpop.xlane.xlu1 %1516 }
 0x6ce   : > { %4901 = vrcp.f32 %v1517_v22 }
 0x6cf   : > { %4903 = vrcp.f32 %v1521_v23 }
 0x6d0   : > { %v1751_v42 = vpop.permute.xlu0 %1750 }
 0x6d1   : > { %v1523_v11 = vpop.xlane.xlu1 %1522 }
 0x6d2   : > { %4905 = vrcp.f32 %v1523_v11 }
 0x6d7   : > { %v4900_v56 = vpop.eup %4899 }
 0x6d8   : > { %v4902_v6 = vpop.eup %4901  ;;  %v1565_v20 = vmul.f32 %v4900_v56, %v5999_v41  ;;  %v1786_v41 = vsel %vm823_vm1, %v5990_v39, 0 }
 0x6d9   : > { %v1564_v47 = vmul.f32 %v4902_v6, %v6001_v27  ;;  %v4904_v48 = vpop.eup %4903  ;;  %v1792_v27 = vsel %vm823_vm1, %v6023_v53, 0 }
 0x6da   : > { %v1566_v33 = vmul.f32 %v4904_v48, %v5996_v38  ;;  %v1789_v38 = vsel %vm823_vm1, %v1747_v10, 0 }
 0x6db   : > { %v1580_v17 = vpack.c.bf16 %v1565_v20, %v1564_v47 }
 0x6dc   : > { %v4906_v9 = vpop.eup %4905 }
 0x6dd   : > { %v1567_v59 = vmul.f32 %v4906_v9, %v6005_v28  ;;  %4319 = vmatprep.mubr.bf16.mxu1 %v1580_v17  ;;  %v1795_v28 = vsel %vm823_vm1, %v1751_v42, 0 }
 0x6df   : > { %v1581_v35 = vpack.c.bf16 %v1567_v59, %v1566_v33 }
 0x6e1   : > { %4320 = vmatmul.mubr.bf16.vlgmr.msra.gmra.mrb[16].mxu1 %v1581_v35 }
 0x6e2   : > { %4336 = vmatpush3.bf16.xpose.msra.mxu1 %v1783_v46 }
 0x6e3   : > { %4568 = vmatprep.subr.msk.bf16.mxu1 %vm823_vm1, %v5990_v39  ;;  %v1753_v39 = vpop.permute.xlu1 %1752 }
 0x6e4   : > { %v1798_v12 = vsel %vm823_vm1, %v1753_v39, 0 }
 0x6ea   : > { %4338 = vmatpush3.bf16.xpose.msra.mxu1 %v1786_v41 }
 0x6eb   : > { %4569 = vmatprep.subr.msk.bf16.mxu1 %vm823_vm1, %v1747_v10 }
 0x6f2   : > { %4340 = vmatpush3.bf16.xpose.msra.mxu1 %v1789_v38 }
 0x6f3   : > { %4570 = vmatprep.subr.msk.bf16.mxu1 %vm823_vm1, %v6023_v53 }
 0x6fa   : > { %4342 = vmatpush3.bf16.xpose.msra.mxu1 %v1792_v27 }
 0x6fb   : > { %4571 = vmatprep.subr.msk.bf16.mxu1 %vm823_vm1, %v1751_v42 }
 0x701   : > { %v1529_v36 = vpop.xlane.xlu0 %1528 }
 0x702   : > { %4344 = vmatpush3.bf16.xpose.msra.mxu1 %v1795_v28 }
 0x703   : > { %4572 = vmatprep.subr.msk.bf16.mxu1 %vm823_vm1, %v1753_v39 }
 0x705   : > { %v1525_v63 = vpop.xlane.xlu0 %1524 }
 0x706   : > { %4907 = vrcp.f32 %v1525_v63  ;;  %v1527_v25 = vpop.xlane.xlu1 %1526 }
 0x707   : > { %4909 = vrcp.f32 %v1527_v25 }
 0x708   : > { %4911 = vrcp.f32 %v1529_v36 }
 0x709   : > { %v1531_v2 = vpop.xlane.xlu0 %1530 }
 0x70a   : > { %4346 = vmatpush3.bf16.xpose.msra.mxu1 %v1798_v12  ;;  %4913 = vrcp.f32 %v1531_v2  ;;  %v1537_v53 = vpop.xlane.xlu1 %1536 }
 0x70d   : > { %v1545_v10 = vpop.xlane.xlu0 %1544 }
 0x70e   : > { %v1533_v23 = vpop.xlane.xlu1 %1532 }
 0x710   : > { %v4908_v21 = vpop.eup %4907 }
 0x711   : > { %v4910_v22 = vpop.eup %4909  ;;  %v1541_v11 = vpop.xlane.xlu0 %1540  ;;  %v1568_v56 = vmul.f32 %v4908_v21, %v6027_v50 }
 0x712   : > { %v4912_v6 = vpop.eup %4911  ;;  %v1539_v20 = vpop.xlane.xlu1 %1538  ;;  %v1569_v47 = vmul.f32 %v4910_v22, %v6029_v0 }
 0x713   : > { %4915 = vrcp.f32 %v1539_v20  ;;  %v1570_v33 = vmul.f32 %v4912_v6, %v6021_v55 }
 0x714   : > { %v4914_v48 = vpop.eup %4913  ;;  %v1582_v17 = vpack.c.bf16 %v1569_v47, %v1568_v56  ;;  %4917 = vrcp.f32 %v1533_v23 }
 0x715   : > { %v1547_v9 = vpop.xlane.xlu0 %1546  ;;  %v1571_v59 = vmul.f32 %v4914_v48, %v6034_v24  ;;  %4919 = vrcp.f32 %v1537_v53 }
 0x716   : > { %v1535_v35 = vpop.xlane.xlu1 %1534  ;;  %4323 = vmatprep.mubr.bf16.mxu1 %v1582_v17 }
 0x717   : > { %4921 = vrcp.f32 %v1535_v35  ;;  %v1583_v46 = vpack.c.bf16 %v1571_v59, %v1570_v33 }
 0x718   : > { %4923 = vrcp.f32 %v1541_v11 }
 0x719   : > { %4324 = vmatmul.mubr.bf16.gmra.mrb[20].mxu1 %v1583_v46  ;;  %v1755_v50 = vpop.permute.xlu0 %1754 }
 0x71a   : > { %v1543_v41 = vpop.xlane.xlu1 %1542  ;;  %4573 = vmatprep.subr.msk.bf16.mxu1 %vm823_vm1, %v1755_v50  ;;  %v1801_v0 = vsel %vm823_vm1, %v1755_v50, 0 }
 0x71b   : > { %4925 = vrcp.f32 %v1543_v41  ;;  %4348 = vmatpush3.bf16.xpose.msra.mxu1 %v1801_v0 }
 0x71c   : > { %4927 = vrcp.f32 %v1547_v9 }
 0x71d   : > { %v1727_v38 = vpop.permute.xlu0 %1726  ;;  %v4916_v55 = vpop.eup %4915  ;;  %4929 = vrcp.f32 %v1545_v10 }
 0x71e   : > { %v1757_v24 = vpop.permute.xlu1 %1756  ;;  %v4918_v27 = vpop.eup %4917  ;;  %v1575_v39 = vmul.f32 %v4916_v55, %v6049_v45 }
 0x71f   : > { %4574 = vmatprep.subr.msk.bf16.mxu1 %vm823_vm1, %v1757_v24  ;;  %v4920_v42 = vpop.eup %4919  ;;  %v1804_v25 = vsel %vm823_vm1, %v1757_v24, 0  ;;  %v1572_v12 = vmul.f32 %v4918_v27, %v6043_v34 }
 0x720   : > { %v1574_v10 = vmul.f32 %v4920_v42, %v6036_v5 }
 0x721   : > { %v4922_v28 = vpop.eup %4921  ;;  %v1731_v36 = vpop.permute.xlu0 %1730 }
 0x722   : > { %v1729_v63 = vpop.permute.xlu1 %1728  ;;  %v1573_v2 = vmul.f32 %v4922_v28, %v6055_v54  ;;  %v4924_v53 = vpop.eup %4923  ;;  %v1585_v11 = vpack.c.bf16 %v1575_v39, %v1574_v10 }
 0x723   : > { %4350 = vmatpush3.bf16.xpose.msra.mxu1 %v1804_v25  ;;  %v1576_v45 = vmul.f32 %v4924_v53, %v6047_v44 }
 0x724   : > { %v1584_v23 = vpack.c.bf16 %v1573_v2, %v1572_v12 }
 0x725   : > { %v4926_v21 = vpop.eup %4925  ;;  %v1735_v22 = vpop.permute.xlu0 %1734 }
 0x726   : > { %v4928_v56 = vpop.eup %4927  ;;  %v1733_v6 = vpop.permute.xlu1 %1732  ;;  %4327 = vmatprep.mubr.bf16.mxu1 %v1584_v23  ;;  %v1577_v20 = vmul.f32 %v4926_v21, %v6059_v19 }
 0x727   : > { %4328 = vmatmul.mubr.bf16.gmra.mrb[24].mxu1 %v1585_v11  ;;  %v4930_v47 = vpop.eup %4929  ;;  %v1579_v54 = vmul.f32 %v4928_v56, %v6053_v31 }
 0x728   : > { %v1586_v34 = vpack.c.bf16 %v1577_v20, %v1576_v45  ;;  %v1578_v5 = vmul.f32 %v4930_v47, %v6041_v30 }
 0x729   : > { %v1739_v48 = vpop.permute.xlu0 %1738 }
 0x72a   : > { %v1737_v17 = vpop.permute.xlu1 %1736  ;;  %4331 = vmatprep.mubr.bf16.mxu1 %v1586_v34  ;;  %v1587_v33 = vpack.c.bf16 %v1579_v54, %v1578_v5  ;;  %v3927_v34 = vld [vmem:[%s7201_s3 + $0x110] sm:$0xff]  ;;  %v3926_v5 = vld [vmem:[%s7201_s3 + $0x108] sm:$0xff] }
 0x72d   : > { %v2056_v9 = vpop.permute.xlu0 %2055 }
 0x72e   : > { %v1741_v59 = vpop.permute.xlu1 %1740  ;;  %4367 = vmatprep.subr.bf16.mxu0 %v2056_v9 }
 0x72f   : > { %4332 = vmatmul.mubr.bf16.gmra.mrb[28].mxu1 %v1587_v33  ;;  %4368 = vmatpush3.bf16.msra.mxu0 %v2056_v9  ;;  %v3925_v9 = vld [vmem:[%s7201_s3 + $0x100] sm:$0xff] }
 0x730   : > { %4351 = vmatprep.mubr.msk.bf16.mxu1 %vm823_vm1, %v1727_v38 }
 0x731   : > { %v2060_v19 = vpop.permute.xlu0 %2059 }
 0x732   : > { %v2058_v44 = vpop.permute.xlu1 %2057 }
 0x733   : > { %4369 = vmatprep.subr.bf16.mxu0 %v2058_v44 }
 0x734   : > { %4370 = vmatpush3.bf16.msra.mxu0 %v2058_v44 }
 0x735   : > { %4371 = vmatprep.subr.bf16.mxu0 %v2060_v19  ;;  %v2064_v30 = vpop.permute.xlu0 %2063 }
 0x736   : > { %v2062_v31 = vpop.permute.xlu1 %2061 }
 0x737   : > { %4352 = vmatmul.mubr.msk.bf16.vlgmr.msra.gmra.mrb[32].mxu1 %vm823_vm1, %v1729_v63 }
 0x738   : > { %4355 = vmatprep.mubr.msk.bf16.mxu1 %vm823_vm1, %v1731_v36  ;;  %4372 = vmatpush3.bf16.msra.mxu0 %v2060_v19 }
 0x739   : > { %4373 = vmatprep.subr.bf16.mxu0 %v2062_v31  ;;  %v2068_v46 = vpop.permute.xlu0 %2067 }
 0x73a   : > { %v2066_v35 = vpop.permute.xlu1 %2065 }
 0x73c   : > { %4374 = vmatpush3.bf16.msra.mxu0 %v2062_v31  ;;  %v3928_v31 = vld [vmem:[%s7201_s3 + $0x118] sm:$0xff] }
 0x73d   : > { %4375 = vmatprep.subr.bf16.mxu0 %v2064_v30  ;;  %v6129_v41 = vpop.permute.xlu0 %2209 }
 0x73e   : > { %v2070_v50 = vpop.permute.xlu1 %2069 }
 0x73f   : > { %4356 = vmatmul.mubr.msk.bf16.gmra.mrb[36].mxu1 %vm823_vm1, %v1733_v6 }
 0x740   : > { %4359 = vmatprep.mubr.msk.bf16.mxu1 %vm823_vm1, %v1735_v22  ;;  %4376 = vmatpush3.bf16.msra.mxu0 %v2064_v30 }
 0x741   : > { %4377 = vmatprep.subr.bf16.mxu0 %v2066_v35 }
 0x744   : > { %4378 = vmatpush3.bf16.msra.mxu0 %v2066_v35  ;;  %v3932_v35 = vld [vmem:[%s7201_s3 + $0x138] sm:$0xff] }
 0x745   : > { %4379 = vmatprep.subr.bf16.mxu0 %v2068_v46 }
 0x747   : > { %4360 = vmatmul.mubr.msk.bf16.gmra.mrb[40].mxu1 %vm823_vm1, %v1737_v17 }
 0x748   : > { %4363 = vmatprep.mubr.msk.bf16.mxu1 %vm823_vm1, %v1739_v48  ;;  %4380 = vmatpush3.bf16.msra.mxu0 %v2068_v46 }
 0x749   : > { %4381 = vmatprep.subr.bf16.mxu0 %v2070_v50 }
 0x74c   : > { %4382 = vmatpush3.bf16.msra.mxu0 %v2070_v50 }
 0x74d   : > { %4575 = vmatprep.subr.msk.bf16.mxu0 %vm823_vm1, %v6129_v41 }
 0x74f   : > { %4364 = vmatmul.mubr.msk.bf16.gmra.mrb[44].mxu1 %vm823_vm1, %v1741_v59 }
 0x7b4   : > { %v6134_v0 = vpop.f32.mrb[16].mxu1 }
 0x7b5   : > { %v6136_v38 = vpop.f32.mrb[17].mxu1 }
 0x7b6   : > { %v6138_v55 = vpop.f32.mrb[18].mxu1 }
 0x7b7   : > { %v6142_v27 = vpop.f32.mrb[19].mxu1 }
 0x7ec   : > { %v6146_v28 = vpop.f32.mrb[20].mxu1 }
 0x7ed   : > { %v6148_v36 = vpop.f32.mrb[21].mxu1 }
 0x7ee   : > { %v6150_v39 = vpop.f32.mrb[22].mxu1 }
 0x7ef   : > { %v6154_v25 = vpop.f32.mrb[23].mxu1 }
 0x7fa   : > { %v6158_v2 = vpop.f32.mrb[24].mxu1 }
 0x7fb   : > { %v6160_v53 = vpop.f32.mrb[25].mxu1 }
 0x7fc   : > { %v6162_v10 = vpop.f32.mrb[26].mxu1 }
 0x7fd   : > { %v6166_v21 = vpop.f32.mrb[27].mxu1 }
 0x802   : > { %v6170_v11 = vpop.f32.mrb[28].mxu1 }
 0x803   : > { %v6172_v56 = vpop.f32.mrb[29].mxu1 }
 0x804   : > { %v6174_v6 = vpop.f32.mrb[30].mxu1 }
 0x805   : > { %v6178_v20 = vpop.f32.mrb[31].mxu1 }
 0x80a   : > { %v4353_v48 = vpop.f32.mrb[32].mxu1 }
 0x80b   : > { %v6185_v54 = vadd.f32 %v4353_v48, %v3927_v34  ;;  %v1840_v17 = vpop.f32.mrb[33].mxu1  ;;  %v3931_v34 = vld [vmem:[%s7201_s3 + $0x130] sm:$0xff] }
 0x80c   : > { %v4354_v33 = vpop.f32.mrb[34].mxu1  ;;  %v6196_v19 = vadd.f32 %v3925_v9, %v1840_v17  ;;  %v3930_v9 = vld [vmem:[%s7201_s3 + $0x128] sm:$0xff] }
 0x80d   : > { %1907 = vmax.xlane.f32.xlu0 %v6185_v54  ;;  %v1843_v59 = vpop.f32.mrb[35].mxu1  ;;  %v6206_v46 = vadd.f32 %v4354_v33, %v3928_v31  ;;  %v3929_v33 = vld [vmem:[%s7201_s3 + $0x120] sm:$0xff] }
 0x80e   : > { %v6194_v44 = vadd.f32 %v3926_v5, %v1843_v59 }
 0x810   : > { %1905 = vmax.xlane.f32.xlu1 %v6194_v44 }
 0x811   : > { %1903 = vmax.xlane.f32.xlu0 %v6196_v19 }
 0x812   : > { %v4357_v30 = vpop.f32.mrb[36].mxu1 }
 0x813   : > { %v1856_v50 = vpop.f32.mrb[37].mxu1  ;;  %v6217_v59 = vadd.f32 %v4357_v30, %v3931_v34  ;;  %v3935_v34 = vld [vmem:[%s7201_s3 + $0x150] sm:$0xff] }
 0x814   : > { %v4358_v48 = vpop.f32.mrb[38].mxu1  ;;  %v6229_v47 = vadd.f32 %v3929_v33, %v1856_v50  ;;  %v3933_v50 = vld [vmem:[%s7201_s3 + $0x140] sm:$0xff] }
 0x815   : > { %v6211_v17 = vadd.f32 %v4358_v48, %v3932_v35  ;;  %1909 = vmax.xlane.f32.xlu0 %v6206_v46  ;;  %v1859_v5 = vpop.f32.mrb[39].mxu1  ;;  %v3936_v48 = vld [vmem:[%s7201_s3 + $0x158] sm:$0xff] }
 0x816   : > { %v6223_v31 = vadd.f32 %v3930_v9, %v1859_v5  ;;  %v3934_v9 = vld [vmem:[%s7201_s3 + $0x148] sm:$0xff] }
 0x817   : > { %1917 = vmax.xlane.f32.xlu1 %v6211_v17 }
 0x819   : > { %1915 = vmax.xlane.f32.xlu0 %v6217_v59 }
 0x81a   : > { %v4361_v35 = vpop.f32.mrb[40].mxu1 }
 0x81b   : > { %1913 = vmax.xlane.f32.xlu1 %v6223_v31  ;;  %v1872_v30 = vpop.f32.mrb[41].mxu1  ;;  %v6241_v12 = vadd.f32 %v4361_v35, %v3935_v34  ;;  %v3939_v35 = vld [vmem:[%s7201_s3 + $0x170] sm:$0xff] }
 0x81c   : > { %v4362_v45 = vpop.f32.mrb[42].mxu1 }
 0x81d   : > { %v6235_v22 = vadd.f32 %v4362_v45, %v3936_v48  ;;  %1911 = vmax.xlane.f32.xlu0 %v6229_v47  ;;  %v1875_v5 = vpop.f32.mrb[43].mxu1  ;;  %v6250_v48 = vadd.f32 %v3933_v50, %v1872_v30 }
 0x81e   : > { %v6247_v33 = vadd.f32 %v3934_v9, %v1875_v5  ;;  %v3937_v5 = vld [vmem:[%s7201_s3 + $0x160] sm:$0xff]  ;;  %v3940_v9 = vld [vmem:[%s7201_s3 + $0x178] sm:$0xff] }
 0x81f   : > { %1925 = vmax.xlane.f32.xlu1 %v6235_v22 }
 0x821   : > { %1923 = vmax.xlane.f32.xlu0 %v6241_v12 }
 0x822   : > { %v4365_v45 = vpop.f32.mrb[44].mxu1 }
 0x823   : > { %1921 = vmax.xlane.f32.xlu1 %v6247_v33  ;;  %v1888_v42 = vpop.f32.mrb[45].mxu1  ;;  %v6257_v63 = vadd.f32 %v4365_v45, %v3939_v35  ;;  %v3938_v45 = vld [vmem:[%s7201_s3 + $0x168] sm:$0xff]  ;;  %v6282_v35 = vpop.permute.xlu1 %2211 }
 0x824   : > { %v4366_v34 = vpop.f32.mrb[46].mxu1  ;;  %v6263_v30 = vadd.f32 %v3937_v5, %v1888_v42 }
 0x825   : > { %1919 = vmax.xlane.f32.xlu0 %v6250_v48  ;;  %v1891_v23 = vpop.f32.mrb[47].mxu1  ;;  %v6273_v50 = vadd.f32 %v4366_v34, %v3940_v9 }
 0x826   : > { %v6279_v42 = vadd.f32 %v3938_v45, %v1891_v23 }
 0x829   : > { %1931 = vmax.xlane.f32.xlu0 %v6257_v63 }
 0x82d   : > { %1927 = vmax.xlane.f32.xlu0 %v6263_v30 }
 0x834   : > { %2215 = vrot.lane.b32.xlu1 %v5544_v13, %s5211_s27 }
 0x843   : > { %2213 = vrot.lane.b32.xlu0 %v5546_v26, %s5211_s27 }
 0x858   : > { %1933 = vmax.xlane.f32.xlu1 %v6273_v50 }
 0x85c   : > { %1929 = vmax.xlane.f32.xlu1 %v6279_v42 }
 0x89a   : > { %v1908_v5 = vpop.xlane.xlu0 %1907 }
 0x89b   : > { %v1937_v24 = vsub.f32 %v6185_v54, %v1908_v5 }
 0x89d   : > { %v1955_v1 = vmul.f32 1.442695, %v1937_v24  ;;  %v1906_v14 = vpop.xlane.xlu1 %1905 }
 0x89e   : > { %v1936_v34 = vsub.f32 %v6194_v44, %v1906_v14  ;;  %v1904_v9 = vpop.xlane.xlu0 %1903 }
 0x89f   : > { %4931 = vpow2.f32 %v1955_v1  ;;  %v1935_v49 = vsub.f32 %v6196_v19, %v1904_v9 }
 0x8a0   : > { %v1953_v3 = vmul.f32 1.442695, %v1936_v34 }
 0x8a1   : > { %v1951_v7 = vmul.f32 1.442695, %v1935_v49 }
 0x8a2   : > { %4933 = vpow2.f32 %v1953_v3  ;;  %v1910_v23 = vpop.xlane.xlu0 %1909 }
 0x8a3   : > { %4935 = vpow2.f32 %v1951_v7  ;;  %v1938_v45 = vsub.f32 %v6206_v46, %v1910_v23 }
 0x8a4   : > { %v1918_v1 = vpop.xlane.xlu1 %1917 }
 0x8a5   : > { %v1957_v52 = vmul.f32 1.442695, %v1938_v45  ;;  %v1942_v45 = vsub.f32 %v6211_v17, %v1918_v1 }
 0x8a6   : > { %v1916_v7 = vpop.xlane.xlu0 %1915 }
 0x8a7   : > { %4937 = vpow2.f32 %v1957_v52  ;;  %v1941_v54 = vsub.f32 %v6217_v59, %v1916_v7  ;;  %v1965_v60 = vmul.f32 1.442695, %v1942_v45 }
 0x8a8   : > { %v1914_v44 = vpop.xlane.xlu1 %1913 }
 0x8a9   : > { %v6288_v51 = vpop.eup %4931  ;;  %v1963_v46 = vmul.f32 1.442695, %v1941_v54  ;;  %v1940_v34 = vsub.f32 %v6223_v31, %v1914_v44 }
 0x8aa   : > { %1987 = vadd.xlane.f32.xlu1 %v6288_v51  ;;  %v1912_v52 = vpop.xlane.xlu0 %1911 }
 0x8ab   : > { %v1939_v5 = vsub.f32 %v6229_v47, %v1912_v52  ;;  %4939 = vpow2.f32 %v1963_v46  ;;  %v1961_v62 = vmul.f32 1.442695, %v1940_v34 }
 0x8ac   : > { %v6291_v24 = vpop.eup %4933  ;;  %v1926_v9 = vpop.xlane.xlu1 %1925 }
 0x8ad   : > { %v6293_v14 = vpop.eup %4935  ;;  %1985 = vadd.xlane.f32.xlu0 %v6291_v24  ;;  %v1959_v8 = vmul.f32 1.442695, %v1939_v5  ;;  %v1946_v17 = vsub.f32 %v6235_v22, %v1926_v9 }
 0x8ae   : > { %1983 = vadd.xlane.f32.xlu1 %v6293_v14  ;;  %v1924_v3 = vpop.xlane.xlu0 %1923 }
 0x8af   : > { %v1945_v4 = vsub.f32 %v6241_v12, %v1924_v3  ;;  %4941 = vpow2.f32 %v1959_v8 }
 0x8b0   : > { %v1922_v61 = vpop.xlane.xlu1 %1921  ;;  %4943 = vpow2.f32 %v1961_v62 }
 0x8b1   : > { %v6297_v49 = vpop.eup %4937  ;;  %v1971_v7 = vmul.f32 1.442695, %v1945_v4  ;;  %4945 = vpow2.f32 %v1965_v60  ;;  %v1973_v4 = vmul.f32 1.442695, %v1946_v17  ;;  %v1944_v8 = vsub.f32 %v6247_v33, %v1922_v61 }
 0x8b2   : > { %1989 = vadd.xlane.f32.xlu1 %v6297_v49  ;;  %v1920_v19 = vpop.xlane.xlu0 %1919 }
 0x8b3   : > { %v1943_v47 = vsub.f32 %v6250_v48, %v1920_v19  ;;  %4947 = vpow2.f32 %v1971_v7 }
 0x8b4   : > { %v6315_v12 = vpop.permute.xlu1 %2215 }
 0x8b5   : > { %v1967_v1 = vmul.f32 1.442695, %v1943_v47  ;;  %v6313_v44 = vpop.eup %4939 }
 0x8b6   : > { %v1932_v23 = vpop.xlane.xlu0 %1931 }
 0x8b7   : > { %v1949_v59 = vsub.f32 %v6257_v63, %v1932_v23 }
 0x8b9   : > { %v1979_v31 = vmul.f32 1.442695, %v1949_v59  ;;  %v6319_v60 = vpop.eup %4941 }
 0x8ba   : > { %v1928_v52 = vpop.xlane.xlu0 %1927  ;;  %v6321_v48 = vpop.eup %4943 }
 0x8bb   : > { %v1947_v54 = vsub.f32 %v6263_v30, %v1928_v52  ;;  %4949 = vpow2.f32 %v1979_v31  ;;  %v1969_v30 = vmul.f32 1.442695, %v1944_v8  ;;  %v6326_v19 = vpop.eup %4945 }
 0x8bc   : > { %4951 = vpow2.f32 %v1967_v1 }
 0x8bd   : > { %v1975_v62 = vmul.f32 1.442695, %v1947_v54  ;;  %v6328_v61 = vpop.eup %4947 }
 0x8be   : > { %v2214_v7 = vpop.permute.xlu0 %2213 }
 0x8bf   : > { %4953 = vpow2.f32 %v1975_v62 }
 0x8c0   : > { %4955 = vpow2.f32 %v1973_v4 }
 0x8c3   : > { %2217 = vrot.lane.b32.xlu0 %v5554_v32, %s5211_s27  ;;  %2219 = vrot.lane.b32.xlu1 %v5552_v43, %s5211_s27 }
 0x8c5   : > { %v6333_v5 = vpop.eup %4949 }
 0x8c6   : > { %v6335_v34 = vpop.eup %4951 }
 0x8c9   : > { %v6339_v9 = vpop.eup %4953 }
 0x8ca   : > { %v6341_v23 = vpop.eup %4955 }
 0x8e2   : > { %1995 = vadd.xlane.f32.xlu0 %v6313_v44 }
 0x8e5   : > { %v1934_v63 = vpop.xlane.xlu1 %1933 }
 0x8e6   : > { %v1950_v22 = vsub.f32 %v6273_v50, %v1934_v63  ;;  %1991 = vadd.xlane.f32.xlu0 %v6319_v60 }
 0x8e7   : > { %1993 = vadd.xlane.f32.xlu1 %v6321_v48 }
 0x8e8   : > { %v1981_v3 = vmul.f32 1.442695, %v1950_v22 }
 0x8e9   : > { %v1930_v46 = vpop.xlane.xlu1 %1929 }
 0x8ea   : > { %4957 = vpow2.f32 %v1981_v3  ;;  %v1948_v33 = vsub.f32 %v6279_v42, %v1930_v46  ;;  %1997 = vadd.xlane.f32.xlu0 %v6326_v19 }
 0x8eb   : > { %2003 = vadd.xlane.f32.xlu1 %v6328_v61  ;;  %4959 = vpow2.f32 %v1969_v30  ;;  %v2250_v30 = vsel %vm823_vm1, %v6129_v41, 0 }
 0x8ec   : > { %v1977_v50 = vmul.f32 1.442695, %v1948_v33 }
 0x8ee   : > { %2011 = vadd.xlane.f32.xlu0 %v6333_v5  ;;  %4961 = vpow2.f32 %v1977_v50 }
 0x8ef   : > { %1999 = vadd.xlane.f32.xlu1 %v6335_v34 }
 0x8f2   : > { %2007 = vadd.xlane.f32.xlu0 %v6339_v9 }
 0x8f3   : > { %2005 = vadd.xlane.f32.xlu1 %v6341_v23 }
 0x8f4   : > { %v6345_v42 = vpop.eup %4957 }
 0x8f5   : > { %v6347_v45 = vpop.eup %4959 }
 0x8f6   : > { %2013 = vadd.xlane.f32.xlu0 %v6345_v42 }
 0x8f7   : > { %2001 = vadd.xlane.f32.xlu1 %v6347_v45 }
 0x8f8   : > { %v6351_v59 = vpop.eup %4961 }
 0x8fb   : > { %2009 = vadd.xlane.f32.xlu1 %v6351_v59 }
 0x90c   : > { %2223 = vrot.lane.b32.xlu1 %v5560_v57, %s5211_s27  ;;  %2221 = vrot.lane.b32.xlu0 %v5562_v16, %s5211_s27 }
 0x910   : > { %2195 = vrot.lane.b32.xlu1 %v5534_v15, %s5212_s30  ;;  %2193 = vrot.lane.b32.xlu0 %v5536_v18, %s5212_s30 }
 0x914   : > { %2199 = vrot.lane.b32.xlu1 %v5544_v13, %s5212_s30  ;;  %2197 = vrot.lane.b32.xlu0 %v5546_v26, %s5212_s30 }
 0x918   : > { %2203 = vrot.lane.b32.xlu1 %v5552_v43, %s5212_s30  ;;  %2201 = vrot.lane.b32.xlu0 %v5554_v32, %s5212_s30 }
 0x91c   : > { %2207 = vrot.lane.b32.xlu1 %v5560_v57, %s5212_s30  ;;  %2205 = vrot.lane.b32.xlu0 %v5562_v16, %s5212_s30 }
 0x920   : > { %2524 = vrot.lane.b32.xlu1 %v5534_v15, %s5213_s11  ;;  %2522 = vrot.lane.b32.xlu0 %v5536_v18, %s5213_s11 }
 0x924   : > { %2526 = vrot.lane.b32.xlu0 %v5546_v26, %s5213_s11 }
 0x937   : > { %v1988_v47 = vpop.xlane.xlu1 %1987 }
 0x93a   : > { %v1986_v52 = vpop.xlane.xlu0 %1985 }
 0x93b   : > { %4963 = vrcp.f32 %v1986_v52  ;;  %v1984_v31 = vpop.xlane.xlu1 %1983 }
 0x93c   : > { %4965 = vrcp.f32 %v1984_v31 }
 0x93d   : > { %4967 = vrcp.f32 %v1988_v47 }
 0x93e   : > { %v2218_v41 = vpop.permute.xlu0 %2217 }
 0x93f   : > { %v1990_v54 = vpop.xlane.xlu1 %1989 }
 0x940   : > { %4969 = vrcp.f32 %v1990_v54 }
 0x945   : > { %v4964_v17 = vpop.eup %4963 }
 0x946   : > { %v4966_v1 = vpop.eup %4965  ;;  %v2032_v62 = vmul.f32 %v4964_v17, %v6291_v24  ;;  %v2253_v24 = vsel %vm823_vm1, %v6282_v35, 0 }
 0x947   : > { %v2031_v15 = vmul.f32 %v4966_v1, %v6293_v14  ;;  %v4968_v4 = vpop.eup %4967  ;;  %v2259_v14 = vsel %vm823_vm1, %v6315_v12, 0 }
 0x948   : > { %v2033_v26 = vmul.f32 %v4968_v4, %v6288_v51  ;;  %v2256_v51 = vsel %vm823_vm1, %v2214_v7, 0 }
 0x949   : > { %v2047_v18 = vpack.c.bf16 %v2032_v62, %v2031_v15 }
 0x94a   : > { %v4970_v8 = vpop.eup %4969 }
 0x94b   : > { %v2034_v63 = vmul.f32 %v4970_v8, %v6297_v49  ;;  %4383 = vmatprep.mubr.bf16.mxu0 %v2047_v18  ;;  %v2262_v49 = vsel %vm823_vm1, %v2218_v41, 0 }
 0x94d   : > { %v2048_v22 = vpack.c.bf16 %v2034_v63, %v2033_v26 }
 0x94f   : > { %4384 = vmatmul.mubr.bf16.vlgmr.msra.gmra.mrb[48].mxu0 %v2048_v22 }
 0x950   : > { %4400 = vmatpush3.bf16.xpose.msra.mxu0 %v2250_v30 }
 0x951   : > { %4576 = vmatprep.subr.msk.bf16.mxu0 %vm823_vm1, %v6282_v35  ;;  %v2220_v35 = vpop.permute.xlu1 %2219 }
 0x952   : > { %v2265_v50 = vsel %vm823_vm1, %v2220_v35, 0 }
 0x958   : > { %4402 = vmatpush3.bf16.xpose.msra.mxu0 %v2253_v24 }
 0x959   : > { %4577 = vmatprep.subr.msk.bf16.mxu0 %vm823_vm1, %v2214_v7 }
 0x960   : > { %4404 = vmatpush3.bf16.xpose.msra.mxu0 %v2256_v51 }
 0x961   : > { %4578 = vmatprep.subr.msk.bf16.mxu0 %vm823_vm1, %v6315_v12 }
 0x968   : > { %4406 = vmatpush3.bf16.xpose.msra.mxu0 %v2259_v14 }
 0x969   : > { %4579 = vmatprep.subr.msk.bf16.mxu0 %vm823_vm1, %v2218_v41 }
 0x96f   : > { %v1996_v3 = vpop.xlane.xlu0 %1995 }
 0x970   : > { %4408 = vmatpush3.bf16.xpose.msra.mxu0 %v2262_v49 }
 0x971   : > { %4580 = vmatprep.subr.msk.bf16.mxu0 %vm823_vm1, %v2220_v35 }
 0x973   : > { %v1992_v46 = vpop.xlane.xlu0 %1991 }
 0x974   : > { %4971 = vrcp.f32 %v1992_v46  ;;  %v1994_v33 = vpop.xlane.xlu1 %1993 }
 0x975   : > { %4973 = vrcp.f32 %v1994_v33 }
 0x976   : > { %4975 = vrcp.f32 %v1996_v3 }
 0x977   : > { %v1998_v7 = vpop.xlane.xlu0 %1997 }
 0x978   : > { %4410 = vmatpush3.bf16.xpose.msra.mxu0 %v2265_v50  ;;  %4977 = vrcp.f32 %v1998_v7  ;;  %v2004_v12 = vpop.xlane.xlu1 %2003 }
 0x97b   : > { %v2012_v47 = vpop.xlane.xlu0 %2011 }
 0x97c   : > { %v2000_v52 = vpop.xlane.xlu1 %1999 }
 0x97e   : > { %v4972_v31 = vpop.eup %4971 }
 0x97f   : > { %v4974_v54 = vpop.eup %4973  ;;  %v2008_v17 = vpop.xlane.xlu0 %2007  ;;  %v2035_v1 = vmul.f32 %v4972_v31, %v6319_v60 }
 0x980   : > { %v4976_v62 = vpop.eup %4975  ;;  %v2006_v15 = vpop.xlane.xlu1 %2005  ;;  %v2036_v4 = vmul.f32 %v4974_v54, %v6321_v48 }
 0x981   : > { %4979 = vrcp.f32 %v2006_v15  ;;  %v2037_v63 = vmul.f32 %v4976_v62, %v6313_v44 }
 0x982   : > { %v4978_v18 = vpop.eup %4977  ;;  %v2049_v8 = vpack.c.bf16 %v2036_v4, %v2035_v1  ;;  %4981 = vrcp.f32 %v2000_v52 }
 0x983   : > { %v2014_v26 = vpop.xlane.xlu0 %2013  ;;  %v2038_v22 = vmul.f32 %v4978_v18, %v6326_v19  ;;  %4983 = vrcp.f32 %v2004_v12 }
 0x984   : > { %v2002_v30 = vpop.xlane.xlu1 %2001  ;;  %4387 = vmatprep.mubr.bf16.mxu0 %v2049_v8 }
 0x985   : > { %4985 = vrcp.f32 %v2002_v30  ;;  %v2050_v24 = vpack.c.bf16 %v2038_v22, %v2037_v63 }
 0x986   : > { %4987 = vrcp.f32 %v2008_v17 }
 0x987   : > { %4388 = vmatmul.mubr.bf16.gmra.mrb[52].mxu0 %v2050_v24  ;;  %v2222_v60 = vpop.permute.xlu0 %2221 }
 0x988   : > { %v2010_v51 = vpop.xlane.xlu1 %2009  ;;  %4581 = vmatprep.subr.msk.bf16.mxu0 %vm823_vm1, %v2222_v60  ;;  %v2268_v48 = vsel %vm823_vm1, %v2222_v60, 0 }
 0x989   : > { %4989 = vrcp.f32 %v2010_v51  ;;  %4412 = vmatpush3.bf16.xpose.msra.mxu0 %v2268_v48 }
 0x98a   : > { %4991 = vrcp.f32 %v2014_v26 }
 0x98b   : > { %v2194_v14 = vpop.permute.xlu0 %2193  ;;  %v4980_v44 = vpop.eup %4979  ;;  %4993 = vrcp.f32 %v2012_v47 }
 0x98c   : > { %v2224_v19 = vpop.permute.xlu1 %2223  ;;  %v4982_v41 = vpop.eup %4981  ;;  %v2042_v46 = vmul.f32 %v4980_v44, %v6341_v23 }
 0x98d   : > { %4582 = vmatprep.subr.msk.bf16.mxu0 %vm823_vm1, %v2224_v19  ;;  %v4984_v49 = vpop.eup %4983  ;;  %v2271_v50 = vsel %vm823_vm1, %v2224_v19, 0  ;;  %v2039_v7 = vmul.f32 %v4982_v41, %v6335_v34 }
 0x98e   : > { %v2041_v47 = vmul.f32 %v4984_v49, %v6328_v61 }
 0x98f   : > { %v4986_v3 = vpop.eup %4985  ;;  %v2198_v35 = vpop.permute.xlu0 %2197 }
 0x990   : > { %v2196_v33 = vpop.permute.xlu1 %2195  ;;  %v2040_v12 = vmul.f32 %v4986_v3, %v6347_v45  ;;  %v4988_v52 = vpop.eup %4987  ;;  %v2052_v1 = vpack.c.bf16 %v2042_v46, %v2041_v47 }
 0x991   : > { %4414 = vmatpush3.bf16.xpose.msra.mxu0 %v2271_v50  ;;  %v2043_v23 = vmul.f32 %v4988_v52, %v6339_v9 }
 0x992   : > { %v2051_v31 = vpack.c.bf16 %v2040_v12, %v2039_v7 }
 0x993   : > { %v4990_v54 = vpop.eup %4989  ;;  %v2202_v17 = vpop.permute.xlu0 %2201 }
 0x994   : > { %v4992_v62 = vpop.eup %4991  ;;  %v2200_v15 = vpop.permute.xlu1 %2199  ;;  %4391 = vmatprep.mubr.bf16.mxu0 %v2051_v31  ;;  %v2044_v4 = vmul.f32 %v4990_v54, %v6351_v59 }
 0x995   : > { %4392 = vmatmul.mubr.bf16.gmra.mrb[56].mxu0 %v2052_v1  ;;  %v4994_v18 = vpop.eup %4993  ;;  %v2046_v45 = vmul.f32 %v4992_v62, %v6345_v42  ;;  %v3951_v62 = vld [vmem:[%s7201_s3 + $0x190] sm:$0xff] }
 0x996   : > { %v2053_v34 = vpack.c.bf16 %v2044_v4, %v2043_v23  ;;  %v2045_v61 = vmul.f32 %v4994_v18, %v6333_v5  ;;  %v3950_v18 = vld [vmem:[%s7201_s3 + $0x188] sm:$0xff] }
 0x997   : > { %v2206_v8 = vpop.permute.xlu0 %2205 }
 0x998   : > { %v2204_v26 = vpop.permute.xlu1 %2203  ;;  %4395 = vmatprep.mubr.bf16.mxu0 %v2053_v34  ;;  %v2054_v22 = vpack.c.bf16 %v2046_v45, %v2045_v61  ;;  %v3949_v34 = vld [vmem:[%s7201_s3 + $0x180] sm:$0xff] }
 0x99b   : > { %v2523_v63 = vpop.permute.xlu0 %2522 }
 0x99c   : > { %v2208_v30 = vpop.permute.xlu1 %2207  ;;  %4431 = vmatprep.subr.bf16.mxu0 %v2523_v63  ;;  %4535 = vmatprep.subr.bf16.mxu1 %v2523_v63 }
 0x99d   : > { %4396 = vmatmul.mubr.bf16.gmra.mrb[60].mxu0 %v2054_v22  ;;  %4543 = vmatpush3.bf16.msra.mxu1 %v2523_v63 }
 0x99e   : > { %4415 = vmatprep.mubr.msk.bf16.mxu0 %vm823_vm1, %v2194_v14 }
 0x99f   : > { %v2527_v59 = vpop.permute.xlu0 %2526 }
 0x9a0   : > { %v2525_v9 = vpop.permute.xlu1 %2524 }
 0x9a1   : > { %4536 = vmatprep.subr.bf16.mxu1 %v2525_v9 }
 0x9a2   : > { %4544 = vmatpush3.bf16.msra.mxu1 %v2525_v9 }
 0x9a3   : > { %4537 = vmatprep.subr.bf16.mxu1 %v2527_v59 }
 0x9a5   : > { %4416 = vmatmul.mubr.msk.bf16.vlgmr.msra.gmra.mrb[64].mxu0 %vm823_vm1, %v2196_v33 }
 0x9a6   : > { %4432 = vmatpush3.bf16.msra.mxu0 %v2523_v63  ;;  %4419 = vmatprep.mubr.msk.bf16.mxu0 %vm823_vm1, %v2198_v35  ;;  %v3952_v63 = vld [vmem:[%s7201_s3 + $0x198] sm:$0xff] }
 0x9a7   : > { %4433 = vmatprep.subr.bf16.mxu0 %v2525_v9  ;;  %4545 = vmatpush3.bf16.msra.mxu1 %v2527_v59 }
 0x9aa   : > { %4434 = vmatpush3.bf16.msra.mxu0 %v2525_v9 }
 0x9ab   : > { %4435 = vmatprep.subr.bf16.mxu0 %v2527_v59 }
 0x9ad   : > { %4420 = vmatmul.mubr.msk.bf16.gmra.mrb[68].mxu0 %vm823_vm1, %v2200_v15 }
 0x9ae   : > { %4436 = vmatpush3.bf16.msra.mxu0 %v2527_v59  ;;  %4423 = vmatprep.mubr.msk.bf16.mxu0 %vm823_vm1, %v2202_v17 }
 0x9b5   : > { %4424 = vmatmul.mubr.msk.bf16.gmra.mrb[72].mxu0 %vm823_vm1, %v2204_v26 }
 0x9b6   : > { %4427 = vmatprep.mubr.msk.bf16.mxu0 %vm823_vm1, %v2206_v8 }
 0x9bd   : > { %4428 = vmatmul.mubr.msk.bf16.gmra.mrb[76].mxu0 %vm823_vm1, %v2208_v30  ;;  %v3956_v30 = vld [vmem:[%s7201_s3 + $0x1b8] sm:$0xff] }
 0xa22   : > { %v6416_v5 = vpop.f32.mrb[48].mxu0 }
 0xa23   : > { %v6418_v42 = vpop.f32.mrb[49].mxu0 }
 0xa24   : > { %v6420_v24 = vpop.f32.mrb[50].mxu0 }
 0xa25   : > { %v6424_v51 = vpop.f32.mrb[51].mxu0 }
 0xa5a   : > { %v6428_v14 = vpop.f32.mrb[52].mxu0 }
 0xa5b   : > { %v6430_v44 = vpop.f32.mrb[53].mxu0 }
 0xa5c   : > { %v6432_v19 = vpop.f32.mrb[54].mxu0 }
 0xa5d   : > { %v6436_v49 = vpop.f32.mrb[55].mxu0 }
 0xa68   : > { %v6440_v35 = vpop.f32.mrb[56].mxu0 }
 0xa69   : > { %v6442_v46 = vpop.f32.mrb[57].mxu0 }
 0xa6a   : > { %v6444_v33 = vpop.f32.mrb[58].mxu0 }
 0xa6b   : > { %v6448_v7 = vpop.f32.mrb[59].mxu0 }
 0xa70   : > { %v6452_v52 = vpop.f32.mrb[60].mxu0 }
 0xa71   : > { %v6454_v47 = vpop.f32.mrb[61].mxu0 }
 0xa72   : > { %v6456_v31 = vpop.f32.mrb[62].mxu0 }
 0xa73   : > { %v6460_v17 = vpop.f32.mrb[63].mxu0 }
 0xa78   : > { %v4417_v15 = vpop.f32.mrb[64].mxu0 }
 0xa79   : > { %v6467_v23 = vadd.f32 %v4417_v15, %v3951_v62  ;;  %v2307_v4 = vpop.f32.mrb[65].mxu0  ;;  %v3955_v62 = vld [vmem:[%s7201_s3 + $0x1b0] sm:$0xff] }
 0xa7a   : > { %v4418_v8 = vpop.f32.mrb[66].mxu0  ;;  %v6478_v61 = vadd.f32 %v3949_v34, %v2307_v4  ;;  %v3954_v34 = vld [vmem:[%s7201_s3 + $0x1a8] sm:$0xff] }
 0xa7b   : > { %2374 = vmax.xlane.f32.xlu0 %v6467_v23  ;;  %v2310_v45 = vpop.f32.mrb[67].mxu0  ;;  %v6488_v9 = vadd.f32 %v4418_v8, %v3952_v63  ;;  %v3953_v8 = vld [vmem:[%s7201_s3 + $0x1a0] sm:$0xff] }
 0xa7c   : > { %v6476_v26 = vadd.f32 %v3950_v18, %v2310_v45 }
 0xa7e   : > { %2372 = vmax.xlane.f32.xlu1 %v6476_v26 }
 0xa7f   : > { %2370 = vmax.xlane.f32.xlu0 %v6478_v61 }
 0xa80   : > { %v4421_v22 = vpop.f32.mrb[68].mxu0 }
 0xa81   : > { %v2323_v59 = vpop.f32.mrb[69].mxu0  ;;  %v6499_v45 = vadd.f32 %v4421_v22, %v3955_v62  ;;  %v3959_v62 = vld [vmem:[%s7201_s3 + $0x1d0] sm:$0xff] }
 0xa82   : > { %v4422_v15 = vpop.f32.mrb[70].mxu0  ;;  %v6511_v1 = vadd.f32 %v3953_v8, %v2323_v59  ;;  %v3957_v59 = vld [vmem:[%s7201_s3 + $0x1c0] sm:$0xff] }
 0xa83   : > { %v6493_v4 = vadd.f32 %v4422_v15, %v3956_v30  ;;  %2376 = vmax.xlane.f32.xlu0 %v6488_v9  ;;  %v2326_v18 = vpop.f32.mrb[71].mxu0  ;;  %v3960_v15 = vld [vmem:[%s7201_s3 + $0x1d8] sm:$0xff] }
 0xa84   : > { %v6505_v63 = vadd.f32 %v3954_v34, %v2326_v18  ;;  %v3958_v34 = vld [vmem:[%s7201_s3 + $0x1c8] sm:$0xff] }
 0xa85   : > { %2384 = vmax.xlane.f32.xlu1 %v6493_v4 }
 0xa87   : > { %2382 = vmax.xlane.f32.xlu0 %v6499_v45 }
 0xa88   : > { %v4425_v30 = vpop.f32.mrb[72].mxu0 }
 0xa89   : > { %2380 = vmax.xlane.f32.xlu1 %v6505_v63  ;;  %v2339_v22 = vpop.f32.mrb[73].mxu0  ;;  %v6523_v50 = vadd.f32 %v4425_v30, %v3959_v62  ;;  %v3963_v30 = vld [vmem:[%s7201_s3 + $0x1f0] sm:$0xff] }
 0xa8a   : > { %v4426_v54 = vpop.f32.mrb[74].mxu0 }
 0xa8b   : > { %v6517_v12 = vadd.f32 %v4426_v54, %v3960_v15  ;;  %2378 = vmax.xlane.f32.xlu0 %v6511_v1  ;;  %v2342_v18 = vpop.f32.mrb[75].mxu0  ;;  %v6532_v15 = vadd.f32 %v3957_v59, %v2339_v22 }
 0xa8c   : > { %v6529_v8 = vadd.f32 %v3958_v34, %v2342_v18  ;;  %v3961_v18 = vld [vmem:[%s7201_s3 + $0x1e0] sm:$0xff]  ;;  %v3964_v34 = vld [vmem:[%s7201_s3 + $0x1f8] sm:$0xff] }
 0xa8d   : > { %2392 = vmax.xlane.f32.xlu1 %v6517_v12 }
 0xa8f   : > { %2390 = vmax.xlane.f32.xlu0 %v6523_v50 }
 0xa90   : > { %v4429_v54 = vpop.f32.mrb[76].mxu0 }
 0xa91   : > { %2388 = vmax.xlane.f32.xlu1 %v6529_v8  ;;  %v2355_v3 = vpop.f32.mrb[77].mxu0  ;;  %v6539_v60 = vadd.f32 %v4429_v54, %v3963_v30  ;;  %v3962_v54 = vld [vmem:[%s7201_s3 + $0x1e8] sm:$0xff] }
 0xa92   : > { %v4430_v62 = vpop.f32.mrb[78].mxu0  ;;  %v6545_v22 = vadd.f32 %v3961_v18, %v2355_v3 }
 0xa93   : > { %2386 = vmax.xlane.f32.xlu0 %v6532_v15  ;;  %v2358_v41 = vpop.f32.mrb[79].mxu0  ;;  %v6555_v59 = vadd.f32 %v4430_v62, %v3964_v34 }
 0xa94   : > { %v6561_v3 = vadd.f32 %v3962_v54, %v2358_v41 }
 0xa97   : > { %2398 = vmax.xlane.f32.xlu0 %v6539_v60 }
 0xa9b   : > { %2394 = vmax.xlane.f32.xlu0 %v6545_v22 }
 0xaa2   : > { %2530 = vrot.lane.b32.xlu1 %v5554_v32, %s5213_s11 }
 0xab1   : > { %2528 = vrot.lane.b32.xlu0 %v5544_v13, %s5213_s11 }
 0xac6   : > { %2400 = vmax.xlane.f32.xlu1 %v6555_v59 }
 0xaca   : > { %2396 = vmax.xlane.f32.xlu1 %v6561_v3 }
 0xadb   : > { %2532 = vrot.lane.b32.xlu1 %v5552_v43, %s5213_s11 }
 0xb08   : > { %v2375_v13 = vpop.xlane.xlu0 %2374 }
 0xb09   : > { %v2404_v32 = vsub.f32 %v6467_v23, %v2375_v13 }
 0xb0b   : > { %v2422_v30 = vmul.f32 1.442695, %v2404_v32  ;;  %v2373_v62 = vpop.xlane.xlu1 %2372 }
 0xb0c   : > { %v2371_v18 = vpop.xlane.xlu0 %2370  ;;  %v2403_v29 = vsub.f32 %v6476_v26, %v2373_v62 }
 0xb0d   : > { %4995 = vpow2.f32 %v2422_v30  ;;  %v2402_v34 = vsub.f32 %v6478_v61, %v2371_v18 }
 0xb0e   : > { %v2420_v40 = vmul.f32 1.442695, %v2403_v29 }
 0xb0f   : > { %v2418_v48 = vmul.f32 1.442695, %v2402_v34 }
 0xb10   : > { %v2377_v58 = vpop.xlane.xlu0 %2376 }
 0xb11   : > { %4997 = vpow2.f32 %v2418_v48  ;;  %v2405_v41 = vsub.f32 %v6488_v9, %v2377_v58 }
 0xb12   : > { %v2385_v54 = vpop.xlane.xlu1 %2384 }
 0xb13   : > { %v2424_v37 = vmul.f32 1.442695, %v2405_v41  ;;  %v2409_v48 = vsub.f32 %v6493_v4, %v2385_v54 }
 0xb14   : > { %v2383_v43 = vpop.xlane.xlu0 %2382 }
 0xb15   : > { %4999 = vpow2.f32 %v2424_v37  ;;  %v2408_v23 = vsub.f32 %v6499_v45, %v2383_v43  ;;  %v2432_v62 = vmul.f32 1.442695, %v2409_v48 }
 0xb16   : > { %v2381_v13 = vpop.xlane.xlu1 %2380  ;;  %5001 = vpow2.f32 %v2420_v40 }
 0xb17   : > { %v6571_v32 = vpop.eup %4995  ;;  %v2430_v30 = vmul.f32 1.442695, %v2408_v23  ;;  %v2407_v61 = vsub.f32 %v6505_v63, %v2381_v13 }
 0xb18   : > { %2454 = vadd.xlane.f32.xlu1 %v6571_v32  ;;  %v2379_v26 = vpop.xlane.xlu0 %2378 }
 0xb19   : > { %5003 = vpow2.f32 %v2430_v30  ;;  %v2428_v58 = vmul.f32 1.442695, %v2407_v61  ;;  %v2406_v29 = vsub.f32 %v6511_v1, %v2379_v26 }
 0xb1a   : > { %v2393_v45 = vpop.xlane.xlu1 %2392 }
 0xb1b   : > { %v6577_v9 = vpop.eup %4997  ;;  %v2426_v37 = vmul.f32 1.442695, %v2406_v29  ;;  %5005 = vpow2.f32 %v2428_v58  ;;  %v2413_v4 = vsub.f32 %v6517_v12, %v2393_v45 }
 0xb1c   : > { %2450 = vadd.xlane.f32.xlu1 %v6577_v9  ;;  %v2391_v18 = vpop.xlane.xlu0 %2390 }
 0xb1d   : > { %5007 = vpow2.f32 %v2426_v37  ;;  %v2412_v40 = vsub.f32 %v6523_v50, %v2391_v18  ;;  %v2440_v30 = vmul.f32 1.442695, %v2413_v4 }
 0xb1e   : > { %5009 = vpow2.f32 %v2432_v62  ;;  %v2389_v41 = vpop.xlane.xlu1 %2388 }
 0xb1f   : > { %v6581_v63 = vpop.eup %4999  ;;  %v2438_v34 = vmul.f32 1.442695, %v2412_v40  ;;  %v2411_v50 = vsub.f32 %v6529_v8, %v2389_v41  ;;  %v7227_v41 = vpack.i.bf16 %v6138_v55, %v6134_v0  ;;  %v7230_v0 = vpack.i.bf16 %v6150_v39, %v6146_v28 }
 0xb20   : > { %2456 = vadd.xlane.f32.xlu1 %v6581_v63  ;;  %v2387_v1 = vpop.xlane.xlu0 %2386  ;;  %v6586_v43 = vpop.eup %5001  ;;  %v7232_v28 = vpack.i.bf16 %v6162_v10, %v6158_v2  ;;  %v7234_v2 = vpack.i.bf16 %v6154_v25, %v6148_v36  ;;  %v7235_v10 = vpack.i.bf16 %v6436_v49, %v6430_v44 }
 0xb21   : > { %v2410_v54 = vsub.f32 %v6532_v15, %v2387_v1  ;;  %5011 = vpow2.f32 %v2438_v34  ;;  %v2436_v58 = vmul.f32 1.442695, %v2411_v50 }
 0xb22   : > { %v2531_v62 = vpop.permute.xlu1 %2530 }
 0xb23   : > { %v6588_v23 = vpop.eup %5003  ;;  %v2434_v13 = vmul.f32 1.442695, %v2410_v54  ;;  %v7228_v54 = vpack.i.bf16 %v6424_v51, %v6418_v42  ;;  %v7231_v42 = vpack.i.bf16 %v6432_v19, %v6428_v14  ;;  %v7233_v14 = vpack.i.bf16 %v6142_v27, %v6136_v38 }
 0xb24   : > { %2452 = vadd.xlane.f32.xlu1 %v6586_v43  ;;  %2462 = vadd.xlane.f32.xlu0 %v6588_v23  ;;  %v2399_v12 = vpop.xlane.xlu0 %2398  ;;  %v7236_v19 = vpack.i.bf16 %v6166_v21, %v6160_v53 }
 0xb25   : > { %5013 = vpow2.f32 %v2434_v13  ;;  %v2416_v61 = vsub.f32 %v6539_v60, %v2399_v12  ;;  %v6594_v26 = vpop.eup %5005 }
 0xb26   : > { %5015 = vpow2.f32 %v2440_v30 }
 0xb27   : > { %v6596_v15 = vpop.eup %5007  ;;  %v2446_v48 = vmul.f32 1.442695, %v2416_v61 }
 0xb28   : > { %2460 = vadd.xlane.f32.xlu1 %v6594_v26  ;;  %2458 = vadd.xlane.f32.xlu0 %v6596_v15  ;;  %v2395_v8 = vpop.xlane.xlu0 %2394  ;;  %v6601_v37 = vpop.eup %5009 }
 0xb29   : > { %5017 = vpow2.f32 %v2446_v48  ;;  %v2414_v29 = vsub.f32 %v6545_v22, %v2395_v8 }
 0xb2a   : > { %5019 = vpow2.f32 %v2436_v58 }
 0xb2b   : > { %v2442_v45 = vmul.f32 1.442695, %v2414_v29  ;;  %v6604_v18 = vpop.eup %5011 }
 0xb2c   : > { %2464 = vadd.xlane.f32.xlu0 %v6601_v37  ;;  %v2529_v60 = vpop.permute.xlu0 %2528 }
 0xb2d   : > { %5021 = vpow2.f32 %v2442_v45  ;;  %4437 = vmatprep.subr.bf16.mxu0 %v2529_v60  ;;  %4538 = vmatprep.subr.bf16.mxu1 %v2529_v60 }
 0xb2e   : > { %4438 = vmatpush3.bf16.msra.mxu0 %v2529_v60  ;;  %4546 = vmatpush3.bf16.msra.mxu1 %v2529_v60 }
 0xb2f   : > { %v6606_v40 = vpop.eup %5013  ;;  %4439 = vmatprep.subr.bf16.mxu0 %v2531_v62  ;;  %4539 = vmatprep.subr.bf16.mxu1 %v2531_v62 }
 0xb30   : > { %2470 = vadd.xlane.f32.xlu0 %v6604_v18  ;;  %2466 = vadd.xlane.f32.xlu1 %v6606_v40  ;;  %v6610_v22 = vpop.eup %5015 }
 0xb32   : > { %4440 = vmatpush3.bf16.msra.mxu0 %v2531_v62  ;;  %4547 = vmatpush3.bf16.msra.mxu1 %v2531_v62 }
 0xb33   : > { %v6612_v4 = vpop.eup %5017 }
 0xb34   : > { %2472 = vadd.xlane.f32.xlu0 %v6610_v22  ;;  %2478 = vadd.xlane.f32.xlu1 %v6612_v4  ;;  %v6616_v34 = vpop.eup %5019 }
 0xb37   : > { %v6618_v1 = vpop.eup %5021 }
 0xb38   : > { %2468 = vadd.xlane.f32.xlu0 %v6616_v34  ;;  %2474 = vadd.xlane.f32.xlu1 %v6618_v1 }
 0xb49   : > { %2536 = vrot.lane.b32.xlu1 %v5560_v57, %s5213_s11  ;;  %v7229_v57 = vpack.i.bf16 %v6420_v24, %v6416_v5 }
 0xb4d   : > { %4643 = vrot.lane.b32.xlu1 %v7227_v41, %s5214_s25 }
 0xb4e   : > { %2534 = vrot.lane.b32.xlu0 %v5562_v16, %s5213_s11  ;;  %s353_s11 = sand.u32 1, %s5193_s14  }
 0xb4f   : > { %s3878_s30 = sshll.u32 %s353_s11, 7 }
 0xb50   : > { %s7097_s27 = scalar_lea.vmem [#allocation2], %s3878_s30 }
 0xb51   : > { %4648 = vrot.lane.b32.xlu1 %v7228_v54, %s5215_s26  ;;  %s3812_s18 = sshll.u32 %s7097_s27, 4  ;;  %s7148_s18 = int_to_ptr.vmem [resolvable:$true] %s3812_s18 }
 0xb52   : > { %s5139_s28 = scalar_lea.vmem %s7148_s18, 2048 }
 0xb53   : > { %v2401_v13 = vpop.xlane.xlu1 %2400  ;;  %p5140_p11 = scmp.ne.s32.totalorder %s7148_s18, %s5139_s28 }
 0xb54   : > { %v2417_v5 = vsub.f32 %v6555_v59, %v2401_v13 }
 0xb55   : > { %4653 = vrot.lane.b32.xlu1 %v7229_v57, %s5215_s26  ;;  %p5141_p12 = pnand %p5140_p11, %p5312_p5 }
 0xb56   : > { %v2448_v39 = vmul.f32 1.442695, %v2417_v5 }
 0xb57   : > { %v2397_v30 = vpop.xlane.xlu1 %2396  ;;  %p5142_p13 = pneg %p5141_p12 }
 0xb58   : > { %v2415_v16 = vsub.f32 %v6561_v3, %v2397_v30 }
 0xb59   : > { %4663 = vrot.lane.b32.xlu1 %v7230_v0, %s5214_s25 }
 0xb5a   : > { %v2444_v24 = vmul.f32 1.442695, %v2415_v16 }
 0xb5b   : > { %v2533_v55 = vpop.permute.xlu1 %2532 }
 0xb5c   : > { %4441 = vmatprep.subr.bf16.mxu0 %v2533_v55  ;;  %4540 = vmatprep.subr.bf16.mxu1 %v2533_v55  ;;  %5023 = vpow2.f32 %v2444_v24 }
 0xb5d   : > { %4673 = vrot.lane.b32.xlu1 %v7231_v42, %s5215_s26  ;;  %4442 = vmatpush3.bf16.msra.mxu0 %v2533_v55  ;;  %5025 = vpow2.f32 %v2448_v39 }
 0xb5e   : > { %4548 = vmatpush3.bf16.msra.mxu1 %v2533_v55 }
 0xb61   : > { %4683 = vrot.lane.b32.xlu1 %v7232_v28, %s5214_s25 }
 0xb66   : > { %v6652_v51 = vpop.eup %5023 }
 0xb67   : > { %v6655_v3 = vpop.eup %5025 }
 0xb6d   : > { %2476 = vadd.xlane.f32.xlu0 %v6652_v51 }
 0xb71   : > { %2480 = vadd.xlane.f32.xlu0 %v6655_v3 }
 0xb87   : > { %4638 = vrot.lane.b32.xlu0 %v7233_v14, %s5214_s25 }
 0xb8b   : > { %4658 = vrot.lane.b32.xlu0 %v7234_v2, %s5214_s25 }
 0xb8f   : > { %4668 = vrot.lane.b32.xlu0 %v7235_v10, %s5215_s26 }
 0xb93   : > { %4678 = vrot.lane.b32.xlu0 %v7236_v19, %s5214_s25 }
 0xba5   : > { %v2455_v59 = vpop.xlane.xlu1 %2454 }
 0xba9   : > { %v2451_v50 = vpop.xlane.xlu1 %2450 }
 0xbaa   : > { %5027 = vrcp.f32 %v2451_v50 }
 0xbad   : > { %v2457_v12 = vpop.xlane.xlu1 %2456 }
 0xbb1   : > { %v2453_v38 = vpop.xlane.xlu1 %2452  ;;  %v2463_v27 = vpop.xlane.xlu0 %2462 }
 0xbb2   : > { %5029 = vrcp.f32 %v2453_v38 }
 0xbb4   : > { %v5028_v48 = vpop.eup %5027 }
 0xbb5   : > { %v2461_v61 = vpop.xlane.xlu1 %2460  ;;  %v2459_v36 = vpop.xlane.xlu0 %2458  ;;  %v2498_v8 = vmul.f32 %v5028_v48, %v6577_v9 }
 0xbb6   : > { %5031 = vrcp.f32 %v2461_v61 }
 0xbb7   : > { %5033 = vrcp.f32 %v2459_v36 }
 0xbb8   : > { %5035 = vrcp.f32 %v2457_v12 }
 0xbb9   : > { %v2465_v25 = vpop.xlane.xlu0 %2464 }
 0xbba   : > { %5037 = vrcp.f32 %v2465_v25 }
 0xbbb   : > { %5039 = vrcp.f32 %v2455_v59 }
 0xbbc   : > { %v5030_v44 = vpop.eup %5029  ;;  %5041 = vrcp.f32 %v2463_v27 }
 0xbbd   : > { %v2467_v49 = vpop.xlane.xlu1 %2466  ;;  %v2471_v58 = vpop.xlane.xlu0 %2470  ;;  %v2499_v53 = vmul.f32 %v5030_v44, %v6586_v43 }
 0xbbe   : > { %5043 = vrcp.f32 %v2467_v49  ;;  %v4759_v49 = vld [vmem:[%s7202_s4] sm:$0xff]  }
 0xbbf   : > { %v2514_v21 = vpack.c.bf16 %v2499_v53, %v2498_v8 }
 0xbc0   : > { %v5032_v29 = vpop.eup %5031 }
 0xbc1   : > { %v5034_v45 = vpop.eup %5033  ;;  %4447 = vmatprep.mubr.bf16.mxu0 %v2514_v21  ;;  %v2479_v60 = vpop.xlane.xlu1 %2478  ;;  %v2503_v41 = vmul.f32 %v5032_v29, %v6594_v26 }
 0xbc2   : > { %v2473_v62 = vpop.xlane.xlu0 %2472  ;;  %v2502_v54 = vmul.f32 %v5034_v45, %v6596_v15  ;;  %v5036_v43 = vpop.eup %5035 }
 0xbc3   : > { %5045 = vrcp.f32 %v2473_v62  ;;  %v2501_v26 = vmul.f32 %v5036_v43, %v6581_v63  ;;  %v7238_v43 = vpack.i.bf16 %v6448_v7, %v6442_v46  ;;  %v7241_v46 = vpack.i.bf16 %v6456_v31, %v6452_v52 }
 0xbc4   : > { %v2516_v13 = vpack.c.bf16 %v2503_v41, %v2502_v54  ;;  %v5038_v30 = vpop.eup %5037 }
 0xbc5   : > { %v2475_v57 = vpop.xlane.xlu1 %2474  ;;  %v5040_v16 = vpop.eup %5039  ;;  %v2505_v15 = vmul.f32 %v5038_v30, %v6601_v37 }
 0xbc6   : > { %v2469_v9 = vpop.xlane.xlu0 %2468  ;;  %4451 = vmatprep.mubr.bf16.mxu1 %v2516_v13  ;;  %v5042_v55 = vpop.eup %5041  ;;  %v2500_v5 = vmul.f32 %v5040_v16, %v6571_v32 }
 0xbc7   : > { %5047 = vrcp.f32 %v2469_v9  ;;  %v2504_v24 = vmul.f32 %v5042_v55, %v6588_v23  ;;  %v7239_v55 = vpack.i.bf16 %v6174_v6, %v6170_v11 }
 0xbc8   : > { %5049 = vrcp.f32 %v2471_v58  ;;  %v5044_v28 = vpop.eup %5043  ;;  %v2515_v14 = vpack.c.bf16 %v2501_v26, %v2500_v5 }
 0xbc9   : > { %v2537_v42 = vpop.permute.xlu1 %2536  ;;  %v2517_v2 = vpack.c.bf16 %v2505_v15, %v2504_v24  ;;  %v2506_v19 = vmul.f32 %v5044_v28, %v6606_v40  ;;  %5051 = vrcp.f32 %v2475_v57  ;;  %v7237_v57 = vpack.i.bf16 %v6444_v33, %v6440_v35 }
 0xbca   : > { %v2535_v0 = vpop.permute.xlu0 %2534  ;;  %v7240_v35 = vpack.i.bf16 %v6178_v20, %v6172_v56  ;;  %v7242_v33 = vpack.i.bf16 %v6460_v17, %v6454_v47 }
 0xbcb   : > { %4443 = vmatprep.subr.bf16.mxu0 %v2535_v0  ;;  %4541 = vmatprep.subr.bf16.mxu1 %v2535_v0 }
 0xbcc   : > { %4444 = vmatpush3.bf16.msra.mxu0 %v2535_v0  ;;  %4549 = vmatpush3.bf16.msra.mxu1 %v2535_v0 }
 0xbcd   : > { %4445 = vmatprep.subr.bf16.mxu0 %v2537_v42  ;;  %4542 = vmatprep.subr.bf16.mxu1 %v2537_v42  ;;  %v5046_v39 = vpop.eup %5045  ;;  %v4644_v56 = vpop.permute.xlu1 %4643 }
 0xbce   : > { %v2509_v50 = vmul.f32 %v5046_v39, %v6610_v22 }
 0xbd0   : > { %4446 = vmatpush3.bf16.msra.mxu0 %v2537_v42  ;;  %4550 = vmatpush3.bf16.msra.mxu1 %v2537_v42 }
 0xbd1   : > { %v5048_v10 = vpop.eup %5047  ;;  %4463 = vmatprep.subr.bf16.mxu1 %v4759_v49  ;;  %v4649_v20 = vpop.permute.xlu1 %4648 }
 0xbd2   : > { %v2507_v63 = vmul.f32 %v5048_v10, %v6616_v34  ;;  %v5050_v37 = vpop.eup %5049 }
 0xbd3   : > { %4448 = vmatmul.mubr.bf16.vlgmr.msra.gmra.mrb[80].mxu0 %v2515_v14  ;;  %4452 = vmatmul.mubr.bf16.vlgmr.msra.gmra.mrb[48].mxu1 %v2517_v2  ;;  %v2508_v32 = vmul.f32 %v5050_v37, %v6604_v18  ;;  %v5052_v27 = vpop.eup %5051  ;;  %v4646_v14 = vunpack.i.h.bf16 %v4644_v56  ;;  %v4645_v2 = vunpack.i.l.bf16 %v4644_v56 }
 0xbd4   : > { %v2518_v59 = vpack.c.bf16 %v2507_v63, %v2506_v19  ;;  %v2510_v40 = vmul.f32 %v5052_v27, %v6618_v1  ;;  %4464 = vmatpush3.bf16.msra.mxu1 %v4759_v49  ;;  %v4760_v1 = vld [vmem:[%s7202_s4 + $0x8] sm:$0xff]   ;;  %v7245_v27 = vld [vmem:[#allocation8_spill] sm:$0xff] }
 0xbd5   : > { %v2519_v23 = vpack.c.bf16 %v2509_v50, %v2508_v32  ;;  %4465 = vmatprep.subr.bf16.mxu1 %v4760_v1  ;;  %v4654_v5 = vpop.permute.xlu1 %4653  ;;  %v7244_v32 = vld [vmem:[#allocation5_spill] sm:$0xff] }
 0xbd6   : > { %4455 = vmatprep.mubr.bf16.mxu1 %v2518_v59  ;;  %v4656_v19 = vunpack.i.h.bf16 %v4654_v5  ;;  %v4655_v63 = vunpack.i.l.bf16 %v4654_v5  ;;  %v7243_v59 = vld [vmem:[#allocation7_spill] sm:$0xff] }
 0xbd7   : > { %v2838_v50 = vsel %vm823_vm1, %v7243_v59, %v4646_v14 }
 0xbd8   : > { %4466 = vmatpush3.bf16.msra.mxu1 %v4760_v1 }
 0xbd9   : > { %v4664_v28 = vpop.permute.xlu1 %4663 }
 0xbda   : > { %v4666_v49 = vunpack.i.h.bf16 %v4664_v28  ;;  %v4665_v1 = vunpack.i.l.bf16 %v4664_v28 }
 0xbdb   : > { %4456 = vmatmul.mubr.bf16.gmra.mrb[52].mxu1 %v2519_v23  ;;  %v2837_v23 = vsel %vm823_vm1, %v7244_v32, %v4645_v2 }
 0xbdd   : > { %v4674_v31 = vpop.permute.xlu1 %4673 }
 0xbe1   : > { %v6720_v47 = vpop.permute.xlu1 %4683 }
 0xbe2   : > { %v4685_v2 = vunpack.i.l.bf16 %v6720_v47 }
 0xbfa   : > { %v2477_v12 = vpop.xlane.xlu0 %2476 }
 0xbfb   : > { %5053 = vrcp.f32 %v2477_v12  ;;  %v4651_v12 = vunpack.i.h.bf16 %v4649_v20 }
 0xbfc   : > { %5055 = vrcp.f32 %v2479_v60 }
 0xbfe   : > { %v2481_v38 = vpop.xlane.xlu0 %2480 }
 0xbff   : > { %5057 = vrcp.f32 %v2481_v38  ;;  %v4650_v38 = vunpack.i.l.bf16 %v4649_v20  ;;  %v7250_v20 = vld [vmem:[#allocation10_spill] sm:$0xff] }
 0xc02   : > { %v4639_v24 = vpop.permute.xlu0 %4638 }
 0xc03   : > { %v4641_v17 = vunpack.i.h.bf16 %v4639_v24  ;;  %v4640_v10 = vunpack.i.l.bf16 %v4639_v24 }
 0xc05   : > { %v5054_v61 = vpop.eup %5053 }
 0xc06   : > { %v2511_v34 = vmul.f32 %v5054_v61, %v6652_v51  ;;  %v5056_v36 = vpop.eup %5055  ;;  %v4659_v52 = vpop.permute.xlu0 %4658  ;;  %v2836_v61 = vsel %vm823_vm1, %v7245_v27, %v4641_v17 }
 0xc07   : > { %v2512_v18 = vmul.f32 %v5056_v36, %v6612_v4 }
 0xc08   : > { %v2520_v25 = vpack.c.bf16 %v2511_v34, %v2510_v40  ;;  %v7246_v40 = vld [vmem:[#allocation6_spill] sm:$0xff] }
 0xc09   : > { %v5058_v22 = vpop.eup %5057  ;;  %v2835_v34 = vsel %vm823_vm1, %v7246_v40, %v4640_v10  ;;  %v7251_v40 = vld [vmem:[#allocation15_spill] sm:$0xff] }
 0xc0a   : > { %4459 = vmatprep.mubr.bf16.mxu1 %v2520_v25  ;;  %v2513_v48 = vmul.f32 %v5058_v22, %v6655_v3  ;;  %v4669_v39 = vpop.permute.xlu0 %4668  ;;  %v2854_v25 = vsel %vm2851_vm2, %v2837_v23, %v4655_v63  ;;  %v2855_v22 = vsel %vm2851_vm2, %v2838_v50, %v4656_v19 }
 0xc0c   : > { %v2521_v44 = vpack.c.bf16 %v2513_v48, %v2512_v18 }
 0xc0e   : > { %4460 = vmatmul.mubr.bf16.gmra.mrb[56].mxu1 %v2521_v44  ;;  %v6722_v37 = vpop.permute.xlu0 %4678 }
 0xc0f   : > { %v4681_v59 = vunpack.i.h.bf16 %v6722_v37  ;;  %v4680_v50 = vunpack.i.l.bf16 %v6722_v37 }
 0xca6   : > { %v4449_v51 = vpop.f32.mrb[80].mxu0  ;;  %v4453_v58 = vpop.f32.mrb[48].mxu1 }
 0xca7   : > { %v2580_v8 = vpop.f32.mrb[81].mxu0  ;;  %v2596_v4 = vpop.f32.mrb[49].mxu1 }
 0xca8   : > { %v4450_v53 = vpop.f32.mrb[82].mxu0  ;;  %v4454_v3 = vpop.f32.mrb[50].mxu1 }
 0xca9   : > { %v4687_v21 = vpack.i.bf16 %v4450_v53, %v4449_v51  ;;  %v4707_v29 = vpack.i.bf16 %v4454_v3, %v4453_v58  ;;  %v2583_v45 = vpop.f32.mrb[83].mxu0  ;;  %v2599_v60 = vpop.f32.mrb[51].mxu1  ;;  %v2852_v53 = vsel %vm2851_vm2, %v2835_v34, %v4650_v38  ;;  %v2853_v3 = vsel %vm2851_vm2, %v2836_v61, %v4651_v12  ;;  %v7252_v34 = vld [vmem:[#allocation13_spill] sm:$0xff] }
 0xcaa   : > { %v4692_v62 = vpack.i.bf16 %v2583_v45, %v2580_v8  ;;  %v4712_v41 = vpack.i.bf16 %v2599_v60, %v2596_v4 }
 0xcab   : > { %4688 = vrot.lane.b32.xlu1 %v4687_v21, %s5216_s12  ;;  %v4675_v21 = vunpack.i.l.bf16 %v4674_v31 }
 0xcac   : > { %4693 = vrot.lane.b32.xlu0 %v4692_v62, %s5216_s12 }
 0xcae   : > { %v4457_v54 = vpop.f32.mrb[52].mxu1 }
 0xcaf   : > { %v2612_v13 = vpop.f32.mrb[53].mxu1  ;;  %4703 = vrot.lane.b32.xlu1 %v7237_v57, %s5215_s26  ;;  %v4661_v57 = vunpack.i.h.bf16 %v4659_v52 }
 0xcb0   : > { %v4458_v9 = vpop.f32.mrb[54].mxu1  ;;  %4698 = vrot.lane.b32.xlu0 %v7238_v43, %s5215_s26  ;;  %v7247_v43 = vld [vmem:[#allocation9_spill] sm:$0xff] }
 0xcb1   : > { %v4727_v30 = vpack.i.bf16 %v4458_v9, %v4457_v54  ;;  %v2615_v0 = vpop.f32.mrb[55].mxu1  ;;  %v4660_v9 = vunpack.i.l.bf16 %v4659_v52 }
 0xcb2   : > { %v4732_v16 = vpack.i.bf16 %v2615_v0, %v2612_v13  ;;  %v4671_v0 = vunpack.i.h.bf16 %v4669_v39 }
 0xcb3   : > { %4708 = vrot.lane.b32.xlu1 %v4707_v29, %s5216_s12  ;;  %v2839_v5 = vsel %vm823_vm1, %v7250_v20, %v4660_v9 }
 0xcb4   : > { %4713 = vrot.lane.b32.xlu0 %v4712_v41, %s5216_s12  ;;  %v4676_v41 = vunpack.i.h.bf16 %v4674_v31 }
 0xcb7   : > { %4723 = vrot.lane.b32.xlu1 %v7239_v55, %s5214_s25  ;;  %v7248_v55 = vld [vmem:[#allocation11_spill] sm:$0xff] }
 0xcb8   : > { %4718 = vrot.lane.b32.xlu0 %v7240_v35, %s5214_s25  ;;  %v2842_v35 = vsel %vm823_vm1, %v7248_v55, %v4666_v49 }
 0xcbb   : > { %4728 = vrot.lane.b32.xlu1 %v4727_v30, %s5216_s12  ;;  %v2841_v30 = vsel %vm823_vm1, %v7247_v43, %v4665_v1 }
 0xcbc   : > { %4733 = vrot.lane.b32.xlu0 %v4732_v16, %s5216_s12  ;;  %v4670_v16 = vunpack.i.l.bf16 %v4669_v39 }
 0xcbe   : > { %v2856_v52 = vsel %vm2851_vm2, %v2839_v5, %v4670_v16 }
 0xcbf   : > { %4743 = vrot.lane.b32.xlu1 %v7241_v46, %s5215_s26  ;;  %v2858_v46 = vsel %vm2851_vm2, %v2841_v30, %v4675_v21 }
 0xcc0   : > { %4738 = vrot.lane.b32.xlu0 %v7242_v33, %s5215_s26 }
 0xce1   : > { %v4461_v7 = vpop.f32.mrb[56].mxu1 }
 0xce2   : > { %v2628_v11 = vpop.f32.mrb[57].mxu1 }
 0xce3   : > { %v4462_v6 = vpop.f32.mrb[58].mxu1 }
 0xce4   : > { %v4752_v42 = vpack.i.bf16 %v4462_v6, %v4461_v7  ;;  %v2631_v26 = vpop.f32.mrb[59].mxu1  ;;  %v2859_v7 = vsel %vm2851_vm2, %v2842_v35, %v4676_v41 }
 0xce5   : > { %v4747_v15 = vpack.i.bf16 %v2631_v26, %v2628_v11  ;;  %v4686_v11 = vunpack.i.h.bf16 %v6720_v47 }
 0xce6   : > { %4753 = vrot.lane.b32.xlu1 %v4752_v42, %s5216_s12 }
 0xce7   : > { %4748 = vrot.lane.b32.xlu0 %v4747_v15, %s5216_s12  ;;  %v7249_v15 = vld [vmem:[#allocation12_spill] sm:$0xff]  ;;  %v2846_v47 = vsel %vm823_vm1, %v7251_v40, %v4686_v11  ;;  %v5123_v40 = vld [vmem:[%s5326_s29 + $0x10] sm:$0xff]  ;;  %s4012_s12 = sshll.u32 %s5295_s17, 11  ;;  %s7156_s17 = scalar_lea.sflag [#allocation3], %s353_s11 }
 0xce8   : > { %v2840_v56 = vsel %vm823_vm1, %v7249_v15, %v4661_v57  ;;  %v7258_v15 = vld [vmem:[#allocation18_spill] sm:$0xff]  ;;  %s7143_s26 = scalar_lea.hbm %s7208_s10, %s4012_s12 }
 0xce9   : > { %v2857_v31 = vsel %vm2851_vm2, %v2840_v56, %v4671_v0 }
 0xd1d   : > { %v4689_v36 = vpop.permute.xlu1 %4688 }
 0xd1e   : > { %v4691_v18 = vunpack.i.h.bf16 %v4689_v36  ;;  %v4690_v48 = vunpack.i.l.bf16 %v4689_v36  ;;  %v4694_v44 = vpop.permute.xlu0 %4693  ;;  %v2845_v36 = vsel %vm823_vm1, %v7252_v34, %v4685_v2 }
 0xd1f   : > { %v4696_v51 = vunpack.i.h.bf16 %v4694_v44  ;;  %v4695_v58 = vunpack.i.l.bf16 %v4694_v44 }
 0xd20   : > { %v2872_v8 = vsel %vm2868_vm3, %v2855_v22, %v4691_v18  ;;  %v2871_v4 = vsel %vm2868_vm3, %v2854_v25, %v4690_v48  ;;  %v7253_v22 = vld [vmem:[#allocation16_spill] sm:$0xff]  ;;  %v7254_v18 = vld [vmem:[#allocation14_spill] sm:$0xff] }
 0xd21   : > { %v2886_v29 = vpack.c.bf16 %v2872_v8, %v2871_v4  ;;  %v2869_v45 = vsel %vm2868_vm3, %v2852_v53, %v4695_v58  ;;  %v2870_v60 = vsel %vm2868_vm3, %v2853_v3, %v4696_v51  ;;  %v4704_v62 = vpop.permute.xlu1 %4703  ;;  %v2844_v37 = vsel %vm823_vm1, %v7253_v22, %v4681_v59  ;;  %v5124_v22 = vld [vmem:[%s5326_s29] sm:$0xff] }
 0xd22   : > { %v2885_v54 = vpack.c.bf16 %v2870_v60, %v2869_v45  ;;  %v4699_v13 = vpop.permute.xlu0 %4698  ;;  %v4706_v12 = vunpack.i.h.bf16 %v4704_v62  ;;  %v4705_v38 = vunpack.i.l.bf16 %v4704_v62  ;;  %v2843_v48 = vsel %vm823_vm1, %v7254_v18, %v4680_v50  ;;  %v5125_v18 = vld [vmem:[%s5326_s29 + $0x18] sm:$0xff] }
 0xd23   : > { %v4701_v27 = vunpack.i.h.bf16 %v4699_v13  ;;  %v4700_v61 = vunpack.i.l.bf16 %v4699_v13 }
 0xd24   : > { %4467 = vmatprep.mubr.msk.bf16.mxu1 %vm381_vm0, %v2885_v54  ;;  %v2863_v51 = vsel %vm2851_vm2, %v2846_v47, %v4706_v12  ;;  %v2862_v58 = vsel %vm2851_vm2, %v2845_v36, %v4705_v38 }
 0xd25   : > { %v4709_v33 = vpop.permute.xlu1 %4708  ;;  %4468 = vmatmul.mubr.msk.bf16.vlgmr.msra.gmra.mrb[60].mxu1 %vm381_vm0, %v2886_v29  ;;  %v2860_v53 = vsel %vm2851_vm2, %v2843_v48, %v4700_v61  ;;  %v2861_v3 = vsel %vm2851_vm2, %v2844_v37, %v4701_v27 }
 0xd26   : > { %v4711_v6 = vunpack.i.h.bf16 %v4709_v33  ;;  %v4710_v42 = vunpack.i.l.bf16 %v4709_v33  ;;  %v4714_v26 = vpop.permute.xlu0 %4713 }
 0xd27   : > { %v4716_v24 = vunpack.i.h.bf16 %v4714_v26  ;;  %v4715_v28 = vunpack.i.l.bf16 %v4714_v26 }
 0xd28   : > { %v2876_v39 = vsel %vm2868_vm3, %v2859_v7, %v4711_v6  ;;  %v2875_v14 = vsel %vm2868_vm3, %v2858_v46, %v4710_v42  ;;  %v7255_v46 = vld [vmem:[#allocation19_spill] sm:$0xff]  ;;  %v7256_v7 = vld [vmem:[#allocation17_spill] sm:$0xff]  ;;  %v7257_v42 = vld [vmem:[#allocation20_spill] sm:$0xff] }
 0xd29   : > { %v2888_v17 = vpack.c.bf16 %v2876_v39, %v2875_v14  ;;  %v2873_v10 = vsel %vm2868_vm3, %v2856_v52, %v4715_v28  ;;  %v2874_v19 = vsel %vm2868_vm3, %v2857_v31, %v4716_v24  ;;  %v4724_v63 = vpop.permute.xlu1 %4723 }
 0xd2a   : > { %v2887_v32 = vpack.c.bf16 %v2874_v19, %v2873_v10  ;;  %v4719_v23 = vpop.permute.xlu0 %4718  ;;  %v4726_v13 = vunpack.i.h.bf16 %v4724_v63  ;;  %v4725_v57 = vunpack.i.l.bf16 %v4724_v63 }
 0xd2b   : > { %v4721_v43 = vunpack.i.h.bf16 %v4719_v23  ;;  %v4720_v30 = vunpack.i.l.bf16 %v4719_v23 }
 0xd2c   : > { %4471 = vmatprep.mubr.msk.bf16.mxu1 %vm381_vm0, %v2887_v32  ;;  %v2850_v33 = vsel %vm823_vm1, %v7255_v46, %v4726_v13  ;;  %v2849_v11 = vsel %vm823_vm1, %v7256_v7, %v4725_v57  ;;  %v6803_v32 = vld [vmem:[%s7203_s5] ss:$0 sm:$0xff] }
 0xd2d   : > { %v4729_v25 = vpop.permute.xlu1 %4728  ;;  %4472 = vmatmul.mubr.msk.bf16.gmra.mrb[64].mxu1 %vm381_vm0, %v2888_v17  ;;  %v2848_v26 = vsel %vm823_vm1, %v7257_v42, %v4721_v43  ;;  %v2847_v56 = vsel %vm823_vm1, %v7258_v15, %v4720_v30 }
 0xd2e   : > { %v4731_v44 = vunpack.i.h.bf16 %v4729_v25  ;;  %v4730_v49 = vunpack.i.l.bf16 %v4729_v25  ;;  %v4734_v1 = vpop.permute.xlu0 %4733 }
 0xd2f   : > { %v4736_v8 = vunpack.i.h.bf16 %v4734_v1  ;;  %v4735_v4 = vunpack.i.l.bf16 %v4734_v1 }
 0xd30   : > { %v2879_v21 = vsel %vm2868_vm3, %v2862_v58, %v4730_v49  ;;  %v2880_v29 = vsel %vm2868_vm3, %v2863_v51, %v4731_v44  ;;  %v5126_v49 = vld [vmem:[%s5326_s29 + $0x8] sm:$0xff] }
 0xd31   : > { %v2890_v45 = vpack.c.bf16 %v2880_v29, %v2879_v21  ;;  %v2877_v60 = vsel %vm2868_vm3, %v2860_v53, %v4735_v4  ;;  %v2878_v62 = vsel %vm2868_vm3, %v2861_v3, %v4736_v8  ;;  %v4744_v54 = vpop.permute.xlu1 %4743 }
 0xd32   : > { %v2889_v41 = vpack.c.bf16 %v2878_v62, %v2877_v60  ;;  %v4739_v9 = vpop.permute.xlu0 %4738  ;;  %v4746_v0 = vunpack.i.h.bf16 %v4744_v54  ;;  %v4745_v16 = vunpack.i.l.bf16 %v4744_v54  ;;  %v5127_v54 = vld [vmem:[%s5326_s29 + $0x38] sm:$0xff] }
 0xd33   : > { %v4741_v55 = vunpack.i.h.bf16 %v4739_v9  ;;  %v4740_v35 = vunpack.i.l.bf16 %v4739_v9 }
 0xd34   : > { %4475 = vmatprep.mubr.msk.bf16.mxu1 %vm381_vm0, %v2889_v41  ;;  %v2866_v28 = vsel %vm2851_vm2, %v2849_v11, %v4745_v16  ;;  %v2867_v52 = vsel %vm2851_vm2, %v2850_v33, %v4746_v0  ;;  %v5128_v33 = vld [vmem:[%s5326_s29 + $0x28] sm:$0xff] }
 0xd35   : > { %4476 = vmatmul.mubr.msk.bf16.gmra.mrb[68].mxu1 %vm381_vm0, %v2890_v45  ;;  %v2864_v14 = vsel %vm2851_vm2, %v2847_v56, %v4740_v35  ;;  %v2865_v2 = vsel %vm2851_vm2, %v2848_v26, %v4741_v55 }
 0xd58   : > { %v4754_v6 = vpop.permute.xlu1 %4753 }
 0xd59   : > { %v4756_v20 = vunpack.i.h.bf16 %v4754_v6  ;;  %v4755_v5 = vunpack.i.l.bf16 %v4754_v6  ;;  %v4749_v24 = vpop.permute.xlu0 %4748  ;;  %v5129_v6 = vld [vmem:[%s5326_s29 + $0x30] sm:$0xff] }
 0xd5a   : > { %v4751_v31 = vunpack.i.h.bf16 %v4749_v24  ;;  %v4750_v39 = vunpack.i.l.bf16 %v4749_v24 }
 0xd5b   : > { %v2884_v17 = vsel %vm2868_vm3, %v2867_v52, %v4756_v20  ;;  %v2883_v10 = vsel %vm2868_vm3, %v2866_v28, %v4755_v5  ;;  %v5130_v5 = vld [vmem:[%s5326_s29 + $0x20] sm:$0xff] }
 0xd5c   : > { %v2892_v19 = vpack.c.bf16 %v2884_v17, %v2883_v10  ;;  %v2881_v63 = vsel %vm2868_vm3, %v2864_v14, %v4750_v39  ;;  %v2882_v59 = vsel %vm2868_vm3, %v2865_v2, %v4751_v31  ;;  %v5131_v17 = vld [vmem:[%s5326_s29 + $0x58] sm:$0xff] }
 0xd5d   : > { %v2891_v50 = vpack.c.bf16 %v2882_v59, %v2881_v63 }
 0xd5f   : > { %4479 = vmatprep.mubr.msk.bf16.mxu1 %vm381_vm0, %v2891_v50 }
 0xd60   : > { %4480 = vmatmul.mubr.msk.bf16.gmra.mrb[72].mxu1 %vm381_vm0, %v2892_v19 }
 0xdf8   : > { %v4469_v23 = vpop.f32.mrb[60].mxu1 }
 0xdf9   : > { %v2983_v12 = vadd.f32 %v4469_v23, %v6803_v32  ;;  %v2974_v38 = vpop.f32.mrb[61].mxu1 }
 0xdfa   : > { %v2975_v27 = vadd.f32 %v6803_v32, %v2974_v38  ;;  %v4470_v61 = vpop.f32.mrb[62].mxu1 }
 0xdfb   : > { %v6808_v47 = vadd.f32 %v5123_v40, %v2983_v12  ;;  %v2986_v34 = vadd.f32 %v4470_v61, %v6803_v32  ;;  %v2977_v36 = vpop.f32.mrb[63].mxu1  ;;  %v5132_v12 = vld [vmem:[%s5326_s29 + $0x48] sm:$0xff]  ;;  %v5133_v61 = vld [vmem:[%s5326_s29 + $0x50] sm:$0xff] }
 0xdfc   : > { %v2978_v25 = vadd.f32 %v6803_v32, %v2977_v36  ;;  %v6813_v37 = vadd.f32 %v5124_v22, %v2975_v27 }
 0xdfd   : > { %v6816_v48 = vadd.f32 %v5125_v18, %v2986_v34  ;;  %v3059_v44 = vsel %vm381_vm0, %v6808_v47, 0.0  ;;  %v3119_v41 = vmul.f32 %v6808_v47, %v6808_v47  ;;  %v5134_v18 = vld [vmem:[%s5326_s29 + $0x40] sm:$0xff] }
 0xdfe   : > { %v6821_v1 = vadd.f32 %v5126_v49, %v2978_v25  ;;  %3060 = vadd.xlane.f32.xlu0 %v3059_v44  ;;  %v3053_v53 = vsel %vm381_vm0, %v6813_v37, 0.0  ;;  %v3117_v55 = vmul.f32 %v6813_v37, %v6813_v37 }
 0xdff   : > { %v3120_v8 = vmul.f32 %v6816_v48, %v6816_v48  ;;  %v3062_v62 = vsel %vm381_vm0, %v6816_v48, 0.0  ;;  %v3139_v16 = vsel %vm381_vm0, %v3119_v41, 0.0 }
 0xe00   : > { %v4473_v51 = vpop.f32.mrb[64].mxu1  ;;  %v3056_v58 = vsel %vm381_vm0, %v6821_v1, 0.0  ;;  %v3118_v60 = vmul.f32 %v6821_v1, %v6821_v1  ;;  %v3133_v15 = vsel %vm381_vm0, %v3117_v55, 0.0 }
 0xe01   : > { %v2990_v4 = vpop.f32.mrb[65].mxu1  ;;  %3057 = vadd.xlane.f32.xlu1 %v3056_v58  ;;  %v3142_v45 = vsel %vm381_vm0, %v3120_v8, 0.0  ;;  %v2999_v30 = vadd.f32 %v4473_v51, %v6803_v32 }
 0xe02   : > { %v4474_v3 = vpop.f32.mrb[66].mxu1  ;;  %3054 = vadd.xlane.f32.xlu0 %v3053_v53  ;;  %v3136_v43 = vsel %vm381_vm0, %v3118_v60, 0.0  ;;  %v2991_v26 = vadd.f32 %v6803_v32, %v2990_v4  ;;  %v4762_v60 = vld [vmem:[%s7204_s6 + $0x8] sm:$0xff]  }
 0xe03   : > { %v2993_v21 = vpop.f32.mrb[67].mxu1  ;;  %v3002_v29 = vadd.f32 %v4474_v3, %v6803_v32  ;;  %v6852_v42 = vadd.f32 %v5129_v6, %v2999_v30 }
 0xe04   : > { %v2994_v57 = vadd.f32 %v6803_v32, %v2993_v21  ;;  %v6861_v24 = vadd.f32 %v5130_v5, %v2991_v26  ;;  %v5138_v26 = vld [vmem:[%s5326_s29 + $0x68] sm:$0xff] }
 0xe05   : > { %3143 = vadd.xlane.f32.xlu1 %v3142_v45  ;;  %v6838_v13 = vadd.f32 %v5127_v54, %v3002_v29  ;;  %v3071_v28 = vsel %vm381_vm0, %v6852_v42, 0.0  ;;  %v3123_v2 = vmul.f32 %v6852_v42, %v6852_v42  ;;  %v4761_v29 = vld [vmem:[%s7204_s6] sm:$0xff]  }
 0xe06   : > { %3063 = vadd.xlane.f32.xlu0 %v3062_v62  ;;  %v6847_v7 = vadd.f32 %v5128_v33, %v2994_v57  ;;  %v3065_v14 = vsel %vm381_vm0, %v6861_v24, 0.0  ;;  %v3121_v23 = vmul.f32 %v6861_v24, %v6861_v24  ;;  %4483 = vmatprep.subr.bf16.mxu0 %v4761_v29  ;;  %v5137_v33 = vld [vmem:[%s5326_s29 + $0x78] sm:$0xff] }
 0xe07   : > { %v3074_v11 = vsel %vm381_vm0, %v6838_v13, 0.0  ;;  %v3124_v20 = vmul.f32 %v6838_v13, %v6838_v13  ;;  %v3151_v50 = vsel %vm381_vm0, %v3123_v2, 0.0  ;;  %4484 = vmatpush3.bf16.msra.mxu0 %v4761_v29 }
 0xe08   : > { %v4477_v9 = vpop.f32.mrb[68].mxu1  ;;  %v3068_v56 = vsel %vm381_vm0, %v6847_v7, 0.0  ;;  %v3122_v39 = vmul.f32 %v6847_v7, %v6847_v7  ;;  %v3145_v36 = vsel %vm381_vm0, %v3121_v23, 0.0  ;;  %4485 = vmatprep.subr.bf16.mxu0 %v4762_v60 }
 0xe09   : > { %v3006_v0 = vpop.f32.mrb[69].mxu1  ;;  %3137 = vadd.xlane.f32.xlu1 %v3136_v43  ;;  %v3154_v31 = vsel %vm381_vm0, %v3124_v20, 0.0  ;;  %v3015_v59 = vadd.f32 %v4477_v9, %v6803_v32  ;;  %v5135_v43 = vld [vmem:[%s5326_s29 + $0x70] sm:$0xff] }
 0xe0a   : > { %v4478_v35 = vpop.f32.mrb[70].mxu1  ;;  %3140 = vadd.xlane.f32.xlu0 %v3139_v16  ;;  %v3148_v63 = vsel %vm381_vm0, %v3122_v39, 0.0  ;;  %v3007_v34 = vadd.f32 %v6803_v32, %v3006_v0 }
 0xe0b   : > { %v3009_v46 = vpop.f32.mrb[71].mxu1  ;;  %v3018_v52 = vadd.f32 %v4478_v35, %v6803_v32  ;;  %v6888_v40 = vadd.f32 %v5133_v61, %v3015_v59  ;;  %4486 = vmatpush3.bf16.msra.mxu0 %v4762_v60  ;;  %v5136_v35 = vld [vmem:[%s5326_s29 + $0x60] sm:$0xff]  ;;  %s5217_s29 = smov [#allocation2]  }
 0xe0c   : > { %v3010_v19 = vadd.f32 %v6803_v32, %v3009_v46  ;;  %v6897_v44 = vadd.f32 %v5134_v18, %v3007_v34  ;;  %s5143_s30 = sshll.u32 %s5217_s29, 4  ;;  %s5144_s30 = int_to_ptr.vmem [resolvable:$false] %s5143_s30 }
 0xe0d   : > { %3075 = vadd.xlane.f32.xlu1 %v3074_v11  ;;  %v6874_v10 = vadd.f32 %v5131_v17, %v3018_v52  ;;  %v3083_v49 = vsel %vm381_vm0, %v6888_v40, 0.0  ;;  %v3127_v4 = vmul.f32 %v6888_v40, %v6888_v40  ;;  %s5145_s12 = scalar_lea.vmem %s5144_s30, 4096  ;;  %p5146_p0 = scmp.lt.s32.totalorder %s7148_s18, %s5144_s30 }
 0xe0e   : > { %3134 = vadd.xlane.f32.xlu0 %v3133_v15  ;;  %v6883_v38 = vadd.f32 %v5132_v12, %v3010_v19  ;;  %v3077_v8 = vsel %vm381_vm0, %v6897_v44, 0.0  ;;  %v3125_v21 = vmul.f32 %v6897_v44, %v6897_v44  ;;  %p5147_p1 = scmp.lt.s32.totalorder %s5145_s12, %s5139_s28 }
 0xe0f   : > { %v3086_v27 = vsel %vm381_vm0, %v6874_v10, 0.0  ;;  %v3128_v22 = vmul.f32 %v6874_v10, %v6874_v10  ;;  %v3163_v3 = vsel %vm381_vm0, %v3127_v4, 0.0 }
 0xe10   : > { %v3080_v25 = vsel %vm381_vm0, %v6883_v38, 0.0  ;;  %v3126_v58 = vmul.f32 %v6883_v38, %v6883_v38  ;;  %v3157_v45 = vsel %vm381_vm0, %v3125_v21, 0.0  ;;  %p5148_p2 = por %p5147_p1, %p5146_p0 }
 0xe11   : > { %3069 = vadd.xlane.f32.xlu1 %v3068_v56  ;;  %v3166_v51 = vsel %vm381_vm0, %v3128_v22, 0.0 }
 0xe12   : > { %3072 = vadd.xlane.f32.xlu0 %v3071_v28  ;;  %v3160_v53 = vsel %vm381_vm0, %v3126_v58, 0.0  ;;  %p5149_p3 = pnand %p5148_p2, %p5142_p13 }
 0xe15   : > { %3155 = vadd.xlane.f32.xlu1 %v3154_v31 }
 0xe16   : > { %3066 = vadd.xlane.f32.xlu0 %v3065_v14 }
 0xe19   : > { %3149 = vadd.xlane.f32.xlu1 %v3148_v63 }
 0xe1a   : > { %3152 = vadd.xlane.f32.xlu0 %v3151_v50 }
 0xe1d   : > { %3087 = vadd.xlane.f32.xlu1 %v3086_v27 }
 0xe1e   : > { %3146 = vadd.xlane.f32.xlu0 %v3145_v36 }
 0xe21   : > { %3081 = vadd.xlane.f32.xlu1 %v3080_v25 }
 0xe22   : > { %3084 = vadd.xlane.f32.xlu0 %v3083_v49 }
 0xe25   : > { %3167 = vadd.xlane.f32.xlu1 %v3166_v51 }
 0xe26   : > { %3078 = vadd.xlane.f32.xlu0 %v3077_v8 }
 0xe29   : > { %3161 = vadd.xlane.f32.xlu1 %v3160_v53 }
 0xe2a   : > { %3164 = vadd.xlane.f32.xlu0 %v3163_v3 }
 0xe2e   : > { %3158 = vadd.xlane.f32.xlu0 %v3157_v45 }
 0xe33   : > { %v4481_v62 = vpop.f32.mrb[72].mxu1 }
 0xe34   : > { %v3031_v41 = vadd.f32 %v4481_v62, %v6803_v32  ;;  %v3022_v54 = vpop.f32.mrb[73].mxu1 }
 0xe35   : > { %v3023_v57 = vadd.f32 %v6803_v32, %v3022_v54  ;;  %v4482_v9 = vpop.f32.mrb[74].mxu1 }
 0xe36   : > { %v6922_v30 = vadd.f32 %v5135_v43, %v3031_v41  ;;  %v3034_v0 = vadd.f32 %v4482_v9, %v6803_v32  ;;  %v3025_v16 = vpop.f32.mrb[75].mxu1 }
 0xe37   : > { %v3026_v55 = vadd.f32 %v6803_v32, %v3025_v16  ;;  %v6927_v46 = vadd.f32 %v5136_v35, %v3023_v57 }
 0xe38   : > { %v6930_v11 = vadd.f32 %v5137_v33, %v3034_v0  ;;  %v3095_v6 = vsel %vm381_vm0, %v6922_v30, 0.0  ;;  %v3131_v31 = vmul.f32 %v6922_v30, %v6922_v30 }
 0xe39   : > { %3096 = vadd.xlane.f32.xlu0 %v3095_v6  ;;  %v6935_v15 = vadd.f32 %v5138_v26, %v3026_v55  ;;  %v3089_v32 = vsel %vm381_vm0, %v6927_v46, 0.0  ;;  %v3129_v20 = vmul.f32 %v6927_v46, %v6927_v46 }
 0xe3a   : > { %v3098_v56 = vsel %vm381_vm0, %v6930_v11, 0.0  ;;  %v3132_v14 = vmul.f32 %v6930_v11, %v6930_v11  ;;  %v3175_v2 = vsel %vm381_vm0, %v3131_v31, 0.0 }
 0xe3b   : > { %3099 = vadd.xlane.f32.xlu1 %v3098_v56  ;;  %v3092_v5 = vsel %vm381_vm0, %v6935_v15, 0.0  ;;  %v3130_v28 = vmul.f32 %v6935_v15, %v6935_v15  ;;  %v3169_v52 = vsel %vm381_vm0, %v3129_v20, 0.0 }
 0xe3c   : > { %v3178_v17 = vsel %vm381_vm0, %v3132_v14, 0.0 }
 0xe3d   : > { %3090 = vadd.xlane.f32.xlu0 %v3089_v32  ;;  %v3172_v39 = vsel %vm381_vm0, %v3130_v28, 0.0 }
 0xe3f   : > { %3093 = vadd.xlane.f32.xlu1 %v3092_v5 }
 0xe41   : > { %3170 = vadd.xlane.f32.xlu0 %v3169_v52 }
 0xe43   : > { %3173 = vadd.xlane.f32.xlu1 %v3172_v39 }
 0xe45   : > { %3176 = vadd.xlane.f32.xlu0 %v3175_v2 }
 0xe47   : > { %3179 = vadd.xlane.f32.xlu1 %v3178_v17 }
 0xe8b   : > { %v3061_v19 = vpop.xlane.xlu0 %3060 }
 0xe8c   : > { %v3103_v27 = vmul.f32 0.03125, %v3061_v19 }
 0xe8e   : > { %v3058_v63 = vpop.xlane.xlu1 %3057  ;;  %v3199_v51 = vmul.f32 %v3103_v27, %v3103_v27 }
 0xe8f   : > { %v3055_v59 = vpop.xlane.xlu0 %3054  ;;  %v6955_v23 = vmul.f32 0.03125, %v3058_v63  ;;  %v3231_v63 = vsub.f32 %v6808_v47, %v3103_v27 }
 0xe90   : > { %v3101_v58 = vmul.f32 0.03125, %v3055_v59 }
 0xe91   : > { %v3198_v25 = vmul.f32 %v6955_v23, %v6955_v23 }
 0xe92   : > { %v3144_v50 = vpop.xlane.xlu1 %3143  ;;  %v3197_v45 = vmul.f32 %v3101_v58, %v3101_v58 }
 0xe93   : > { %v3064_v12 = vpop.xlane.xlu0 %3063  ;;  %v3184_v22 = vmul.f32 0.03125, %v3144_v50 }
 0xe94   : > { %v6957_v61 = vmul.f32 0.03125, %v3064_v12 }
 0xe96   : > { %v3200_v34 = vmul.f32 %v6957_v61, %v6957_v61  ;;  %v3138_v36 = vpop.xlane.xlu1 %3137 }
 0xe97   : > { %v3182_v18 = vmul.f32 0.03125, %v3138_v36  ;;  %v3141_v49 = vpop.xlane.xlu0 %3140  ;;  %v3229_v36 = vsub.f32 %v6813_v37, %v3101_v58 }
 0xe98   : > { %v3183_v8 = vmul.f32 0.03125, %v3141_v49  ;;  %v3216_v4 = vsub.f32 %v3184_v22, %v3200_v34  ;;  %v3230_v34 = vsub.f32 %v6821_v1, %v6955_v23 }
 0xe99   : > { %v3214_v53 = vsub.f32 %v3182_v18, %v3198_v25  ;;  %v3232_v25 = vsub.f32 %v6816_v48, %v6957_v61 }
 0xe9a   : > { %v3215_v3 = vsub.f32 %v3183_v8, %v3199_v51  ;;  %v3076_v21 = vpop.xlane.xlu1 %3075  ;;  %v3248_v54 = vadd.f32 1e-05, %v3216_v4 }
 0xe9b   : > { %v3135_v29 = vpop.xlane.xlu0 %3134  ;;  %v3246_v60 = vadd.f32 1e-05, %v3214_v53  ;;  %v6963_v55 = vmul.f32 0.03125, %v3076_v21 }
 0xe9c   : > { %v3247_v62 = vadd.f32 1e-05, %v3215_v3  ;;  %v3181_v41 = vmul.f32 0.03125, %v3135_v29 }
 0xe9d   : > { %v3204_v32 = vmul.f32 %v6963_v55, %v6963_v55 }
 0xe9e   : > { %v3213_v57 = vsub.f32 %v3181_v41, %v3197_v45  ;;  %v3070_v9 = vpop.xlane.xlu1 %3069  ;;  %5059 = vrsqrt.f32 %v3247_v62 }
 0xe9f   : > { %v3073_v43 = vpop.xlane.xlu0 %3072  ;;  %5061 = vrsqrt.f32 %v3246_v60  ;;  %v6965_v35 = vmul.f32 0.03125, %v3070_v9 }
 0xea0   : > { %v3245_v0 = vadd.f32 1e-05, %v3213_v57  ;;  %5063 = vrsqrt.f32 %v3248_v54  ;;  %v6967_v6 = vmul.f32 0.03125, %v3073_v43 }
 0xea1   : > { %v3202_v20 = vmul.f32 %v6965_v35, %v6965_v35 }
 0xea2   : > { %5065 = vrsqrt.f32 %v3245_v0  ;;  %v3156_v16 = vpop.xlane.xlu1 %3155  ;;  %v3203_v31 = vmul.f32 %v6967_v6, %v6967_v6 }
 0xea3   : > { %v3067_v33 = vpop.xlane.xlu0 %3066  ;;  %v3188_v26 = vmul.f32 0.03125, %v3156_v16 }
 0xea4   : > { %v6973_v5 = vmul.f32 0.03125, %v3067_v33 }
 0xea5   : > { %v3220_v2 = vsub.f32 %v3188_v26, %v3204_v32 }
 0xea6   : > { %v3150_v56 = vpop.xlane.xlu1 %3149  ;;  %v3201_v22 = vmul.f32 %v6973_v5, %v6973_v5 }
 0xea7   : > { %v3186_v28 = vmul.f32 0.03125, %v3150_v56  ;;  %v3153_v52 = vpop.xlane.xlu0 %3152  ;;  %v3252_v53 = vadd.f32 1e-05, %v3220_v2 }
 0xea8   : > { %v3187_v39 = vmul.f32 0.03125, %v3153_v52  ;;  %v5060_v14 = vpop.eup %5059 }
 0xea9   : > { %v3218_v17 = vsub.f32 %v3186_v28, %v3202_v20  ;;  %v5062_v19 = vpop.eup %5061  ;;  %v3279_v27 = vmul.f32 %v5060_v14, %v3231_v63 }
 0xeaa   : > { %v3219_v59 = vsub.f32 %v3187_v39, %v3203_v31  ;;  %v3088_v50 = vpop.xlane.xlu1 %3087  ;;  %v5064_v12 = vpop.eup %5063  ;;  %v3278_v21 = vmul.f32 %v5062_v19, %v3230_v34 }
 0xeab   : > { %v3147_v18 = vpop.xlane.xlu0 %3146  ;;  %v3250_v51 = vadd.f32 1e-05, %v3218_v17  ;;  %v3280_v29 = vmul.f32 %v5064_v12, %v3232_v25  ;;  %v3112_v54 = vmul.f32 0.03125, %v3088_v50  ;;  %v3235_v17 = vsub.f32 %v6852_v42, %v6967_v6 }
 0xeac   : > { %v5066_v49 = vpop.eup %5065  ;;  %v3251_v8 = vadd.f32 1e-05, %v3219_v59  ;;  %v3185_v4 = vmul.f32 0.03125, %v3147_v18  ;;  %v3236_v59 = vsub.f32 %v6838_v13, %v6963_v55  ;;  %v3234_v50 = vsub.f32 %v6847_v7, %v6965_v35 }
 0xead   : > { %v3277_v3 = vmul.f32 %v5066_v49, %v3229_v36  ;;  %v3294_v62 = vpack.c.bf16 %v3280_v29, %v3279_v27  ;;  %v3208_v33 = vmul.f32 %v3112_v54, %v3112_v54  ;;  %v3233_v12 = vsub.f32 %v6861_v24, %v6973_v5 }
 0xeae   : > { %v3217_v45 = vsub.f32 %v3185_v4, %v3201_v22  ;;  %v3082_v23 = vpop.xlane.xlu1 %3081  ;;  %5067 = vrsqrt.f32 %v3251_v8 }
 0xeaf   : > { %v3085_v58 = vpop.xlane.xlu0 %3084  ;;  %v3293_v60 = vpack.c.bf16 %v3278_v21, %v3277_v3  ;;  %5069 = vrsqrt.f32 %v3250_v51  ;;  %v3110_v57 = vmul.f32 0.03125, %v3082_v23 }
 0xeb0   : > { %v3249_v61 = vadd.f32 1e-05, %v3217_v45  ;;  %5071 = vrsqrt.f32 %v3252_v53  ;;  %v3111_v43 = vmul.f32 0.03125, %v3085_v58 }
 0xeb1   : > { %4487 = vmatprep.mubr.msk.bf16.mxu0 %vm381_vm0, %v3293_v60  ;;  %v3206_v26 = vmul.f32 %v3110_v57, %v3110_v57  ;;  %v3238_v60 = vsub.f32 %v6883_v38, %v3110_v57 }
 0xeb2   : > { %5073 = vrsqrt.f32 %v3249_v61  ;;  %v3168_v41 = vpop.xlane.xlu1 %3167  ;;  %4488 = vmatmul.mubr.msk.bf16.vlgmr.msra.gmra.mrb[84].mxu0 %vm381_vm0, %v3294_v62  ;;  %v3207_v28 = vmul.f32 %v3111_v43, %v3111_v43  ;;  %v3239_v23 = vsub.f32 %v6888_v40, %v3111_v43 }
 0xeb3   : > { %v3079_v9 = vpop.xlane.xlu0 %3078  ;;  %v3192_v0 = vmul.f32 0.03125, %v3168_v41 }
 0xeb4   : > { %v3109_v56 = vmul.f32 0.03125, %v3079_v9  ;;  %v3240_v9 = vsub.f32 %v6874_v10, %v3112_v54 }
 0xeb5   : > { %v3224_v39 = vsub.f32 %v3192_v0, %v3208_v33 }
 0xeb6   : > { %v3162_v16 = vpop.xlane.xlu1 %3161  ;;  %v3205_v34 = vmul.f32 %v3109_v56, %v3109_v56  ;;  %v3237_v61 = vsub.f32 %v6897_v44, %v3109_v56 }
 0xeb7   : > { %v3190_v32 = vmul.f32 0.03125, %v3162_v16  ;;  %v3165_v20 = vpop.xlane.xlu0 %3164  ;;  %v3256_v8 = vadd.f32 1e-05, %v3224_v39 }
 0xeb8   : > { %v3191_v52 = vmul.f32 0.03125, %v3165_v20  ;;  %v5068_v31 = vpop.eup %5067 }
 0xeb9   : > { %v3222_v14 = vsub.f32 %v3190_v32, %v3206_v26  ;;  %v5070_v2 = vpop.eup %5069  ;;  %v3283_v51 = vmul.f32 %v5068_v31, %v3235_v17 }
 0xeba   : > { %v3223_v19 = vsub.f32 %v3191_v52, %v3207_v28  ;;  %v5072_v63 = vpop.eup %5071  ;;  %v3282_v4 = vmul.f32 %v5070_v2, %v3234_v50 }
 0xebb   : > { %v3159_v36 = vpop.xlane.xlu0 %3158  ;;  %v3254_v22 = vadd.f32 1e-05, %v3222_v14  ;;  %v3284_v53 = vmul.f32 %v5072_v63, %v3236_v59 }
 0xebc   : > { %v5074_v25 = vpop.eup %5073  ;;  %v3255_v18 = vadd.f32 1e-05, %v3223_v19  ;;  %v3189_v49 = vmul.f32 0.03125, %v3159_v36 }
 0xebd   : > { %v3281_v6 = vmul.f32 %v5074_v25, %v3233_v12  ;;  %v3296_v35 = vpack.c.bf16 %v3284_v53, %v3283_v51 }
 0xebe   : > { %v3221_v27 = vsub.f32 %v3189_v49, %v3205_v34  ;;  %5075 = vrsqrt.f32 %v3255_v18 }
 0xebf   : > { %v3295_v55 = vpack.c.bf16 %v3282_v4, %v3281_v6  ;;  %5077 = vrsqrt.f32 %v3254_v22 }
 0xec0   : > { %v3253_v3 = vadd.f32 1e-05, %v3221_v27  ;;  %5079 = vrsqrt.f32 %v3256_v8 }
 0xec1   : > { %4491 = vmatprep.mubr.msk.bf16.mxu0 %vm381_vm0, %v3295_v55 }
 0xec2   : > { %5081 = vrsqrt.f32 %v3253_v3  ;;  %4492 = vmatmul.mubr.msk.bf16.gmra.mrb[88].mxu0 %vm381_vm0, %v3296_v35 }
 0xec6   : > { %v3097_v5 = vpop.xlane.xlu0 %3096 }
 0xec7   : > { %v3115_v39 = vmul.f32 0.03125, %v3097_v5 }
 0xec8   : > { %v5076_v21 = vpop.eup %5075  ;;  %v3100_v29 = vpop.xlane.xlu1 %3099 }
 0xec9   : > { %v5078_v45 = vpop.eup %5077  ;;  %v3287_v16 = vmul.f32 %v5076_v21, %v3239_v23  ;;  %v3116_v57 = vmul.f32 0.03125, %v3100_v29  ;;  %v3211_v59 = vmul.f32 %v3115_v39, %v3115_v39  ;;  %v3243_v21 = vsub.f32 %v6922_v30, %v3115_v39 }
 0xeca   : > { %v5080_v58 = vpop.eup %5079  ;;  %v3091_v62 = vpop.xlane.xlu0 %3090  ;;  %v3286_v32 = vmul.f32 %v5078_v45, %v3238_v60 }
 0xecb   : > { %v3113_v0 = vmul.f32 0.03125, %v3091_v62  ;;  %v3288_v28 = vmul.f32 %v5080_v58, %v3240_v9  ;;  %v3212_v36 = vmul.f32 %v3116_v57, %v3116_v57  ;;  %v3244_v29 = vsub.f32 %v6930_v11, %v3116_v57  ;;  %v4763_v62 = vld [vmem:[%s7206_s8] sm:$0xff]   ;;  %v4765_v9 = vld [vmem:[%s7206_s8 + $0x10] sm:$0xff]  }
 0xecc   : > { %v5082_v41 = vpop.eup %5081  ;;  %v3094_v33 = vpop.xlane.xlu1 %3093  ;;  %4503 = vmatprep.subr.bf16.mxu1 %v4763_v62 }
 0xecd   : > { %v3285_v26 = vmul.f32 %v5082_v41, %v3237_v61  ;;  %v3114_v20 = vmul.f32 0.03125, %v3094_v33  ;;  %v3209_v43 = vmul.f32 %v3113_v0, %v3113_v0  ;;  %v3298_v2 = vpack.c.bf16 %v3288_v28, %v3287_v16  ;;  %4504 = vmatpush3.bf16.msra.mxu1 %v4763_v62  ;;  %v4764_v41 = vld [vmem:[%s7206_s8 + $0x8] sm:$0xff]   ;;  %v4767_v16 = vld [vmem:[%s7206_s8 + $0x20] sm:$0xff]  }
 0xece   : > { %v3171_v52 = vpop.xlane.xlu0 %3170  ;;  %v3241_v27 = vsub.f32 %v6927_v46, %v3113_v0  ;;  %4505 = vmatprep.subr.bf16.mxu1 %v4764_v41  ;;  %v4766_v0 = vld [vmem:[%s7206_s8 + $0x18] sm:$0xff]   ;;  %v4768_v33 = vld [vmem:[%s7206_s8 + $0x28] sm:$0xff]  }
 0xecf   : > { %v3297_v31 = vpack.c.bf16 %v3286_v32, %v3285_v26  ;;  %v3193_v14 = vmul.f32 0.03125, %v3171_v52  ;;  %v3210_v56 = vmul.f32 %v3114_v20, %v3114_v20  ;;  %v3242_v53 = vsub.f32 %v6935_v15, %v3114_v20  ;;  %v4769_v26 = vld [vmem:[%s7206_s8 + $0x30] sm:$0xff]   ;;  %v4770_v32 = vld [vmem:[%s7206_s8 + $0x38] sm:$0xff]   ;;  %v7036_v20 = vld [vmem:[%s7205_s7] ss:$0 sm:$0xff] }
 0xed0   : > { %v3174_v17 = vpop.xlane.xlu1 %3173 }
 0xed1   : > { %4495 = vmatprep.mubr.msk.bf16.mxu0 %vm381_vm0, %v3297_v31  ;;  %v3225_v19 = vsub.f32 %v3193_v14, %v3209_v43  ;;  %v3194_v54 = vmul.f32 0.03125, %v3174_v17  ;;  %4506 = vmatpush3.bf16.msra.mxu1 %v4764_v41 }
 0xed2   : > { %4496 = vmatmul.mubr.msk.bf16.gmra.mrb[92].mxu0 %vm381_vm0, %v3298_v2  ;;  %v3177_v63 = vpop.xlane.xlu0 %3176  ;;  %4507 = vmatprep.subr.bf16.mxu1 %v4765_v9 }
 0xed3   : > { %v3257_v50 = vadd.f32 1e-05, %v3225_v19  ;;  %v3226_v12 = vsub.f32 %v3194_v54, %v3210_v56  ;;  %v3195_v34 = vmul.f32 0.03125, %v3177_v63 }
 0xed4   : > { %v3180_v25 = vpop.xlane.xlu1 %3179 }
 0xed5   : > { %5083 = vrsqrt.f32 %v3257_v50  ;;  %v3258_v22 = vadd.f32 1e-05, %v3226_v12  ;;  %v3227_v18 = vsub.f32 %v3195_v34, %v3211_v59  ;;  %v3196_v49 = vmul.f32 0.03125, %v3180_v25  ;;  %4508 = vmatpush3.bf16.msra.mxu1 %v4765_v9 }
 0xed6   : > { %4509 = vmatprep.subr.bf16.mxu1 %v4766_v0 }
 0xed7   : > { %5085 = vrsqrt.f32 %v3258_v22  ;;  %v3259_v51 = vadd.f32 1e-05, %v3227_v18  ;;  %v3228_v8 = vsub.f32 %v3196_v49, %v3212_v36 }
 0xed9   : > { %5087 = vrsqrt.f32 %v3259_v51  ;;  %v3260_v6 = vadd.f32 1e-05, %v3228_v8  ;;  %4510 = vmatpush3.bf16.msra.mxu1 %v4766_v0 }
 0xeda   : > { %4511 = vmatprep.subr.bf16.mxu1 %v4767_v16 }
 0xedb   : > { %5089 = vrsqrt.f32 %v3260_v6 }
 0xedd   : > { %4512 = vmatpush3.bf16.msra.mxu1 %v4767_v16 }
 0xede   : > { %4513 = vmatprep.subr.bf16.mxu1 %v4768_v33 }
 0xedf   : > { %v5084_v4 = vpop.eup %5083 }
 0xee0   : > { %v3289_v3 = vmul.f32 %v5084_v4, %v3241_v27 }
 0xee1   : > { %v5086_v55 = vpop.eup %5085  ;;  %4514 = vmatpush3.bf16.msra.mxu1 %v4768_v33 }
 0xee2   : > { %v3290_v35 = vmul.f32 %v5086_v55, %v3242_v53  ;;  %4515 = vmatprep.subr.bf16.mxu1 %v4769_v26 }
 0xee3   : > { %v5088_v5 = vpop.eup %5087 }
 0xee4   : > { %v3299_v45 = vpack.c.bf16 %v3290_v35, %v3289_v3  ;;  %v3291_v58 = vmul.f32 %v5088_v5, %v3243_v21 }
 0xee5   : > { %v5090_v23 = vpop.eup %5089  ;;  %4516 = vmatpush3.bf16.msra.mxu1 %v4769_v26 }
 0xee6   : > { %4499 = vmatprep.mubr.msk.bf16.mxu0 %vm381_vm0, %v3299_v45  ;;  %v3292_v60 = vmul.f32 %v5090_v23, %v3244_v29  ;;  %4517 = vmatprep.subr.bf16.mxu1 %v4770_v32 }
 0xee8   : > { %v3300_v61 = vpack.c.bf16 %v3292_v60, %v3291_v58 }
 0xee9   : > { %4518 = vmatpush3.bf16.msra.mxu1 %v4770_v32 }
 0xeea   : > { %4500 = vmatmul.mubr.msk.bf16.gmra.mrb[96].mxu0 %vm381_vm0, %v3300_v61 }
 0xf85   : > { %v4489_v28 = vpop.f32.mrb[84].mxu0 }
 0xf86   : > { %v3391_v52 = vadd.f32 %v4489_v28, %v7036_v20  ;;  %v3382_v31 = vpop.f32.mrb[85].mxu0 }
 0xf87   : > { %v3383_v39 = vadd.f32 %v7036_v20, %v3382_v31  ;;  %v4490_v43 = vpop.f32.mrb[86].mxu0 }
 0xf88   : > { %v3463_v14 = vmul.f32 0.044715, %v3391_v52  ;;  %v3394_v2 = vadd.f32 %v4490_v43, %v7036_v20  ;;  %v3385_v57 = vpop.f32.mrb[87].mxu0  ;;  %v3447_v32 = vmul.f32 0.5, %v3391_v52 }
 0xf89   : > { %v3461_v17 = vmul.f32 0.044715, %v3383_v39  ;;  %v3386_v56 = vadd.f32 %v7036_v20, %v3385_v57 }
 0xf8a   : > { %v3479_v19 = vmul.f32 %v3463_v14, %v3391_v52  ;;  %v3464_v54 = vmul.f32 0.044715, %v3394_v2 }
 0xf8b   : > { %v3477_v63 = vmul.f32 %v3461_v17, %v3383_v39  ;;  %v3462_v59 = vmul.f32 0.044715, %v3386_v56  ;;  %v3445_v17 = vmul.f32 0.5, %v3383_v39 }
 0xf8c   : > { %v3495_v50 = vmul.f32 %v3479_v19, %v3391_v52  ;;  %v3480_v12 = vmul.f32 %v3464_v54, %v3394_v2 }
 0xf8d   : > { %v3493_v34 = vmul.f32 %v3477_v63, %v3383_v39  ;;  %v3478_v36 = vmul.f32 %v3462_v59, %v3386_v56  ;;  %v3448_v59 = vmul.f32 0.5, %v3394_v2 }
 0xf8e   : > { %v3511_v25 = vadd.f32 %v3495_v50, %v3391_v52  ;;  %v3496_v22 = vmul.f32 %v3480_v12, %v3394_v2  ;;  %v3446_v52 = vmul.f32 0.5, %v3386_v56 }
 0xf8f   : > { %v3494_v18 = vmul.f32 %v3478_v36, %v3386_v56  ;;  %v3509_v49 = vadd.f32 %v3493_v34, %v3383_v39 }
 0xf90   : > { %v3527_v51 = vmul.f32 0.7978846, %v3511_v25  ;;  %v3512_v8 = vadd.f32 %v3496_v22, %v3394_v2 }
 0xf91   : > { %v3510_v6 = vadd.f32 %v3494_v18, %v3386_v56  ;;  %v3525_v4 = vmul.f32 0.7978846, %v3509_v49 }
 0xf92   : > { %5091 = vtanh.f32 %v3527_v51  ;;  %v3528_v27 = vmul.f32 0.7978846, %v3512_v8 }
 0xf93   : > { %v3526_v53 = vmul.f32 0.7978846, %v3510_v6  ;;  %5093 = vtanh.f32 %v3525_v4 }
 0xf94   : > { %5095 = vtanh.f32 %v3528_v27 }
 0xf95   : > { %v4493_v55 = vpop.f32.mrb[88].mxu0  ;;  %5097 = vtanh.f32 %v3526_v53 }
 0xf96   : > { %v7043_v3 = vadd.f32 %v4493_v55, %v7036_v20  ;;  %v3398_v35 = vpop.f32.mrb[89].mxu0 }
 0xf97   : > { %v7046_v5 = vadd.f32 %v7036_v20, %v3398_v35  ;;  %v4494_v21 = vpop.f32.mrb[90].mxu0 }
 0xf98   : > { %v3467_v29 = vmul.f32 0.044715, %v7043_v3  ;;  %v7050_v45 = vadd.f32 %v4494_v21, %v7036_v20  ;;  %v3401_v23 = vpop.f32.mrb[91].mxu0 }
 0xf99   : > { %v3465_v58 = vmul.f32 0.044715, %v7046_v5  ;;  %v7054_v60 = vadd.f32 %v7036_v20, %v3401_v23 }
 0xf9a   : > { %v3483_v61 = vmul.f32 %v3467_v29, %v7043_v3  ;;  %v3468_v62 = vmul.f32 0.044715, %v7050_v45 }
 0xf9b   : > { %v3481_v41 = vmul.f32 %v3465_v58, %v7046_v5  ;;  %v3466_v9 = vmul.f32 0.044715, %v7054_v60 }
 0xf9c   : > { %v5092_v0 = vpop.eup %5091  ;;  %v3499_v16 = vmul.f32 %v3483_v61, %v7043_v3  ;;  %v3484_v33 = vmul.f32 %v3468_v62, %v7050_v45 }
 0xf9d   : > { %v5094_v26 = vpop.eup %5093  ;;  %v3497_v28 = vmul.f32 %v3481_v41, %v7046_v5  ;;  %v3482_v31 = vmul.f32 %v3466_v9, %v7054_v60  ;;  %v3559_v43 = vadd.f32 1.0, %v5092_v0 }
 0xf9e   : > { %v5096_v14 = vpop.eup %5095  ;;  %v3500_v57 = vmul.f32 %v3484_v33, %v7050_v45  ;;  %v3557_v19 = vadd.f32 1.0, %v5094_v26  ;;  %v3515_v54 = vadd.f32 %v3499_v16, %v7043_v3 }
 0xf9f   : > { %v5098_v63 = vpop.eup %5097  ;;  %v3498_v50 = vmul.f32 %v3482_v31, %v7054_v60  ;;  %v3560_v12 = vadd.f32 1.0, %v5096_v14  ;;  %v3513_v34 = vadd.f32 %v3497_v28, %v7046_v5  ;;  %v3575_v18 = vmul.f32 %v3559_v43, %v3447_v32 }
 0xfa0   : > { %v3558_v36 = vadd.f32 1.0, %v5098_v63  ;;  %v3516_v25 = vadd.f32 %v3500_v57, %v7050_v45  ;;  %v3531_v22 = vmul.f32 0.7978846, %v3515_v54  ;;  %v3573_v8 = vmul.f32 %v3557_v19, %v3445_v17 }
 0xfa1   : > { %v3576_v49 = vmul.f32 %v3560_v12, %v3448_v59  ;;  %v3514_v51 = vadd.f32 %v3498_v50, %v7054_v60  ;;  %v3529_v39 = vmul.f32 0.7978846, %v3513_v34  ;;  %v3451_v57 = vmul.f32 0.5, %v7043_v3 }
 0xfa2   : > { %v3574_v6 = vmul.f32 %v3558_v36, %v3446_v52  ;;  %v3532_v4 = vmul.f32 0.7978846, %v3516_v25  ;;  %5099 = vtanh.f32 %v3531_v22  ;;  %v3449_v63 = vmul.f32 0.5, %v7046_v5 }
 0xfa3   : > { %v3590_v2 = vpack.c.bf16 %v3576_v49, %v3575_v18  ;;  %v3530_v27 = vmul.f32 0.7978846, %v3514_v51  ;;  %5101 = vtanh.f32 %v3529_v39  ;;  %v3452_v52 = vmul.f32 0.5, %v7050_v45 }
 0xfa4   : > { %v3589_v53 = vpack.c.bf16 %v3574_v6, %v3573_v8  ;;  %5103 = vtanh.f32 %v3532_v4  ;;  %v3450_v22 = vmul.f32 0.5, %v7054_v60 }
 0xfa5   : > { %v4497_v55 = vpop.f32.mrb[92].mxu0  ;;  %5105 = vtanh.f32 %v3530_v27 }
 0xfa6   : > { %v3423_v56 = vadd.f32 %v4497_v55, %v7036_v20  ;;  %v3414_v35 = vpop.f32.mrb[93].mxu0  ;;  %4519 = vmatprep.mubr.bf16.mxu1 %v3589_v53 }
 0xfa7   : > { %v7072_v21 = vadd.f32 %v7036_v20, %v3414_v35  ;;  %v4498_v29 = vpop.f32.mrb[94].mxu0  ;;  %4520 = vmatmul.mubr.bf16.vlgmr.msra.gmra.mrb[76].mxu1 %v3590_v2 }
 0xfa8   : > { %v3471_v23 = vmul.f32 0.044715, %v3423_v56  ;;  %v3426_v58 = vadd.f32 %v4498_v29, %v7036_v20  ;;  %v3417_v61 = vpop.f32.mrb[95].mxu0 }
 0xfa9   : > { %v3469_v62 = vmul.f32 0.044715, %v7072_v21  ;;  %v3418_v41 = vadd.f32 %v7036_v20, %v3417_v61 }
 0xfaa   : > { %v3487_v9 = vmul.f32 %v3471_v23, %v3423_v56  ;;  %v3472_v0 = vmul.f32 0.044715, %v3426_v58 }
 0xfab   : > { %v3485_v16 = vmul.f32 %v3469_v62, %v7072_v21  ;;  %v3470_v33 = vmul.f32 0.044715, %v3418_v41 }
 0xfac   : > { %v5100_v26 = vpop.eup %5099  ;;  %v3503_v32 = vmul.f32 %v3487_v9, %v3423_v56  ;;  %v3488_v28 = vmul.f32 %v3472_v0, %v3426_v58 }
 0xfad   : > { %v5102_v31 = vpop.eup %5101  ;;  %v3501_v43 = vmul.f32 %v3485_v16, %v7072_v21  ;;  %v3486_v14 = vmul.f32 %v3470_v33, %v3418_v41  ;;  %v3563_v17 = vadd.f32 1.0, %v5100_v26  ;;  %v3455_v16 = vmul.f32 0.5, %v3423_v56 }
 0xfae   : > { %v5104_v19 = vpop.eup %5103  ;;  %v3504_v54 = vmul.f32 %v3488_v28, %v3426_v58  ;;  %v3561_v59 = vadd.f32 1.0, %v5102_v31  ;;  %v3519_v50 = vadd.f32 %v3503_v32, %v3423_v56  ;;  %v3456_v33 = vmul.f32 0.5, %v3426_v58 }
 0xfaf   : > { %v5106_v12 = vpop.eup %5105  ;;  %v3502_v34 = vmul.f32 %v3486_v14, %v3418_v41  ;;  %v3564_v36 = vadd.f32 1.0, %v5104_v19  ;;  %v3517_v25 = vadd.f32 %v3501_v43, %v7072_v21  ;;  %v3579_v3 = vmul.f32 %v3563_v17, %v3451_v57 }
 0xfb0   : > { %v3562_v18 = vadd.f32 1.0, %v5106_v12  ;;  %v3520_v49 = vadd.f32 %v3504_v54, %v3426_v58  ;;  %v3535_v51 = vmul.f32 0.7978846, %v3519_v50  ;;  %v3577_v4 = vmul.f32 %v3561_v59, %v3449_v63 }
 0xfb1   : > { %v3580_v39 = vmul.f32 %v3564_v36, %v3452_v52  ;;  %v3518_v8 = vadd.f32 %v3502_v34, %v3418_v41  ;;  %v3533_v6 = vmul.f32 0.7978846, %v3517_v25  ;;  %v3453_v31 = vmul.f32 0.5, %v7072_v21 }
 0xfb2   : > { %v3578_v5 = vmul.f32 %v3562_v18, %v3450_v22  ;;  %v3536_v2 = vmul.f32 0.7978846, %v3520_v49  ;;  %5107 = vtanh.f32 %v3535_v51  ;;  %v3454_v43 = vmul.f32 0.5, %v3418_v41 }
 0xfb3   : > { %v3592_v27 = vpack.c.bf16 %v3580_v39, %v3579_v3  ;;  %v3534_v53 = vmul.f32 0.7978846, %v3518_v8  ;;  %5109 = vtanh.f32 %v3533_v6 }
 0xfb4   : > { %v3591_v45 = vpack.c.bf16 %v3578_v5, %v3577_v4  ;;  %5111 = vtanh.f32 %v3536_v2 }
 0xfb5   : > { %5113 = vtanh.f32 %v3534_v53 }
 0xfb6   : > { %4523 = vmatprep.mubr.bf16.mxu1 %v3591_v45 }
 0xfb7   : > { %4524 = vmatmul.mubr.bf16.gmra.mrb[80].mxu1 %v3592_v27 }
 0xfbc   : > { %v5108_v60 = vpop.eup %5107 }
 0xfbd   : > { %v5110_v55 = vpop.eup %5109  ;;  %v3567_v35 = vadd.f32 1.0, %v5108_v60  ;;  %v4501_v23 = vpop.f32.mrb[96].mxu0 }
 0xfbe   : > { %v5112_v29 = vpop.eup %5111  ;;  %v3565_v61 = vadd.f32 1.0, %v5110_v55  ;;  %v3439_v9 = vadd.f32 %v4501_v23, %v7036_v20  ;;  %v3430_v0 = vpop.f32.mrb[97].mxu0 }
 0xfbf   : > { %v5114_v62 = vpop.eup %5113  ;;  %v3568_v26 = vadd.f32 1.0, %v5112_v29  ;;  %v3431_v32 = vadd.f32 %v7036_v20, %v3430_v0  ;;  %v4502_v28 = vpop.f32.mrb[98].mxu0  ;;  %v3583_v54 = vmul.f32 %v3567_v35, %v3455_v16 }
 0xfc0   : > { %v3566_v14 = vadd.f32 1.0, %v5114_v62  ;;  %v3475_v57 = vmul.f32 0.044715, %v3439_v9  ;;  %v3442_v17 = vadd.f32 %v4502_v28, %v7036_v20  ;;  %v3433_v19 = vpop.f32.mrb[99].mxu0  ;;  %v3581_v12 = vmul.f32 %v3565_v61, %v3453_v31 }
 0xfc1   : > { %v3584_v63 = vmul.f32 %v3568_v26, %v3456_v33  ;;  %v3473_v59 = vmul.f32 0.044715, %v3431_v32  ;;  %v3434_v50 = vadd.f32 %v7036_v20, %v3433_v19  ;;  %v3459_v23 = vmul.f32 0.5, %v3439_v9  ;;  %v3995_v19 = vld [vmem:[%s7207_s9] ss:$0 sm:$0xff] }
 0xfc2   : > { %v3582_v56 = vmul.f32 %v3566_v14, %v3454_v43  ;;  %v3491_v58 = vmul.f32 %v3475_v57, %v3439_v9  ;;  %v3476_v34 = vmul.f32 0.044715, %v3442_v17  ;;  %v3460_v61 = vmul.f32 0.5, %v3442_v17 }
 0xfc3   : > { %v3594_v52 = vpack.c.bf16 %v3584_v63, %v3583_v54  ;;  %v3489_v36 = vmul.f32 %v3473_v59, %v3431_v32  ;;  %v3474_v25 = vmul.f32 0.044715, %v3434_v50  ;;  %v3457_v0 = vmul.f32 0.5, %v3431_v32 }
 0xfc4   : > { %v3593_v22 = vpack.c.bf16 %v3582_v56, %v3581_v12  ;;  %v3507_v21 = vmul.f32 %v3491_v58, %v3439_v9  ;;  %v3492_v41 = vmul.f32 %v3476_v34, %v3442_v17  ;;  %v3458_v16 = vmul.f32 0.5, %v3434_v50 }
 0xfc5   : > { %v3505_v18 = vmul.f32 %v3489_v36, %v3431_v32  ;;  %v3490_v49 = vmul.f32 %v3474_v25, %v3434_v50 }
 0xfc6   : > { %4527 = vmatprep.mubr.bf16.mxu1 %v3593_v22  ;;  %v3508_v51 = vmul.f32 %v3492_v41, %v3442_v17  ;;  %v3523_v3 = vadd.f32 %v3507_v21, %v3439_v9 }
 0xfc7   : > { %4528 = vmatmul.mubr.bf16.gmra.mrb[84].mxu1 %v3594_v52  ;;  %v3506_v39 = vmul.f32 %v3490_v49, %v3434_v50  ;;  %v3521_v8 = vadd.f32 %v3505_v18, %v3431_v32 }
 0xfc8   : > { %v3524_v6 = vadd.f32 %v3508_v51, %v3442_v17  ;;  %v3539_v20 = vmul.f32 0.7978846, %v3523_v3 }
 0xfc9   : > { %v3522_v4 = vadd.f32 %v3506_v39, %v3434_v50  ;;  %v3537_v5 = vmul.f32 0.7978846, %v3521_v8 }
 0xfca   : > { %v3540_v2 = vmul.f32 0.7978846, %v3524_v6  ;;  %5115 = vtanh.f32 %v3539_v20 }
 0xfcb   : > { %v3538_v27 = vmul.f32 0.7978846, %v3522_v4  ;;  %5117 = vtanh.f32 %v3537_v5 }
 0xfcc   : > { %5119 = vtanh.f32 %v3540_v2 }
 0xfcd   : > { %5121 = vtanh.f32 %v3538_v27 }
 0xfd4   : > { %v5116_v53 = vpop.eup %5115 }
 0xfd5   : > { %v5118_v45 = vpop.eup %5117  ;;  %v3571_v60 = vadd.f32 1.0, %v5116_v53 }
 0xfd6   : > { %v5120_v55 = vpop.eup %5119  ;;  %v3569_v35 = vadd.f32 1.0, %v5118_v45 }
 0xfd7   : > { %v5122_v29 = vpop.eup %5121  ;;  %v3572_v62 = vadd.f32 1.0, %v5120_v55  ;;  %v3587_v26 = vmul.f32 %v3571_v60, %v3459_v23 }
 0xfd8   : > { %v3570_v33 = vadd.f32 1.0, %v5122_v29  ;;  %v3585_v31 = vmul.f32 %v3569_v35, %v3457_v0 }
 0xfd9   : > { %v3588_v28 = vmul.f32 %v3572_v62, %v3460_v61 }
 0xfda   : > { %v3586_v43 = vmul.f32 %v3570_v33, %v3458_v16 }
 0xfdb   : > { %v3596_v14 = vpack.c.bf16 %v3588_v28, %v3587_v26 }
 0xfdc   : > { %v3595_v57 = vpack.c.bf16 %v3586_v43, %v3585_v31 }
 0xfde   : > { %4531 = vmatprep.mubr.bf16.mxu1 %v3595_v57 }
 0xfdf   : > { %4532 = vmatmul.mubr.bf16.gmra.mrb[88].mxu1 %v3596_v14 }
0x107a   : > { %v4521_v9 = vpop.f32.mrb[76].mxu1 }
0x107b   : > { %v3711_v17 = vadd.f32 %v4521_v9, %v3995_v19  ;;  %v3702_v32 = vpop.f32.mrb[77].mxu1 }
0x107c   : > { %v3703_v54 = vadd.f32 %v3995_v19, %v3702_v32  ;;  %v4522_v63 = vpop.f32.mrb[78].mxu1 }
0x107d   : > { %v3767_v59 = vadd.f32 %v3711_v17, %v6808_v47  ;;  %v3714_v50 = vadd.f32 %v4522_v63, %v3995_v19  ;;  %v3705_v12 = vpop.f32.mrb[79].mxu1 }
0x107e   : > { %v3765_v56 = vadd.f32 %v3703_v54, %v6813_v37  ;;  %v3706_v58 = vadd.f32 %v3995_v19, %v3705_v12 }
0x107f   : > { %3783 = vst.msk [vmem:[%s7097_s27 + $0x10] sm:$0xff] %vm381_vm0, %v3767_v59  ;;  %v3768_v34 = vadd.f32 %v3714_v50, %v6816_v48 }
0x1080   : > { %3781 = vst.msk [vmem:[%s7097_s27] sm:$0xff] %vm381_vm0, %v3765_v56  ;;  %v3766_v47 = vadd.f32 %v3706_v58, %v6821_v1 }
0x1081   : > { %3784 = vst.msk [vmem:[%s7097_s27 + $0x18] sm:$0xff] %vm381_vm0, %v3768_v34 }
0x1082   : > { %3782 = vst.msk [vmem:[%s7097_s27 + $0x8] sm:$0xff] %vm381_vm0, %v3766_v47 }
0x108a   : > { %v4525_v37 = vpop.f32.mrb[80].mxu1 }
0x108b   : > { %v3727_v52 = vadd.f32 %v4525_v37, %v3995_v19  ;;  %v3718_v36 = vpop.f32.mrb[81].mxu1 }
0x108c   : > { %v3719_v25 = vadd.f32 %v3995_v19, %v3718_v36  ;;  %v4526_v22 = vpop.f32.mrb[82].mxu1 }
0x108d   : > { %v3771_v21 = vadd.f32 %v3727_v52, %v6852_v42  ;;  %v3730_v41 = vadd.f32 %v4526_v22, %v3995_v19  ;;  %v3721_v48 = vpop.f32.mrb[83].mxu1 }
0x108e   : > { %v3769_v18 = vadd.f32 %v3719_v25, %v6861_v24  ;;  %v3722_v49 = vadd.f32 %v3995_v19, %v3721_v48 }
0x108f   : > { %3787 = vst.msk [vmem:[%s7097_s27 + $0x30] sm:$0xff] %vm381_vm0, %v3771_v21  ;;  %v3772_v1 = vadd.f32 %v3730_v41, %v6838_v13 }
0x1090   : > { %3785 = vst.msk [vmem:[%s7097_s27 + $0x20] sm:$0xff] %vm381_vm0, %v3769_v18  ;;  %v3770_v51 = vadd.f32 %v3722_v49, %v6847_v7 }
0x1091   : > { %3788 = vst.msk [vmem:[%s7097_s27 + $0x38] sm:$0xff] %vm381_vm0, %v3772_v1 }
0x1092   : > { %3786 = vst.msk [vmem:[%s7097_s27 + $0x28] sm:$0xff] %vm381_vm0, %v3770_v51 }
0x109a   : > { %v4529_v42 = vpop.f32.mrb[84].mxu1 }
0x109b   : > { %v3743_v3 = vadd.f32 %v4529_v42, %v3995_v19  ;;  %v3734_v24 = vpop.f32.mrb[85].mxu1 }
0x109c   : > { %v3735_v39 = vadd.f32 %v3995_v19, %v3734_v24  ;;  %v4530_v8 = vpop.f32.mrb[86].mxu1 }
0x109d   : > { %v3775_v6 = vadd.f32 %v3743_v3, %v6888_v40  ;;  %v3746_v13 = vadd.f32 %v4530_v8, %v3995_v19  ;;  %v3737_v20 = vpop.f32.mrb[87].mxu1 }
0x109e   : > { %v3773_v4 = vadd.f32 %v3735_v39, %v6897_v44  ;;  %v3738_v5 = vadd.f32 %v3995_v19, %v3737_v20 }
0x109f   : > { %3791 = vst.msk [vmem:[%s7097_s27 + $0x50] sm:$0xff] %vm381_vm0, %v3775_v6  ;;  %v3776_v7 = vadd.f32 %v3746_v13, %v6874_v10 }
0x10a0   : > { %3789 = vst.msk [vmem:[%s7097_s27 + $0x40] sm:$0xff] %vm381_vm0, %v3773_v4  ;;  %v3774_v2 = vadd.f32 %v3738_v5, %v6883_v38 }
0x10a1   : > { %3792 = vst.msk [vmem:[%s7097_s27 + $0x58] sm:$0xff] %vm381_vm0, %v3776_v7 }
0x10a2   : > { %3790 = vst.msk [vmem:[%s7097_s27 + $0x48] sm:$0xff] %vm381_vm0, %v3774_v2 }
0x10b2   : > { %v4533_v40 = vpop.f32.mrb[88].mxu1 }
0x10b3   : > { %v3759_v27 = vadd.f32 %v4533_v40, %v3995_v19  ;;  %v3750_v53 = vpop.f32.mrb[89].mxu1 }
0x10b4   : > { %v3751_v44 = vadd.f32 %v3995_v19, %v3750_v53  ;;  %v4534_v45 = vpop.f32.mrb[90].mxu1 }
0x10b5   : > { %v3779_v10 = vadd.f32 %v3759_v27, %v6922_v30  ;;  %v3762_v60 = vadd.f32 %v4534_v45, %v3995_v19  ;;  %v3753_v55 = vpop.f32.mrb[91].mxu1 }
0x10b6   : > { %v3777_v38 = vadd.f32 %v3751_v44, %v6927_v46  ;;  %v3754_v35 = vadd.f32 %v3995_v19, %v3753_v55 }
0x10b7   : > { %3795 = vst.msk [vmem:[%s7097_s27 + $0x70] sm:$0xff] %vm381_vm0, %v3779_v10  ;;  %v3780_v29 = vadd.f32 %v3762_v60, %v6930_v11 }
0x10b8   : > { %3793 = vst.msk [vmem:[%s7097_s27 + $0x60] sm:$0xff] %vm381_vm0, %v3777_v38  ;;  %v3778_v30 = vadd.f32 %v3754_v35, %v6935_v15 }
0x10b9   : > { %3796 = vst.msk [vmem:[%s7097_s27 + $0x78] sm:$0xff] %vm381_vm0, %v3780_v29 }
0x10ba   : > { %3794 = vst.msk [vmem:[%s7097_s27 + $0x68] sm:$0xff] %vm381_vm0, %v3778_v30 }
0x10bb   : > { %5152 = shalt.err (!%p5149_p3)
}
0x10bc   : > { %s5153_s11 = scalar_lea.hbm %s7143_s26, 2048  ;;  %s5157_s21 = scalar_lea.hbm %s7208_s10, 4096 }
0x10bd   : > { %p5154_p4 = scmp.ne.s32.totalorder %s7143_s26, %s5153_s11  ;;  %p5158_p9 = scmp.lt.u32.totalorder %s7143_s26, %s7208_s10 }
0x10be   : > { %p5159_p10 = scmp.lt.u32.totalorder %s5157_s21, %s5153_s11  ;;  %p5161_p12 = scmp.lt.u32.totalorder %s5153_s11, %s7143_s26 }
0x10bf   : > { %p5155_p7 = pnand %p5154_p4, %p5312_p5 }
0x10c0   : > { %p5160_p11 = por %p5159_p10, %p5158_p9 }
0x10c1   : > { %p5156_p8 = pneg %p5155_p7 }
0x10c2   : > { %p5162_p13 = por %p5161_p12, %p5160_p11 }
0x10c4   : > { %p5163_p0 = pnand %p5162_p13, %p5156_p8 }
0x10c6   : > { %5166 = shalt.err (!%p5163_p0)
}
0x10c7   : > { %s5218_s28 = smov 128  }
0x10c8   : > { %4583 = dma.vmem_to_hbm [thread:$0]  (%p5312_p5), %s7148_s18, 2048, %s7143_s26, %s7156_s17, %s5218_s28, %s5218_s28, %s5214_s25  }
0x10c9 PF: > { %p4589_p1 = scmp.ge.s32.totalorder %s5201_s16, 2  ;;  %s3827_s12 = sand.u32 1, %s5189_s13  }
0x10ca   : > { %s3828_s11 = scalar_lea.sflag [#allocation3], %s3827_s12 }
0x10cb   : > { %p4586_p2 = pnand %p4589_p1, %p5316_p6 }
0x10cd   : > { %5184 = dma.done.wait (!%p4586_p2), %s3828_s11, 2048  }
0x10ce   : > { %5186 = vsyncadd (!%p4586_p2), %s3828_s11, 4294965248  ;;  %p20_p3 = scmp.ge.s32.totalorder %s5299_s19, 4   ;;  %s7259_s13 = smov %s5193_s14 }
0x10cf   : > { %s7260_s14 = smov %s5197_s15  ;;  %s7261_s15 = smov %s5310_s22 }
0x10d0   : > { %s7262_s16 = smov %s5299_s19  ;;  %22 = sbr.rel (!%p20_p3) target bundleno = 3 (0x3), region = 98 }
0x10d7   :  { %3833 = vsyncpa [#allocation3], 1 }
0x10d8   :  { %3835 = vsyncpa [#allocation3 + $0x1], 1 }

</bundles_post_ra>
